<compile_context>
chip_gen: v7x
topology: tpu7x:2x2x1
jax: 0.10.0
libtpu: 0.0.40
codegen_flags: <defaults>
</compile_context>

<pallas_src>
import jax
import jax.numpy as jnp
from jax.experimental import pallas as pl
from jax.experimental.pallas import tpu as pltpu


def _round_up(v, m):
    return ((v + m - 1) // m) * m


def _pick_vmem_limit_bytes():
    """Generation-aware scoped-VMEM limit: ~3/4 of physical, clamped to 32-96 MiB."""
    try:
        cap = int(pltpu.get_tpu_info().vmem_capacity_bytes)
    except Exception:
        cap = 0
    if cap <= 0:
        return 32 * 1024 * 1024                       # known-safe fallback
    return max(32 * 1024 * 1024, min(96 * 1024 * 1024, (cap * 3) // 4))


# ---------------------------------------------------------------------------
# Wrapper: pad/concat, single fused pallas_call, slice the padded outputs
# ---------------------------------------------------------------------------
def prototypical_forward(support_clip, support_labels, query_clip, n_classes,
                         w1, b1, w2, b2, *, tile_m=512):
    ns, clip_dim = support_clip.shape
    nq = query_clip.shape[0]
    feat_dim = w2.shape[1]

    # Row layout (all 16-row aligned so bf16 sublane tiles stay aligned):
    #   [0, ns)               support rows
    #   [ns, ns_pad)          padding (label -1)
    #   [ns_pad, ns_pad+nq)   query rows
    #   [ns_pad+nq, n_pad)    padding (label -1)
    ns_pad = _round_up(max(ns, 1), 16)
    nq_pad = _round_up(max(nq, 1), 16)
    n_total = ns_pad + nq_pad
    tile_rows = n_total if n_total <= tile_m else _round_up(tile_m, 16)
    n_pad = _round_up(n_total, tile_rows)
    cp = _round_up(n_classes, 128)                    # lane-dense class axis

    # ---- padded bf16 input stream + per-row labels (-1 = not support) ------
    x = jnp.zeros((n_pad, clip_dim), jnp.bfloat16)
    x = x.at[:ns].set(support_clip.astype(jnp.bfloat16))
    x = x.at[ns_pad:ns_pad + nq].set(query_clip.astype(jnp.bfloat16))

    labels = jnp.full((1, n_pad), -1, jnp.int32)
    labels = labels.at[0, :ns].set(support_labels.astype(jnp.int32))

    w1b = w1.astype(jnp.bfloat16)
    w2b = w2.astype(jnp.bfloat16)
    b1f = b1.reshape(1, feat_dim).astype(jnp.float32)
    b2f = b2.reshape(1, feat_dim).astype(jnp.float32)

    # -----------------------------------------------------------------------
    # Fused kernel: encode tile -> bf16 VMEM scratch; accumulate per-tile
    # prototype sums; last step normalizes protos + query-only cdist logits.
    # -----------------------------------------------------------------------
    def kernel(labels_ref, x_ref, w1_ref, b1_ref, w2_ref, b2_ref,
               logits_ref, protos_ref, feats_ref, psum_ref, pcnt_ref):
        i = pl.program_id(0)

        @pl.when(i == 0)
        def _():
            psum_ref[...] = jnp.zeros_like(psum_ref)
            pcnt_ref[...] = jnp.zeros_like(pcnt_ref)

        # ---- feature_projector on this row tile (bf16 MXU, f32 accum) ------
        h = jnp.dot(x_ref[...], w1_ref[...],
                    preferred_element_type=jnp.float32) + b1_ref[...]
        h = jnp.maximum(h, 0.0)                 # ReLU (Dropout = identity @ eval)
        f = jnp.dot(h.astype(jnp.bfloat16), w2_ref[...],
                    preferred_element_type=jnp.float32) + b2_ref[...]

        # F.normalize(dim=-1, eps=1e-12) in f32 via EUP rsqrt, store bf16.
        n2 = jnp.sum(f * f, axis=-1, keepdims=True)
        feats = (f * jax.lax.rsqrt(jnp.maximum(n2, 1e-24))).astype(jnp.bfloat16)

        row0 = pl.multiple_of(i * tile_rows, tile_rows)
        feats_ref[pl.ds(row0, tile_rows), :] = feats

        # ---- per-tile prototype accumulation (hidden under the x DMA) ------
        labels_t = labels_ref[...]                                  # (1, tile_rows)
        class_ids = jax.lax.broadcasted_iota(jnp.int32, (cp, tile_rows), 0)
        onehot = (class_ids == labels_t).astype(jnp.float32)        # (cp, tile_rows)
        psum_ref[...] += jnp.dot(onehot.astype(jnp.bfloat16), feats,
                                 preferred_element_type=jnp.float32)
        pcnt_ref[...] += jnp.sum(onehot, axis=-1, keepdims=True)

        # ---- final step: normalize protos, query-only cdist -> logits ------
        @pl.when(i == pl.num_programs(0) - 1)
        def _():
            counts = pcnt_ref[...]                                  # (cp, 1)
            # empty classes stay at zero (matches torch.zeros init)
            protos = jnp.where(counts > 0.0,
                               psum_ref[...] / jnp.maximum(counts, 1.0), 0.0)
            protos_ref[...] = protos

            # ||p||^2 as a lane-dense (1, cp) row via a tiny ones-row matmul
            # (kept in f32: negligible MXU cost, preserves the norm exactly).
            ones_row = jnp.ones((1, feat_dim), jnp.float32)
            p2 = jax.lax.dot_general(ones_row, protos * protos,
                                     dimension_numbers=(((1,), (1,)), ((), ())),
                                     preferred_element_type=jnp.float32)

            # query rows are unit-norm (to bf16 precision):
            #   d^2 = 1 + ||p||^2 - 2 q.p   (clamped >= 0)
            q = feats_ref[pl.ds(ns_pad, nq_pad), :]                 # bf16, aligned
            qp = jax.lax.dot_general(q, protos.astype(jnp.bfloat16),
                                     dimension_numbers=(((1,), (1,)), ((), ())),
                                     preferred_element_type=jnp.float32)
            d2 = jnp.maximum(1.0 + p2 - 2.0 * qp, 0.0)
            logits_ref[...] = -jnp.sqrt(d2)

    grid = (n_pad // tile_rows,)

    logits_pad, protos_pad = pl.pallas_call(
        kernel,
        out_shape=(
            jax.ShapeDtypeStruct((nq_pad, cp), jnp.float32),        # query-only logits
            jax.ShapeDtypeStruct((cp, feat_dim), jnp.float32),
        ),
        grid=grid,
        in_specs=[
            pl.BlockSpec((1, tile_rows), lambda i: (0, i)),         # labels (per tile)
            pl.BlockSpec((tile_rows, clip_dim), lambda i: (i, 0)),  # x row tiles (bf16)
            pl.BlockSpec((clip_dim, feat_dim), lambda i: (0, 0)),   # W1 (resident)
            pl.BlockSpec((1, feat_dim), lambda i: (0, 0)),          # b1
            pl.BlockSpec((feat_dim, feat_dim), lambda i: (0, 0)),   # W2 (resident)
            pl.BlockSpec((1, feat_dim), lambda i: (0, 0)),          # b2
        ],
        out_specs=(
            pl.BlockSpec((nq_pad, cp), lambda i: (0, 0)),           # logits (resident)
            pl.BlockSpec((cp, feat_dim), lambda i: (0, 0)),         # prototypes
        ),
        scratch_shapes=[
            pltpu.VMEM((n_pad, feat_dim), jnp.bfloat16),            # on-chip feats
            pltpu.VMEM((cp, feat_dim), jnp.float32),                # prototype sums
            pltpu.VMEM((cp, 1), jnp.float32),                       # prototype counts
        ],
        compiler_params=pltpu.CompilerParams(
            # "arbitrary": the last step reads scratch written by all steps.
            dimension_semantics=("arbitrary",),
            vmem_limit_bytes=_pick_vmem_limit_bytes(),
        ),
    )(labels, x, w1b, b1f, w2b, b2f)

    logits = logits_pad[:nq, :n_classes]
    prototypes = protos_pad[:n_classes, :]
    return logits, prototypes


# ---------------------------------------------------------------------------
# Pure-JAX reference (same bf16-input / f32-accum MLP recipe) for sanity check
# ---------------------------------------------------------------------------
def _reference_forward(support_clip, support_labels, query_clip, n_classes,
                       w1, b1, w2, b2):
    def enc(x):
        h = jnp.dot(x.astype(jnp.bfloat16), w1.astype(jnp.bfloat16),
                    preferred_element_type=jnp.float32) + b1[None, :]
        h = jnp.maximum(h, 0.0)
        f = jnp.dot(h.astype(jnp.bfloat16), w2.astype(jnp.bfloat16),
                    preferred_element_type=jnp.float32) + b2[None, :]
        n = jnp.sqrt(jnp.sum(f * f, axis=-1, keepdims=True))
        return f / jnp.maximum(n, 1e-12)

    sf, qf = enc(support_clip), enc(query_clip)
    onehot = (support_labels[None, :].astype(jnp.int32)
              == jnp.arange(n_classes, dtype=jnp.int32)[:, None]).astype(jnp.float32)
    counts = onehot.sum(-1, keepdims=True)
    protos = jnp.where(counts > 0.0, (onehot @ sf) / jnp.maximum(counts, 1.0), 0.0)
    q2 = jnp.sum(qf * qf, axis=-1, keepdims=True)
    p2 = jnp.sum(protos * protos, axis=-1)[None, :]
    d2 = jnp.maximum(q2 + p2 - 2.0 * (qf @ protos.T), 0.0)
    return -jnp.sqrt(d2), protos


if __name__ == "__main__":
    key = jax.random.PRNGKey(0)
    # Small stand-in shapes (real CLIP ViT-B/32 would be clip_dim=512).
    clip_dim, feat_dim, n_classes = 128, 128, 5
    k = jax.random.split(key, 8)

    w1 = jax.random.normal(k[0], (clip_dim, feat_dim), jnp.float32) / jnp.sqrt(clip_dim)
    b1 = jax.random.normal(k[1], (feat_dim,), jnp.float32) * 0.01
    w2 = jax.random.normal(k[2], (feat_dim, feat_dim), jnp.float32) / jnp.sqrt(feat_dim)
    b2 = jax.random.normal(k[3], (feat_dim,), jnp.float32) * 0.01

    # Episode A: big enough to exercise multi-tile cross-step accumulation
    # (tile_m=256 -> 512 padded rows -> grid of 2 row tiles).
    ns_a, nq_a = 32, 480
    sup_a = jax.random.normal(k[4], (ns_a, clip_dim), jnp.float32)
    qry_a = jax.random.normal(k[5], (nq_a, clip_dim), jnp.float32)
    lab_a = jnp.arange(ns_a, dtype=jnp.int32) % n_classes
    logits_a, protos_a = prototypical_forward(
        sup_a, lab_a, qry_a, n_classes, w1, b1, w2, b2, tile_m=256)

    # Episode B: small 5-way / 5-shot episode (single-tile fast path).
    ns_b, nq_b = 25, 50
    sup_b = jax.random.normal(k[6], (ns_b, clip_dim), jnp.float32)
    qry_b = jax.random.normal(k[7], (nq_b, clip_dim), jnp.float32)
    lab_b = jnp.arange(ns_b, dtype=jnp.int32) % n_classes
    logits_b, protos_b = prototypical_forward(
        sup_b, lab_b, qry_b, n_classes, w1, b1, w2, b2)

    jax.block_until_ready((logits_a, protos_a, logits_b, protos_b))

    for lg, pr, sup, lab, qry, nq in (
            (logits_a, protos_a, sup_a, lab_a, qry_a, nq_a),
            (logits_b, protos_b, sup_b, lab_b, qry_b, nq_b)):
        assert lg.shape == (nq, n_classes)
        assert pr.shape == (n_classes, feat_dim)
        assert bool(jnp.all(jnp.isfinite(lg))) and bool(jnp.all(jnp.isfinite(pr)))
        ref_lg, ref_pr = _reference_forward(sup, lab, qry, n_classes, w1, b1, w2, b2)
        assert bool(jnp.allclose(lg, ref_lg, atol=1e-2, rtol=1e-2)), \
            ("logits mismatch", float(jnp.max(jnp.abs(lg - ref_lg))))
        assert bool(jnp.allclose(pr, ref_pr, atol=1e-2, rtol=1e-2)), \
            ("proto mismatch", float(jnp.max(jnp.abs(pr - ref_pr))))

    print("KERNEL_OK")
</pallas_src>

<mosaic_0001>
module attributes {stable_mosaic.version = 11 : i64} {
  func.func @kernel(%arg0: i32, %arg1: memref<1x256xi32, #tpu.memory_space<vmem>>, %arg2: memref<256x128xbf16, #tpu.memory_space<vmem>>, %arg3: memref<128x128xbf16, #tpu.memory_space<vmem>>, %arg4: memref<1x128xf32, #tpu.memory_space<vmem>>, %arg5: memref<128x128xbf16, #tpu.memory_space<vmem>>, %arg6: memref<1x128xf32, #tpu.memory_space<vmem>>, %arg7: memref<480x128xf32, #tpu.memory_space<vmem>>, %arg8: memref<128x128xf32, #tpu.memory_space<vmem>>, %arg9: memref<512x128xbf16, #tpu.memory_space<vmem>>, %arg10: memref<128x128xf32, #tpu.memory_space<vmem>>, %arg11: memref<128x1xf32, #tpu.memory_space<vmem>>) attributes {dimension_semantics = [#tpu.dimension_semantics<arbitrary>], iteration_bounds = array<i64: 2>, scalar_prefetch = 0 : i64, scratch_operands = 3 : i64, tpu.core_type = #tpu.core_type<tc>, window_params = [{transform_indices = @transform_0, window_bounds = array<i64: 1, 256>}, {transform_indices = @transform_1, window_bounds = array<i64: 256, 128>}, {pipeline_mode = #tpu.pipeline_mode<synchronous>, transform_indices = @transform_2, window_bounds = array<i64: 128, 128>}, {pipeline_mode = #tpu.pipeline_mode<synchronous>, transform_indices = @transform_3, window_bounds = array<i64: 1, 128>}, {pipeline_mode = #tpu.pipeline_mode<synchronous>, transform_indices = @transform_4, window_bounds = array<i64: 128, 128>}, {pipeline_mode = #tpu.pipeline_mode<synchronous>, transform_indices = @transform_5, window_bounds = array<i64: 1, 128>}, {pipeline_mode = #tpu.pipeline_mode<synchronous>, transform_indices = @transform_6, window_bounds = array<i64: 480, 128>}, {pipeline_mode = #tpu.pipeline_mode<synchronous>, transform_indices = @transform_7, window_bounds = array<i64: 128, 128>}]} {
    %c0_i32 = arith.constant 0 : i32
    %0 = arith.cmpi eq, %arg0, %c0_i32 : i32
    %1 = arith.extui %0 : i1 to i32
    %c0_i32_0 = arith.constant 0 : i32
    %2 = arith.cmpi ne, %1, %c0_i32_0 : i32
    scf.if %2 {
      %cst_28 = arith.constant 0.000000e+00 : f32
      %49 = vector.broadcast %cst_28 : f32 to vector<128x128xf32>
      %c0_29 = arith.constant 0 : index
      %c0_30 = arith.constant 0 : index
      %50 = vector.load %arg10[%c0_29, %c0_30] : memref<128x128xf32, #tpu.memory_space<vmem>>, vector<128x128xf32>
      tpu.vector_store %arg10[%c0_29, %c0_30], %49 {strides = array<i32>} : memref<128x128xf32, #tpu.memory_space<vmem>>, vector<128x128xf32>,
      %cst_31 = arith.constant 0.000000e+00 : f32
      %51 = vector.broadcast %cst_31 : f32 to vector<128x1xf32>
      %c0_32 = arith.constant 0 : index
      %c0_33 = arith.constant 0 : index
      %52 = vector.load %arg11[%c0_32, %c0_33] : memref<128x1xf32, #tpu.memory_space<vmem>>, vector<128x1xf32>
      tpu.vector_store %arg11[%c0_32, %c0_33], %51 {strides = array<i32>} : memref<128x1xf32, #tpu.memory_space<vmem>>, vector<128x1xf32>,
    } else {
    }
    %c0 = arith.constant 0 : index
    %c0_1 = arith.constant 0 : index
    %3 = vector.load %arg2[%c0, %c0_1] : memref<256x128xbf16, #tpu.memory_space<vmem>>, vector<256x128xbf16>
    %c0_2 = arith.constant 0 : index
    %c0_3 = arith.constant 0 : index
    %4 = vector.load %arg3[%c0_2, %c0_3] : memref<128x128xbf16, #tpu.memory_space<vmem>>, vector<128x128xbf16>
    %cst = arith.constant dense<0.000000e+00> : vector<256x128xf32>
    %5 = tpu.matmul %3, %4, %cst {dimension_numbers = #tpu.dot_dimension_numbers<[1], [0], [0], [1], [0, 0, 1, 1], [], []>} : vector<256x128xbf16>, vector<128x128xbf16>, vector<256x128xf32> -> vector<256x128xf32>
    %c0_4 = arith.constant 0 : index
    %c0_5 = arith.constant 0 : index
    %6 = vector.load %arg4[%c0_4, %c0_5] : memref<1x128xf32, #tpu.memory_space<vmem>>, vector<1x128xf32>
    %7 = vector.broadcast %6 : vector<1x128xf32> to vector<256x128xf32>
    %8 = arith.addf %5, %7 : vector<256x128xf32>
    %cst_6 = arith.constant 0.000000e+00 : f32
    %9 = vector.broadcast %cst_6 : f32 to vector<256x128xf32>
    %10 = arith.maximumf %8, %9 : vector<256x128xf32>
    %11 = arith.truncf %10 : vector<256x128xf32> to vector<256x128xbf16>
    %c0_7 = arith.constant 0 : index
    %c0_8 = arith.constant 0 : index
    %12 = vector.load %arg5[%c0_7, %c0_8] : memref<128x128xbf16, #tpu.memory_space<vmem>>, vector<128x128xbf16>
    %cst_9 = arith.constant dense<0.000000e+00> : vector<256x128xf32>
    %13 = tpu.matmul %11, %12, %cst_9 {dimension_numbers = #tpu.dot_dimension_numbers<[1], [0], [0], [1], [0, 0, 1, 1], [], []>} : vector<256x128xbf16>, vector<128x128xbf16>, vector<256x128xf32> -> vector<256x128xf32>
    %c0_10 = arith.constant 0 : index
    %c0_11 = arith.constant 0 : index
    %14 = vector.load %arg6[%c0_10, %c0_11] : memref<1x128xf32, #tpu.memory_space<vmem>>, vector<1x128xf32>
    %15 = vector.broadcast %14 : vector<1x128xf32> to vector<256x128xf32>
    %16 = arith.addf %13, %15 : vector<256x128xf32>
    %17 = arith.mulf %16, %16 : vector<256x128xf32>
    %cst_12 = arith.constant dense<0.000000e+00> : vector<256xf32>
    %18 = vector.multi_reduction <add>, %17, %cst_12 [1] : vector<256x128xf32> to vector<256xf32>
    %19 = vector.shape_cast %18 : vector<256xf32> to vector<256x1xf32>
    %cst_13 = arith.constant 1.000000e-24 : f32
    %20 = vector.broadcast %cst_13 : f32 to vector<256x1xf32>
    %21 = arith.maximumf %19, %20 : vector<256x1xf32>
    %22 = math.rsqrt %21 : vector<256x1xf32>
    %23 = vector.broadcast %22 : vector<256x1xf32> to vector<256x128xf32>
    %24 = arith.mulf %16, %23 : vector<256x128xf32>
    %25 = arith.truncf %24 : vector<256x128xf32> to vector<256x128xbf16>
    %c256_i32 = arith.constant 256 : i32
    %26 = arith.muli %arg0, %c256_i32 : i32
    %27 = tpu.assume_multiple %26, 256 : i32
    %28 = arith.index_cast %27 : i32 to index
    %c0_14 = arith.constant 0 : index
    %29 = vector.load %arg9[%28, %c0_14] : memref<512x128xbf16, #tpu.memory_space<vmem>>, vector<256x128xbf16>
    tpu.vector_store %arg9[%28, %c0_14], %25 {strides = array<i32>} : memref<512x128xbf16, #tpu.memory_space<vmem>>, vector<256x128xbf16>,
    %c0_15 = arith.constant 0 : index
    %c0_16 = arith.constant 0 : index
    %30 = vector.load %arg1[%c0_15, %c0_16] : memref<1x256xi32, #tpu.memory_space<vmem>>, vector<1x256xi32>
    %31 = tpu.iota {dimensions = array<i32: 0>} : vector<128x256xi32>
    %32 = vector.broadcast %30 : vector<1x256xi32> to vector<128x256xi32>
    %33 = arith.cmpi eq, %31, %32 : vector<128x256xi32>
    %34 = arith.extui %33 : vector<128x256xi1> to vector<128x256xi32>
    %35 = arith.sitofp %34 : vector<128x256xi32> to vector<128x256xf32>
    %c0_17 = arith.constant 0 : index
    %c0_18 = arith.constant 0 : index
    %36 = vector.load %arg10[%c0_17, %c0_18] : memref<128x128xf32, #tpu.memory_space<vmem>>, vector<128x128xf32>
    %37 = arith.truncf %35 : vector<128x256xf32> to vector<128x256xbf16>
    %cst_19 = arith.constant dense<0.000000e+00> : vector<128x128xf32>
    %38 = tpu.matmul %37, %25, %cst_19 {dimension_numbers = #tpu.dot_dimension_numbers<[1], [0], [0], [1], [0, 0, 1, 1], [], []>} : vector<128x256xbf16>, vector<256x128xbf16>, vector<128x128xf32> -> vector<128x128xf32>
    %39 = arith.addf %36, %38 : vector<128x128xf32>
    %c0_20 = arith.constant 0 : index
    %c0_21 = arith.constant 0 : index
    %40 = vector.load %arg10[%c0_20, %c0_21] : memref<128x128xf32, #tpu.memory_space<vmem>>, vector<128x128xf32>
    tpu.vector_store %arg10[%c0_20, %c0_21], %39 {strides = array<i32>} : memref<128x128xf32, #tpu.memory_space<vmem>>, vector<128x128xf32>,
    %c0_22 = arith.constant 0 : index
    %c0_23 = arith.constant 0 : index
    %41 = vector.load %arg11[%c0_22, %c0_23] : memref<128x1xf32, #tpu.memory_space<vmem>>, vector<128x1xf32>
    %cst_24 = arith.constant dense<0.000000e+00> : vector<128xf32>
    %42 = vector.multi_reduction <add>, %35, %cst_24 [1] : vector<128x256xf32> to vector<128xf32>
    %43 = vector.shape_cast %42 : vector<128xf32> to vector<128x1xf32>
    %44 = arith.addf %41, %43 : vector<128x1xf32>
    %c0_25 = arith.constant 0 : index
    %c0_26 = arith.constant 0 : index
    %45 = vector.load %arg11[%c0_25, %c0_26] : memref<128x1xf32, #tpu.memory_space<vmem>>, vector<128x1xf32>
    tpu.vector_store %arg11[%c0_25, %c0_26], %44 {strides = array<i32>} : memref<128x1xf32, #tpu.memory_space<vmem>>, vector<128x1xf32>,
    %c1_i32 = arith.constant 1 : i32
    %46 = arith.cmpi eq, %arg0, %c1_i32 : i32
    %47 = arith.extui %46 : i1 to i32
    %c0_i32_27 = arith.constant 0 : i32
    %48 = arith.cmpi ne, %47, %c0_i32_27 : i32
    scf.if %48 {
      %c0_28 = arith.constant 0 : index
      %c0_29 = arith.constant 0 : index
      %49 = vector.load %arg11[%c0_28, %c0_29] : memref<128x1xf32, #tpu.memory_space<vmem>>, vector<128x1xf32>
      %cst_30 = arith.constant 0.000000e+00 : f32
      %50 = vector.broadcast %cst_30 : f32 to vector<128x1xf32>
      %51 = arith.cmpf ogt, %49, %50 : vector<128x1xf32>
      %c0_31 = arith.constant 0 : index
      %c0_32 = arith.constant 0 : index
      %52 = vector.load %arg10[%c0_31, %c0_32] : memref<128x128xf32, #tpu.memory_space<vmem>>, vector<128x128xf32>
      %cst_33 = arith.constant 1.000000e+00 : f32
      %53 = vector.broadcast %cst_33 : f32 to vector<128x1xf32>
      %54 = arith.maximumf %49, %53 : vector<128x1xf32>
      %55 = vector.broadcast %54 : vector<128x1xf32> to vector<128x128xf32>
      %56 = arith.divf %52, %55 : vector<128x128xf32>
      %cst_34 = arith.constant 0.000000e+00 : f32
      %57 = vector.shape_cast %51 : vector<128x1xi1> to vector<128x1xi1>
      %58 = vector.broadcast %57 : vector<128x1xi1> to vector<128x128xi1>
      %59 = vector.broadcast %cst_34 : f32 to vector<128x128xf32>
      %60 = arith.select %58, %56, %59 : vector<128x128xi1>, vector<128x128xf32>
      %c0_35 = arith.constant 0 : index
      %c0_36 = arith.constant 0 : index
      %61 = vector.load %arg8[%c0_35, %c0_36] : memref<128x128xf32, #tpu.memory_space<vmem>>, vector<128x128xf32>
      tpu.vector_store %arg8[%c0_35, %c0_36], %60 {strides = array<i32>} : memref<128x128xf32, #tpu.memory_space<vmem>>, vector<128x128xf32>,
      %cst_37 = arith.constant 1.000000e+00 : f32
      %62 = vector.broadcast %cst_37 : f32 to vector<1x128xf32>
      %63 = arith.mulf %60, %60 : vector<128x128xf32>
      %cst_38 = arith.constant dense<0.000000e+00> : vector<1x128xf32>
      %64 = tpu.matmul %62, %63, %cst_38 {dimension_numbers = #tpu.dot_dimension_numbers<[1], [1], [0], [0], [0, 0, 1, 0], [], []>} : vector<1x128xf32>, vector<128x128xf32>, vector<1x128xf32> -> vector<1x128xf32>
      %c32 = arith.constant 32 : index
      %c0_39 = arith.constant 0 : index
      %65 = vector.load %arg9[%c32, %c0_39] : memref<512x128xbf16, #tpu.memory_space<vmem>>, vector<480x128xbf16>
      %66 = arith.truncf %60 : vector<128x128xf32> to vector<128x128xbf16>
      %cst_40 = arith.constant dense<0.000000e+00> : vector<480x128xf32>
      %67 = tpu.matmul %65, %66, %cst_40 {dimension_numbers = #tpu.dot_dimension_numbers<[1], [1], [0], [0], [0, 0, 1, 0], [], []>} : vector<480x128xbf16>, vector<128x128xbf16>, vector<480x128xf32> -> vector<480x128xf32>
      %cst_41 = arith.constant 1.000000e+00 : f32
      %68 = vector.broadcast %cst_41 : f32 to vector<1x128xf32>
      %69 = arith.addf %68, %64 : vector<1x128xf32>
      %cst_42 = arith.constant 2.000000e+00 : f32
      %70 = vector.broadcast %cst_42 : f32 to vector<480x128xf32>
      %71 = arith.mulf %70, %67 : vector<480x128xf32>
      %72 = vector.broadcast %69 : vector<1x128xf32> to vector<480x128xf32>
      %73 = arith.subf %72, %71 : vector<480x128xf32>
      %cst_43 = arith.constant 0.000000e+00 : f32
      %74 = vector.broadcast %cst_43 : f32 to vector<480x128xf32>
      %75 = arith.maximumf %73, %74 : vector<480x128xf32>
      %76 = math.sqrt %75 : vector<480x128xf32>
      %cst_44 = arith.constant 0.000000e+00 : f32
      %77 = vector.broadcast %cst_44 : f32 to vector<480x128xf32>
      %78 = arith.subf %77, %76 : vector<480x128xf32>
      %c0_45 = arith.constant 0 : index
      %c0_46 = arith.constant 0 : index
      %79 = vector.load %arg7[%c0_45, %c0_46] : memref<480x128xf32, #tpu.memory_space<vmem>>, vector<480x128xf32>
      tpu.vector_store %arg7[%c0_45, %c0_46], %78 {strides = array<i32>} : memref<480x128xf32, #tpu.memory_space<vmem>>, vector<480x128xf32>,
    } else {
    }
    return
  }
  func.func @transform_0(%arg0: i32) -> (i32, i32) {
    %c0_i32 = arith.constant 0 : i32
    %c0_i32_0 = arith.constant 0 : i32
    return %c0_i32, %arg0 : i32, i32
  }
  func.func @transform_1(%arg0: i32) -> (i32, i32) {
    %c0_i32 = arith.constant 0 : i32
    %c0_i32_0 = arith.constant 0 : i32
    return %arg0, %c0_i32 : i32, i32
  }
  func.func @transform_2(%arg0: i32) -> (i32, i32) {
    %c0_i32 = arith.constant 0 : i32
    %c0_i32_0 = arith.constant 0 : i32
    %c0_i32_1 = arith.constant 0 : i32
    return %c0_i32, %c0_i32_0 : i32, i32
  }
  func.func @transform_3(%arg0: i32) -> (i32, i32) {
    %c0_i32 = arith.constant 0 : i32
    %c0_i32_0 = arith.constant 0 : i32
    %c0_i32_1 = arith.constant 0 : i32
    return %c0_i32, %c0_i32_0 : i32, i32
  }
  func.func @transform_4(%arg0: i32) -> (i32, i32) {
    %c0_i32 = arith.constant 0 : i32
    %c0_i32_0 = arith.constant 0 : i32
    %c0_i32_1 = arith.constant 0 : i32
    return %c0_i32, %c0_i32_0 : i32, i32
  }
  func.func @transform_5(%arg0: i32) -> (i32, i32) {
    %c0_i32 = arith.constant 0 : i32
    %c0_i32_0 = arith.constant 0 : i32
    %c0_i32_1 = arith.constant 0 : i32
    return %c0_i32, %c0_i32_0 : i32, i32
  }
  func.func @transform_6(%arg0: i32) -> (i32, i32) {
    %c0_i32 = arith.constant 0 : i32
    %c0_i32_0 = arith.constant 0 : i32
    %c0_i32_1 = arith.constant 0 : i32
    return %c0_i32, %c0_i32_0 : i32, i32
  }
  func.func @transform_7(%arg0: i32) -> (i32, i32) {
    %c0_i32 = arith.constant 0 : i32
    %c0_i32_0 = arith.constant 0 : i32
    %c0_i32_1 = arith.constant 0 : i32
    return %c0_i32, %c0_i32_0 : i32, i32
  }
}

</mosaic_0001>

<bundles_post_ra>
// kernel: tpu_custom_call.1
= control target key start
LH: loop header
LB: loop body
LE: loop exit
PB: predicated region body
PF: predicated region fallthrough
CT: control target
= control target key end

     0   :  { %13 = vsyncpa [#allocation6], 0  ;;  %s6872_s0 = inlined_call_operand.hbm [shape: s32[1,512], index: 0, kind: input, shape index: {}]   ;;  %s6873_s1 = inlined_call_operand.hbm [shape: bf16[512,128], index: 1, kind: input, shape index: {}]   ;;  %s6874_s2 = inlined_call_operand.hbm [shape: bf16[128,128], index: 2, kind: input, shape index: {}]   ;;  %s6875_s3 = inlined_call_operand.vmem [shape: f32[1,128], index: 3, kind: input, shape index: {}]   ;;  %s6876_s4 = inlined_call_operand.hbm [shape: bf16[128,128], index: 4, kind: input, shape index: {}]   ;;  %s6877_s5 = inlined_call_operand.vmem [shape: f32[1,128], index: 5, kind: input, shape index: {}]   ;;  %s6878_s6 = inlined_call_operand.hbm [shape: f32[480,128], index: 6, kind: output, shape index: {0}]   ;;  %s6879_s7 = inlined_call_operand.hbm [shape: f32[128,128], index: 7, kind: output, shape index: {1}]  }
   0x1   :  { %15 = vsyncpa [#allocation6 + $0x1], 0 }
   0x2   :  { %16 = vsyncpa [#allocation9], 0 }
   0x3   :  { %18 = vsyncpa [#allocation9 + $0x1], 0 }
   0x4   :  { %19 = vsyncpa [#allocation12], 0 }
   0x5   :  { %20 = vsyncpa [#allocation7], 0 }
   0x6   :  { %21 = vsyncpa [#allocation15], 0  ;;  %s4383_s24 = smov 0   ;;  %s4385_s25 = smov 0  }
   0x7   :  { %s4387_s26 = smov 0   ;;  %s4389_s27 = smov 0  }
   0x8 LB: > { %s4402_s28 = sadd.s32 4294967295, %s4323_s27   ;;  %p47_p0 = scmp.ne.s32.totalorder %s4315_s25, %s4311_s24  ;;  %s4323_s27 = sphi %s4389_s27, %s7237_s27   ;;  %s4319_s26 = sphi %s4387_s26, %s7236_s26   ;;  %s4315_s25 = sphi %s4385_s25, %s7235_s25   ;;  %s4311_s24 = sphi %s4383_s24, %s7234_s24  }
   0x9   : > { %p6880_p1 = scmp.eq.s32.totalorder %s4402_s28, 0  ;;  %p3181_p2 = scmp.ge.s32.totalorder %s4323_s27, 1 }
   0xa   : > { %p210_p3 = scmp.lt.s32.totalorder %s4323_s27, 3  ;;  %s4325_s8 = smov [#allocation10]  }
   0xb   : > { %p4411_p5 = por %p6880_p1, %p47_p0  ;;  %s222_s9 = sshll.u32 %s4325_s8, 4  ;;  %s223_s9 = int_to_ptr.vmem [resolvable:$true] %s222_s9 }
   0xc   : > { %p4415_p6 = pnand %p3181_p2, %p210_p3  ;;  %s4326_s11 = smov [#allocation11]  }
   0xd   : > { %s6970_s29 = scalar_select %p4411_p5, 1, 0 }
   0xe   : > { %s6971_s30 = scalar_select %p4415_p6, 1, 0 }
   0xf   : > { %p3780_p7 = pneg %p4415_p6  ;;  %s238_s12 = sshll.u32 %s4326_s11, 4  ;;  %s4427_s12 = int_to_ptr.vmem [resolvable:$true] %s238_s12 }
  0x10   : > { %s4101_s15 = scalar_lea.hbm %s6874_s2, 1024 }
  0x11   : > { %p4423_p8 = pnand %p3780_p7, %p6880_p1  ;;  %p4102_p9 = scmp.ne.s32.totalorder %s6874_s2, %s4101_s15 }
  0x12   : > { %p4108_p13 = scmp.lt.u32.totalorder %s4101_s15, %s6874_s2 }
  0x13   : > { %p4103_p10 = pneg %p4423_p8 }
  0x15   : > { %p4104_p11 = pnand %p4103_p10, %p4102_p9 }
  0x17   : > { %p4105_p12 = pneg %p4104_p11 }
  0x19   : > { %p4110_p0 = pnand %p4108_p13, %p4105_p12 }
  0x1b   : > { %4113 = shalt.err (!%p4110_p0)
}
  0x1c   : > { %s4114_s20 = scalar_lea.vmem %s223_s9, 1024  ;;  %p4122_p4 = scmp.lt.s32.totalorder %s223_s9, %s223_s9 }
  0x1d   : > { %p4115_p2 = scmp.ne.s32.totalorder %s223_s9, %s4114_s20  ;;  %p4123_p1 = scmp.lt.s32.totalorder %s4114_s20, %s4114_s20 }
  0x1f   : > { %p4117_p3 = pnand %p4115_p2, %p4103_p10  ;;  %p4124_p5 = por %p4123_p1, %p4122_p4 }
  0x21   : > { %p4118_p7 = pneg %p4117_p3 }
  0x23   : > { %p4125_p6 = pnand %p4124_p5, %p4118_p7 }
  0x25   : > { %4128 = shalt.err (!%p4125_p6)
}
  0x26   : > { %s6883_s21 = smov 64   ;;  %s6884_s22 = smov 4  }
  0x27   : > { %3783 = dma.hbm_to_vmem [thread:$0]  (!%p4423_p8), %s6874_s2, 1024, %s223_s9, [#allocation9], %s6883_s21, %s6883_s21, %s6884_s22  }
  0x28   : > { %s4129_s13 = scalar_lea.hbm %s6876_s4, 1024 }
  0x29   : > { %p4130_p1 = scmp.ne.s32.totalorder %s6876_s4, %s4129_s13  ;;  %p4136_p6 = scmp.lt.u32.totalorder %s4129_s13, %s6876_s4 }
  0x2b   : > { %p4132_p4 = pnand %p4130_p1, %p4103_p10 }
  0x2d   : > { %p4133_p5 = pneg %p4132_p4 }
  0x2f   : > { %p4138_p9 = pnand %p4136_p6, %p4133_p5 }
  0x31   : > { %4141 = shalt.err (!%p4138_p9)
}
  0x32   : > { %s4142_s9 = scalar_lea.vmem %s4427_s12, 1024  ;;  %p4150_p0 = scmp.lt.s32.totalorder %s4427_s12, %s4427_s12 }
  0x33   : > { %p4143_p11 = scmp.ne.s32.totalorder %s4427_s12, %s4142_s9  ;;  %p4151_p2 = scmp.lt.s32.totalorder %s4142_s9, %s4142_s9 }
  0x35   : > { %p4145_p12 = pnand %p4143_p11, %p4103_p10  ;;  %p4152_p3 = por %p4151_p2, %p4150_p0 }
  0x37   : > { %p4146_p13 = pneg %p4145_p12 }
  0x39   : > { %p4153_p7 = pnand %p4152_p3, %p4146_p13 }
  0x3b   : > { %4156 = shalt.err (!%p4153_p7)
}
  0x3c   : > { %3786 = dma.hbm_to_vmem [thread:$0]  (!%p4423_p8), %s6876_s4, 1024, %s4427_s12, [#allocation12], %s6883_s21, %s6883_s21, %s6884_s22  }
  0x3d   : > { %s4483_s20 = sadd.s32 1, %s4323_s27   ;;  %s34_s10 = sadd.s32 1, %s4319_s26 }
  0x3e   : > { %s31_s23 = ssub.s32 %s4323_s27, %s4483_s20  ;;  %p41_p10 = scmp.ne.s32.totalorder %s4319_s26, %s4315_s25 }
  0x3f   : > { %p32_p1 = scmp.eq.s32.totalorder %s31_s23, 0  ;;  %p42_p4 = scmp.eq.s32.totalorder %s4323_s27, 0 }
  0x40   : > { %p3796_p5 = scmp.lt.s32.totalorder %s4323_s27, 2  ;;  %s4493_s24 = sand.u32 1, %s4319_s26  }
  0x41   : > { %s4496_s8 = scalar_select %p32_p1, %s4319_s26, %s34_s10  }
  0x42   : > { %p43_p6 = por %p42_p4, %p41_p10  ;;  %s3185_s11 = sshll.u32 %s4493_s24, 1 }
  0x43   : > { %s3328_s13 = sshll.u32 %s4323_s27, 5  ;;  %s259_s16 = scalar_lea.vmem [#allocation5], %s3185_s11 }
  0x44   : > { %s4503_s15 = scalar_lea.hbm %s6872_s0, %s3328_s13  ;;  %s267_s17 = sshll.u32 %s259_s16, 4  ;;  %s4509_s17 = int_to_ptr.vmem [resolvable:$true] %s267_s17 }
  0x45   : > { %p4505_p8 = pnand %p3796_p5, %p43_p6  ;;  %s3188_s18 = sshll.u32 %s4493_s24, 7 }
  0x46   : > { %s256_s19 = scalar_lea.sflag [#allocation6], %s4493_s24  ;;  %s4157_s10 = scalar_lea.hbm %s4503_s15, 32 }
  0x47   : > { %p4158_p9 = scmp.ne.s32.totalorder %s4503_s15, %s4157_s10  ;;  %p4159_p11 = pneg %p4505_p8 }
  0x48   : > { %s4162_s13 = scalar_lea.hbm %s6872_s0, 64  ;;  %p4163_p0 = scmp.lt.u32.totalorder %s4503_s15, %s6872_s0 }
  0x49   : > { %p4160_p12 = pnand %p4159_p11, %p4158_p9  ;;  %p4164_p2 = scmp.lt.u32.totalorder %s4162_s13, %s4157_s10 }
  0x4a   : > { %p4166_p7 = scmp.lt.u32.totalorder %s4157_s10, %s4503_s15 }
  0x4b   : > { %p4161_p13 = pneg %p4160_p12  ;;  %p4165_p3 = por %p4164_p2, %p4163_p0 }
  0x4d   : > { %p4167_p10 = por %p4166_p7, %p4165_p3 }
  0x4f   : > { %p4168_p1 = pnand %p4167_p10, %p4161_p13 }
  0x51   : > { %4171 = shalt.err (!%p4168_p1)
}
  0x52   : > { %s4172_s16 = scalar_lea.vmem %s4509_s17, 32  ;;  %s4329_s23 = smov [#allocation5]  }
  0x53   : > { %p4173_p4 = scmp.ne.s32.totalorder %s4509_s17, %s4172_s16  ;;  %s4177_s11 = sshll.u32 %s4329_s23, 4  ;;  %s4178_s11 = int_to_ptr.vmem [resolvable:$false] %s4177_s11 }
  0x54   : > { %s4179_s12 = scalar_lea.vmem %s4178_s11, 64  ;;  %p4180_p9 = scmp.lt.s32.totalorder %s4509_s17, %s4178_s11 }
  0x55   : > { %p4175_p5 = pnand %p4173_p4, %p4159_p11  ;;  %p4181_p12 = scmp.lt.s32.totalorder %s4179_s12, %s4172_s16 }
  0x57   : > { %p4176_p6 = pneg %p4175_p5  ;;  %p4182_p0 = por %p4181_p12, %p4180_p9 }
  0x59   : > { %p4183_p2 = pnand %p4182_p0, %p4176_p6 }
  0x5b   : > { %4186 = shalt.err (!%p4183_p2)
}
  0x5c   : > { %3790 = dma.hbm_to_vmem [thread:$0]  (!%p4505_p8), %s4503_s15, 32, %s4509_s17, %s256_s19  }
  0x5d   : > { %s278_s10 = scalar_lea.vmem [#allocation8], %s3188_s18  ;;  %s274_s14 = sand.u32 1, %s4323_s27  }
  0x5e   : > { %s285_s13 = sshll.u32 %s278_s10, 4  ;;  %s3329_s23 = sshll.u32 %s4323_s27, 11  ;;  %s4541_s13 = int_to_ptr.vmem [resolvable:$true] %s285_s13 }
  0x5f   : > { %s4547_s12 = scalar_lea.hbm %s6873_s1, %s3329_s23  ;;  %s4549_s21 = scalar_lea.sflag [#allocation9], %s274_s14 }
  0x60   : > { %s4187_s22 = scalar_lea.hbm %s4547_s12, 2048  ;;  %s4192_s27 = scalar_lea.hbm %s6873_s1, 4096 }
  0x61   : > { %p4188_p13 = scmp.ne.s32.totalorder %s4547_s12, %s4187_s22  ;;  %p4193_p10 = scmp.lt.u32.totalorder %s4547_s12, %s6873_s1 }
  0x62   : > { %p4194_p1 = scmp.lt.u32.totalorder %s4192_s27, %s4187_s22  ;;  %p4196_p5 = scmp.lt.u32.totalorder %s4187_s22, %s4547_s12 }
  0x63   : > { %p4190_p3 = pnand %p4188_p13, %p4159_p11 }
  0x64   : > { %p4195_p4 = por %p4194_p1, %p4193_p10 }
  0x65   : > { %p4191_p7 = pneg %p4190_p3 }
  0x66   : > { %p4197_p6 = por %p4196_p5, %p4195_p4 }
  0x68   : > { %p4198_p9 = pnand %p4197_p6, %p4191_p7 }
  0x6a   : > { %4201 = shalt.err (!%p4198_p9)
}
  0x6b   : > { %s4202_s19 = scalar_lea.vmem %s4541_s13, 2048  ;;  %s4330_s10 = smov [#allocation8]  }
  0x6c   : > { %p4203_p12 = scmp.ne.s32.totalorder %s4541_s13, %s4202_s19  ;;  %s4207_s14 = sshll.u32 %s4330_s10, 4  ;;  %s4208_s14 = int_to_ptr.vmem [resolvable:$false] %s4207_s14 }
  0x6d   : > { %s4209_s23 = scalar_lea.vmem %s4208_s14, 4096  ;;  %p4210_p13 = scmp.lt.s32.totalorder %s4541_s13, %s4208_s14 }
  0x6e   : > { %p4205_p0 = pnand %p4203_p12, %p4159_p11  ;;  %p4211_p3 = scmp.lt.s32.totalorder %s4209_s23, %s4202_s19 }
  0x70   : > { %p4206_p2 = pneg %p4205_p0  ;;  %p4212_p10 = por %p4211_p3, %p4210_p13 }
  0x72   : > { %p4213_p1 = pnand %p4212_p10, %p4206_p2 }
  0x74   : > { %4216 = shalt.err (!%p4213_p1)
}
  0x75   : > { %s6974_s22 = smov 4   ;;  %s6975_s16 = smov 64  }
  0x76   : > { %3793 = dma.hbm_to_vmem [thread:$0]  (!%p4505_p8), %s4547_s12, 2048, %s4541_s13, %s4549_s21, %s6975_s16, %s6975_s16, %s6974_s22  }
  0x77   : > { %p6976_p11 = scmp.ne.s32.totalorder %s6971_s30, 0 }
  0x79   : > { %297 = sbr.rel (%p6976_p11) target bundleno = 1850 (0x73a), region = 44 }
  0x80   : > { %s299_s11 = sand.u32 1, %s4315_s25   ;;  %p6977_p7 = scmp.ne.s32.totalorder %s6970_s29, 0 }
  0x81   : > { %s3192_s24 = sshll.u32 %s299_s11, 1  ;;  %s300_s15 = scalar_lea.sflag [#allocation6], %s299_s11 }
  0x82   : > { %s4581_s27 = scalar_lea.vmem [#allocation5], %s3192_s24 }
  0x83   : > { %4286 = dma.done.wait (%p6977_p7), %s300_s15, 32  }
  0x84   : > { %4288 = vsyncadd (%p6977_p7), %s300_s15, 4294967264  ;;  %s308_s9 = sand.u32 1, %s4402_s28   ;;  %s3193_s17 = sshll.u32 %s299_s11, 7 }
  0x85   : > { %s309_s21 = scalar_lea.sflag [#allocation9], %s308_s9  ;;  %s4588_s13 = scalar_lea.vmem [#allocation8], %s3193_s17 }
  0x86   : > { %4290 = dma.done.wait (%p6977_p7), %s309_s21, 2048  }
  0x87   : > { %4292 = vsyncadd (%p6977_p7), %s309_s21, 4294965248  ;;  %p6978_p8 = scmp.eq.s32.totalorder %s4402_s28, 0 }
  0x89   : > { %4294 = dma.done.wait (%p6978_p8), [#allocation9], 1024   ;;  %p6979_p4 = pmov %p6978_p8 }
  0x8b   : > { %4296 = vsyncadd (%p6979_p4), [#allocation9], 4294966272  ;;  %p6980_p5 = pmov %p6979_p4 }
  0x8c   : > { %p6981_p6 = pmov %p6979_p4 }
  0x8d   : > { %4298 = dma.done.wait (%p6980_p5), [#allocation12], 1024  }
  0x8e   : > { %4300 = vsyncadd (%p6981_p6), [#allocation12], 4294966272  ;;  %p6982_p9 = scmp.ne.s32.totalorder %s4402_s28, 0 }
  0x8f   : > { %vm374_vm0 = vcmask (!%p6982_p9), 7168   ;;  %v4331_v0 = vmov (!%p6982_p9), 0.0  }
  0x90   : > { %357 = sbr.rel (%p6982_p9) target bundleno = 160 (0xa0), region = 64  ;;  %358 = vst [vmem:[#allocation3] sm:$0xff] (!%p6982_p9), %v4331_v0  ;;  %359 = vst [vmem:[#allocation3 + $0x8] sm:$0xff] (!%p6982_p9), %v4331_v0 }
  0x91   : > { %360 = vst [vmem:[#allocation3 + $0x10] sm:$0xff] (!%p6982_p9), %v4331_v0  ;;  %361 = vst [vmem:[#allocation3 + $0x18] sm:$0xff] (!%p6982_p9), %v4331_v0 }
  0x92   : > { %362 = vst [vmem:[#allocation3 + $0x20] sm:$0xff] (!%p6982_p9), %v4331_v0  ;;  %363 = vst [vmem:[#allocation3 + $0x28] sm:$0xff] (!%p6982_p9), %v4331_v0 }
  0x93   : > { %364 = vst [vmem:[#allocation3 + $0x30] sm:$0xff] (!%p6982_p9), %v4331_v0  ;;  %365 = vst [vmem:[#allocation3 + $0x38] sm:$0xff] (!%p6982_p9), %v4331_v0 }
  0x94   : > { %366 = vst [vmem:[#allocation3 + $0x40] sm:$0xff] (!%p6982_p9), %v4331_v0  ;;  %367 = vst [vmem:[#allocation3 + $0x48] sm:$0xff] (!%p6982_p9), %v4331_v0 }
  0x95   : > { %368 = vst [vmem:[#allocation3 + $0x50] sm:$0xff] (!%p6982_p9), %v4331_v0  ;;  %369 = vst [vmem:[#allocation3 + $0x58] sm:$0xff] (!%p6982_p9), %v4331_v0 }
  0x96   : > { %370 = vst [vmem:[#allocation3 + $0x60] sm:$0xff] (!%p6982_p9), %v4331_v0  ;;  %371 = vst [vmem:[#allocation3 + $0x68] sm:$0xff] (!%p6982_p9), %v4331_v0 }
  0x97   : > { %372 = vst [vmem:[#allocation3 + $0x70] sm:$0xff] %v4331_v0  ;;  %373 = vst [vmem:[#allocation3 + $0x78] sm:$0xff] %v4331_v0 }
  0x98   : > { %375 = vst.msk [vmem:[#allocation4] sm:$0xff] %vm374_vm0, %v4331_v0  ;;  %376 = vst.msk [vmem:[#allocation4 + $0x8] sm:$0xff] %vm374_vm0, %v4331_v0 }
  0x99   : > { %377 = vst.msk [vmem:[#allocation4 + $0x10] sm:$0xff] %vm374_vm0, %v4331_v0  ;;  %378 = vst.msk [vmem:[#allocation4 + $0x18] sm:$0xff] %vm374_vm0, %v4331_v0 }
  0x9a   : > { %379 = vst.msk [vmem:[#allocation4 + $0x20] sm:$0xff] %vm374_vm0, %v4331_v0  ;;  %380 = vst.msk [vmem:[#allocation4 + $0x28] sm:$0xff] %vm374_vm0, %v4331_v0 }
  0x9b   : > { %381 = vst.msk [vmem:[#allocation4 + $0x30] sm:$0xff] %vm374_vm0, %v4331_v0  ;;  %382 = vst.msk [vmem:[#allocation4 + $0x38] sm:$0xff] %vm374_vm0, %v4331_v0 }
  0x9c   : > { %383 = vst.msk [vmem:[#allocation4 + $0x40] sm:$0xff] %vm374_vm0, %v4331_v0  ;;  %384 = vst.msk [vmem:[#allocation4 + $0x48] sm:$0xff] %vm374_vm0, %v4331_v0 }
  0x9d   : > { %385 = vst.msk [vmem:[#allocation4 + $0x50] sm:$0xff] %vm374_vm0, %v4331_v0  ;;  %386 = vst.msk [vmem:[#allocation4 + $0x58] sm:$0xff] %vm374_vm0, %v4331_v0 }
  0x9e   : > { %387 = vst.msk [vmem:[#allocation4 + $0x60] sm:$0xff] %vm374_vm0, %v4331_v0  ;;  %388 = vst.msk [vmem:[#allocation4 + $0x68] sm:$0xff] %vm374_vm0, %v4331_v0 }
  0x9f   : > { %389 = vst.msk [vmem:[#allocation4 + $0x70] sm:$0xff] %vm374_vm0, %v4331_v0  ;;  %390 = vst.msk [vmem:[#allocation4 + $0x78] sm:$0xff] %vm374_vm0, %v4331_v0 }
  0xa0 PF: > { %v3851_v1 = vld [vmem:[#allocation10] sm:$0xff]   ;;  %v3852_v2 = vld [vmem:[#allocation10 + $0x8] sm:$0xff]   ;;  %v3853_v3 = vld [vmem:[#allocation10 + $0x10] sm:$0xff]   ;;  %s3231_s19 = sshll.u32 %s4402_s28, 8  ;;  %p3297_p12 = scmp.ne.s32.totalorder %s4402_s28, 1 }
  0xa1   : > { %3497 = vmatprep.subr.bf16.mxu0 %v3851_v1  ;;  %3728 = vmatprep.subr.bf16.mxu1 %v3851_v1  ;;  %v3854_v4 = vld [vmem:[#allocation10 + $0x18] sm:$0xff]   ;;  %v3859_v5 = vld [vmem:[%s4588_s13] sm:$0xff]   ;;  %v3856_v7 = vld [vmem:[#allocation10 + $0x28] sm:$0xff]   ;;  %s5100_s10 = sshra.s32 %s3231_s19, 4 }
  0xa2   : > { %3498 = vmatpush3.bf16.msra.mxu0 %v3851_v1  ;;  %3736 = vmatpush3.bf16.msra.mxu1 %v3851_v1  ;;  %v3855_v6 = vld [vmem:[#allocation10 + $0x20] sm:$0xff]   ;;  %v3857_v9 = vld [vmem:[#allocation10 + $0x30] sm:$0xff]   ;;  %v3858_v10 = vld [vmem:[#allocation10 + $0x38] sm:$0xff]   ;;  %s3232_s14 = sshll.u32 %s5100_s10, 3 }
  0xa3   : > { %3499 = vmatprep.subr.bf16.mxu0 %v3852_v2  ;;  %3729 = vmatprep.subr.bf16.mxu1 %v3852_v2  ;;  %v3867_v8 = vld [vmem:[%s4588_s13 + $0x40] sm:$0xff]   ;;  %v3860_v11 = vld [vmem:[%s4588_s13 + $0x8] sm:$0xff]   ;;  %v3861_v14 = vld [vmem:[%s4588_s13 + $0x10] sm:$0xff]   ;;  %s5145_s23 = scalar_lea.vmem [#allocation2], %s3232_s14 }
  0xa4   : > { %3513 = vmatprep.mubr.bf16.mxu0 %v3859_v5  ;;  %3529 = vmatprep.mubr.bf16.mxu1 %v3867_v8  ;;  %v3875_v12 = vld [vmem:[#allocation11] sm:$0xff]   ;;  %v3868_v13 = vld [vmem:[%s4588_s13 + $0x48] sm:$0xff]   ;;  %v3869_v15 = vld [vmem:[%s4588_s13 + $0x50] sm:$0xff]  }
  0xa5   : > { %v3876_v16 = vld [vmem:[#allocation11 + $0x8] sm:$0xff]   ;;  %v3877_v17 = vld [vmem:[#allocation11 + $0x10] sm:$0xff]   ;;  %v3862_v18 = vld [vmem:[%s4588_s13 + $0x18] sm:$0xff]  }
  0xa6   : > { %3500 = vmatpush3.bf16.msra.mxu0 %v3852_v2  ;;  %3737 = vmatpush3.bf16.msra.mxu1 %v3852_v2  ;;  %v3870_v19 = vld [vmem:[%s4588_s13 + $0x58] sm:$0xff]   ;;  %v3863_v20 = vld [vmem:[%s4588_s13 + $0x20] sm:$0xff]   ;;  %v3864_v24 = vld [vmem:[%s4588_s13 + $0x28] sm:$0xff]  }
  0xa7   : > { %3501 = vmatprep.subr.bf16.mxu0 %v3853_v3  ;;  %3730 = vmatprep.subr.bf16.mxu1 %v3853_v3  ;;  %v3871_v21 = vld [vmem:[%s4588_s13 + $0x60] sm:$0xff]   ;;  %v3878_v22 = vld [vmem:[#allocation11 + $0x18] sm:$0xff]   ;;  %v3872_v25 = vld [vmem:[%s4588_s13 + $0x68] sm:$0xff]  }
  0xa8   : > { %v3879_v23 = vld [vmem:[#allocation11 + $0x20] sm:$0xff]   ;;  %v3865_v26 = vld [vmem:[%s4588_s13 + $0x30] sm:$0xff]   ;;  %v3880_v28 = vld [vmem:[#allocation11 + $0x28] sm:$0xff]  }
  0xa9   : > { %v3873_v27 = vld [vmem:[%s4588_s13 + $0x70] sm:$0xff]   ;;  %v3866_v29 = vld [vmem:[%s4588_s13 + $0x38] sm:$0xff]  }
  0xaa   : > { %3502 = vmatpush3.bf16.msra.mxu0 %v3853_v3  ;;  %3738 = vmatpush3.bf16.msra.mxu1 %v3853_v3  ;;  %v3874_v30 = vld [vmem:[%s4588_s13 + $0x78] sm:$0xff]   ;;  %v3881_v31 = vld [vmem:[#allocation11 + $0x30] sm:$0xff]  }
  0xab   : > { %3503 = vmatprep.subr.bf16.mxu0 %v3854_v4  ;;  %3731 = vmatprep.subr.bf16.mxu1 %v3854_v4  ;;  %v3882_v32 = vld [vmem:[#allocation11 + $0x38] sm:$0xff]  }
  0xac   : > { %v4639_v33 = vld [vmem:[%s6875_s3] ss:$0 sm:$0xff] }
  0xae   : > { %3504 = vmatpush3.bf16.msra.mxu0 %v3854_v4  ;;  %3739 = vmatpush3.bf16.msra.mxu1 %v3854_v4 }
  0xaf   : > { %3505 = vmatprep.subr.bf16.mxu0 %v3855_v6  ;;  %3732 = vmatprep.subr.bf16.mxu1 %v3855_v6 }
  0xb2   : > { %3506 = vmatpush3.bf16.msra.mxu0 %v3855_v6  ;;  %3740 = vmatpush3.bf16.msra.mxu1 %v3855_v6 }
  0xb3   : > { %3507 = vmatprep.subr.bf16.mxu0 %v3856_v7  ;;  %3733 = vmatprep.subr.bf16.mxu1 %v3856_v7 }
  0xb6   : > { %3508 = vmatpush3.bf16.msra.mxu0 %v3856_v7  ;;  %3741 = vmatpush3.bf16.msra.mxu1 %v3856_v7 }
  0xb7   : > { %3509 = vmatprep.subr.bf16.mxu0 %v3857_v9  ;;  %3734 = vmatprep.subr.bf16.mxu1 %v3857_v9 }
  0xba   : > { %3510 = vmatpush3.bf16.msra.mxu0 %v3857_v9  ;;  %3742 = vmatpush3.bf16.msra.mxu1 %v3857_v9 }
  0xbb   : > { %3511 = vmatprep.subr.bf16.mxu0 %v3858_v10  ;;  %3735 = vmatprep.subr.bf16.mxu1 %v3858_v10 }
  0xbe   : > { %3512 = vmatpush3.bf16.msra.mxu0 %v3858_v10  ;;  %3743 = vmatpush3.bf16.msra.mxu1 %v3858_v10 }
  0xbf   : > { %3545 = vmatprep.subr.bf16.mxu1 %v3875_v12 }
  0xc1   : > { %3514 = vmatmul.mubr.bf16.vlgmr.msra.gmra.mrb[0].mxu0 %v3860_v11  ;;  %3530 = vmatmul.mubr.bf16.vlgmr.msra.gmra.mrb[0].mxu1 %v3868_v13 }
  0xc2   : > { %3517 = vmatprep.mubr.bf16.mxu0 %v3861_v14  ;;  %3533 = vmatprep.mubr.bf16.mxu1 %v3869_v15 }
  0xc3   : > { %3546 = vmatpush3.bf16.msra.mxu1 %v3875_v12 }
  0xc4   : > { %3547 = vmatprep.subr.bf16.mxu1 %v3876_v16 }
  0xc7   : > { %3548 = vmatpush3.bf16.msra.mxu1 %v3876_v16 }
  0xc8   : > { %3549 = vmatprep.subr.bf16.mxu1 %v3877_v17 }
  0xc9   : > { %3518 = vmatmul.mubr.bf16.gmra.mrb[4].mxu0 %v3862_v18  ;;  %3534 = vmatmul.mubr.bf16.gmra.mrb[4].mxu1 %v3870_v19 }
  0xca   : > { %3521 = vmatprep.mubr.bf16.mxu0 %v3863_v20  ;;  %3537 = vmatprep.mubr.bf16.mxu1 %v3871_v21 }
  0xcb   : > { %3550 = vmatpush3.bf16.msra.mxu1 %v3877_v17 }
  0xcc   : > { %3551 = vmatprep.subr.bf16.mxu1 %v3878_v22 }
  0xcf   : > { %3552 = vmatpush3.bf16.msra.mxu1 %v3878_v22 }
  0xd0   : > { %3553 = vmatprep.subr.bf16.mxu1 %v3879_v23 }
  0xd1   : > { %3522 = vmatmul.mubr.bf16.gmra.mrb[8].mxu0 %v3864_v24  ;;  %3538 = vmatmul.mubr.bf16.gmra.mrb[8].mxu1 %v3872_v25 }
  0xd2   : > { %3525 = vmatprep.mubr.bf16.mxu0 %v3865_v26  ;;  %3541 = vmatprep.mubr.bf16.mxu1 %v3873_v27 }
  0xd3   : > { %3554 = vmatpush3.bf16.msra.mxu1 %v3879_v23 }
  0xd4   : > { %3555 = vmatprep.subr.bf16.mxu1 %v3880_v28 }
  0xd7   : > { %3556 = vmatpush3.bf16.msra.mxu1 %v3880_v28 }
  0xd8   : > { %3557 = vmatprep.subr.bf16.mxu1 %v3881_v31 }
  0xd9   : > { %3526 = vmatmul.mubr.bf16.gmra.mrb[12].mxu0 %v3866_v29  ;;  %3542 = vmatmul.mubr.bf16.gmra.mrb[12].mxu1 %v3874_v30 }
  0xdb   : > { %3558 = vmatpush3.bf16.msra.mxu1 %v3881_v31 }
  0xdc   : > { %3559 = vmatprep.subr.bf16.mxu1 %v3882_v32 }
  0xdf   : > { %3560 = vmatpush3.bf16.msra.mxu1 %v3882_v32 }
 0x194   : > { %v3515_v34 = vpop.f32.mrb[0].mxu0  ;;  %v3531_v35 = vpop.f32.mrb[0].mxu1 }
 0x195   : > { %v633_v36 = vadd.f32 %v3515_v34, %v4639_v33  ;;  %v624_v37 = vpop.f32.mrb[1].mxu0  ;;  %v697_v38 = vadd.f32 %v3531_v35, %v4639_v33  ;;  %v688_v39 = vpop.f32.mrb[1].mxu1 }
 0x196   : > { %v625_v40 = vadd.f32 %v4639_v33, %v624_v37  ;;  %v3516_v41 = vpop.f32.mrb[2].mxu0  ;;  %v689_v42 = vadd.f32 %v4639_v33, %v688_v39  ;;  %v3532_v43 = vpop.f32.mrb[2].mxu1 }
 0x197   : > { %v636_v44 = vadd.f32 %v3516_v41, %v4639_v33  ;;  %v627_v45 = vpop.f32.mrb[3].mxu0  ;;  %v769_v46 = vmax.f32 %v697_v38, 0.0  ;;  %v700_v47 = vadd.f32 %v3532_v43, %v4639_v33  ;;  %v691_v48 = vpop.f32.mrb[3].mxu1  ;;  %v753_v52 = vmax.f32 %v633_v36, 0.0 }
 0x198   : > { %v628_v49 = vadd.f32 %v4639_v33, %v627_v45  ;;  %v767_v50 = vmax.f32 %v689_v42, 0.0  ;;  %v692_v51 = vadd.f32 %v4639_v33, %v691_v48  ;;  %v751_v55 = vmax.f32 %v625_v40, 0.0 }
 0x199   : > { %v754_v53 = vmax.f32 %v636_v44, 0.0  ;;  %v770_v54 = vmax.f32 %v700_v47, 0.0 }
 0x19a   : > { %v752_v56 = vmax.f32 %v628_v49, 0.0  ;;  %v768_v57 = vmax.f32 %v692_v51, 0.0 }
 0x19b   : > { %v784_v58 = vpack.c.bf16 %v754_v53, %v753_v52  ;;  %v4649_v59 = vpack.c.bf16 %v770_v54, %v769_v46 }
 0x19c   : > { %v783_v60 = vpack.c.bf16 %v752_v56, %v751_v55  ;;  %v3519_v61 = vpop.f32.mrb[4].mxu0  ;;  %v4651_v62 = vpack.c.bf16 %v768_v57, %v767_v50  ;;  %v3535_v63 = vpop.f32.mrb[4].mxu1 }
 0x19d   : > { %v649_v0 = vadd.f32 %v3519_v61, %v4639_v33  ;;  %v640_v1 = vpop.f32.mrb[5].mxu0  ;;  %v713_v2 = vadd.f32 %v3535_v63, %v4639_v33  ;;  %v704_v3 = vpop.f32.mrb[5].mxu1 }
 0x19e   : > { %v641_v4 = vadd.f32 %v4639_v33, %v640_v1  ;;  %v3520_v5 = vpop.f32.mrb[6].mxu0  ;;  %3561 = vmatprep.mubr.bf16.mxu1 %v783_v60  ;;  %v705_v6 = vadd.f32 %v4639_v33, %v704_v3  ;;  %v3536_v7 = vpop.f32.mrb[6].mxu1 }
 0x19f   : > { %v652_v8 = vadd.f32 %v3520_v5, %v4639_v33  ;;  %v643_v9 = vpop.f32.mrb[7].mxu0  ;;  %3562 = vmatmul.mubr.bf16.vlgmr.msra.gmra.mrb[16].mxu1 %v784_v58  ;;  %v773_v10 = vmax.f32 %v713_v2, 0.0  ;;  %v716_v11 = vadd.f32 %v3536_v7, %v4639_v33  ;;  %v707_v12 = vpop.f32.mrb[7].mxu1  ;;  %v757_v16 = vmax.f32 %v649_v0, 0.0 }
 0x1a0   : > { %v644_v13 = vadd.f32 %v4639_v33, %v643_v9  ;;  %v771_v14 = vmax.f32 %v705_v6, 0.0  ;;  %v708_v15 = vadd.f32 %v4639_v33, %v707_v12  ;;  %v755_v19 = vmax.f32 %v641_v4, 0.0 }
 0x1a1   : > { %v758_v17 = vmax.f32 %v652_v8, 0.0  ;;  %v774_v18 = vmax.f32 %v716_v11, 0.0 }
 0x1a2   : > { %v756_v20 = vmax.f32 %v644_v13, 0.0  ;;  %v772_v21 = vmax.f32 %v708_v15, 0.0 }
 0x1a3   : > { %v786_v22 = vpack.c.bf16 %v758_v17, %v757_v16  ;;  %v4661_v23 = vpack.c.bf16 %v774_v18, %v773_v10 }
 0x1a4   : > { %v785_v24 = vpack.c.bf16 %v756_v20, %v755_v19  ;;  %v3523_v25 = vpop.f32.mrb[8].mxu0  ;;  %v4663_v26 = vpack.c.bf16 %v772_v21, %v771_v14  ;;  %v3539_v27 = vpop.f32.mrb[8].mxu1 }
 0x1a5   : > { %v665_v28 = vadd.f32 %v3523_v25, %v4639_v33  ;;  %v656_v29 = vpop.f32.mrb[9].mxu0  ;;  %v729_v30 = vadd.f32 %v3539_v27, %v4639_v33  ;;  %v720_v31 = vpop.f32.mrb[9].mxu1 }
 0x1a6   : > { %v657_v32 = vadd.f32 %v4639_v33, %v656_v29  ;;  %v3524_v34 = vpop.f32.mrb[10].mxu0  ;;  %3565 = vmatprep.mubr.bf16.mxu1 %v785_v24  ;;  %v721_v35 = vadd.f32 %v4639_v33, %v720_v31  ;;  %v3540_v36 = vpop.f32.mrb[10].mxu1 }
 0x1a7   : > { %v668_v37 = vadd.f32 %v3524_v34, %v4639_v33  ;;  %v659_v38 = vpop.f32.mrb[11].mxu0  ;;  %3566 = vmatmul.mubr.bf16.gmra.mrb[20].mxu1 %v786_v22  ;;  %v777_v39 = vmax.f32 %v729_v30, 0.0  ;;  %v732_v40 = vadd.f32 %v3540_v36, %v4639_v33  ;;  %v723_v41 = vpop.f32.mrb[11].mxu1  ;;  %v761_v45 = vmax.f32 %v665_v28, 0.0 }
 0x1a8   : > { %v660_v42 = vadd.f32 %v4639_v33, %v659_v38  ;;  %v775_v43 = vmax.f32 %v721_v35, 0.0  ;;  %v724_v44 = vadd.f32 %v4639_v33, %v723_v41  ;;  %v759_v48 = vmax.f32 %v657_v32, 0.0 }
 0x1a9   : > { %v762_v46 = vmax.f32 %v668_v37, 0.0  ;;  %v778_v47 = vmax.f32 %v732_v40, 0.0 }
 0x1aa   : > { %v760_v49 = vmax.f32 %v660_v42, 0.0  ;;  %v776_v50 = vmax.f32 %v724_v44, 0.0 }
 0x1ab   : > { %v788_v51 = vpack.c.bf16 %v762_v46, %v761_v45  ;;  %v796_v52 = vpack.c.bf16 %v778_v47, %v777_v39 }
 0x1ac   : > { %v787_v53 = vpack.c.bf16 %v760_v49, %v759_v48  ;;  %v3527_v54 = vpop.f32.mrb[12].mxu0  ;;  %v795_v55 = vpack.c.bf16 %v776_v50, %v775_v43  ;;  %v3543_v56 = vpop.f32.mrb[12].mxu1 }
 0x1ad   : > { %v681_v57 = vadd.f32 %v3527_v54, %v4639_v33  ;;  %v672_v58 = vpop.f32.mrb[13].mxu0  ;;  %v745_v60 = vadd.f32 %v3543_v56, %v4639_v33  ;;  %v736_v61 = vpop.f32.mrb[13].mxu1 }
 0x1ae   : > { %v673_v63 = vadd.f32 %v4639_v33, %v672_v58  ;;  %v3528_v0 = vpop.f32.mrb[14].mxu0  ;;  %3569 = vmatprep.mubr.bf16.mxu1 %v787_v53  ;;  %v737_v1 = vadd.f32 %v4639_v33, %v736_v61  ;;  %v3544_v2 = vpop.f32.mrb[14].mxu1 }
 0x1af   : > { %v684_v3 = vadd.f32 %v3528_v0, %v4639_v33  ;;  %v675_v4 = vpop.f32.mrb[15].mxu0  ;;  %3570 = vmatmul.mubr.bf16.gmra.mrb[24].mxu1 %v788_v51  ;;  %v781_v5 = vmax.f32 %v745_v60, 0.0  ;;  %v748_v6 = vadd.f32 %v3544_v2, %v4639_v33  ;;  %v739_v7 = vpop.f32.mrb[15].mxu1  ;;  %v765_v11 = vmax.f32 %v681_v57, 0.0 }
 0x1b0   : > { %v676_v8 = vadd.f32 %v4639_v33, %v675_v4  ;;  %v779_v9 = vmax.f32 %v737_v1, 0.0  ;;  %v740_v10 = vadd.f32 %v4639_v33, %v739_v7  ;;  %v763_v14 = vmax.f32 %v673_v63, 0.0  ;;  %v4688_v33 = vld [vmem:[%s6877_s5] ss:$0 sm:$0xff] }
 0x1b1   : > { %v766_v12 = vmax.f32 %v684_v3, 0.0  ;;  %v782_v13 = vmax.f32 %v748_v6, 0.0 }
 0x1b2   : > { %v764_v15 = vmax.f32 %v676_v8, 0.0  ;;  %v780_v16 = vmax.f32 %v740_v10, 0.0 }
 0x1b3   : > { %v790_v17 = vpack.c.bf16 %v766_v12, %v765_v11  ;;  %v798_v18 = vpack.c.bf16 %v782_v13, %v781_v5 }
 0x1b4   : > { %v789_v19 = vpack.c.bf16 %v764_v15, %v763_v14  ;;  %v797_v20 = vpack.c.bf16 %v780_v16, %v779_v9 }
 0x1b6   : > { %3573 = vmatprep.mubr.bf16.mxu1 %v789_v19 }
 0x1b7   : > { %3574 = vmatmul.mubr.bf16.gmra.mrb[28].mxu1 %v790_v17 }
 0x1b8   : > { %3577 = vmatprep.mubr.bf16.mxu1 %v4651_v62 }
 0x1bf   : > { %3578 = vmatmul.mubr.bf16.gmra.mrb[32].mxu1 %v4649_v59 }
 0x1c0   : > { %3581 = vmatprep.mubr.bf16.mxu1 %v4663_v26 }
 0x1c7   : > { %3582 = vmatmul.mubr.bf16.gmra.mrb[36].mxu1 %v4661_v23 }
 0x1c8   : > { %3585 = vmatprep.mubr.bf16.mxu1 %v795_v55 }
 0x1cf   : > { %3586 = vmatmul.mubr.bf16.gmra.mrb[40].mxu1 %v796_v52 }
 0x1d0   : > { %3589 = vmatprep.mubr.bf16.mxu1 %v797_v20 }
 0x1d7   : > { %3590 = vmatmul.mubr.bf16.gmra.mrb[44].mxu1 %v798_v18 }
 0x272   : > { %v3563_v21 = vpop.f32.mrb[16].mxu1 }
 0x273   : > { %v4691_v22 = vadd.f32 %v3563_v21, %v4688_v33  ;;  %v904_v62 = vpop.f32.mrb[17].mxu1 }
 0x274   : > { %v4694_v59 = vadd.f32 %v4688_v33, %v904_v62  ;;  %v3564_v24 = vpop.f32.mrb[18].mxu1 }
 0x275   : > { %v907_v25 = vpop.f32.mrb[19].mxu1  ;;  %v1033_v23 = vmul.f32 %v4691_v22, %v4691_v22  ;;  %v4699_v26 = vadd.f32 %v3564_v24, %v4688_v33 }
 0x276   : > { %v1031_v27 = vmul.f32 %v4694_v59, %v4694_v59  ;;  %v4704_v28 = vadd.f32 %v4688_v33, %v907_v25 }
 0x277   : > { %1067 = vadd.xlane.f32.xlu0 %v1033_v23  ;;  %v1034_v30 = vmul.f32 %v4699_v26, %v4699_v26 }
 0x278   : > { %1063 = vadd.xlane.f32.xlu1 %v1031_v27  ;;  %v1032_v39 = vmul.f32 %v4704_v28, %v4704_v28 }
 0x27a   : > { %v3567_v29 = vpop.f32.mrb[20].mxu1 }
 0x27b   : > { %v4709_v31 = vadd.f32 %v3567_v29, %v4688_v33  ;;  %v920_v32 = vpop.f32.mrb[21].mxu1 }
 0x27c   : > { %v3568_v34 = vpop.f32.mrb[22].mxu1  ;;  %1069 = vadd.xlane.f32.xlu1 %v1034_v30  ;;  %v4712_v35 = vadd.f32 %v4688_v33, %v920_v32 }
 0x27d   : > { %v923_v36 = vpop.f32.mrb[23].mxu1  ;;  %v1037_v37 = vmul.f32 %v4709_v31, %v4709_v31  ;;  %v4717_v38 = vadd.f32 %v3568_v34, %v4688_v33 }
 0x27e   : > { %v1035_v40 = vmul.f32 %v4712_v35, %v4712_v35  ;;  %v4724_v41 = vadd.f32 %v4688_v33, %v923_v36 }
 0x27f   : > { %1075 = vadd.xlane.f32.xlu0 %v1037_v37  ;;  %v1038_v43 = vmul.f32 %v4717_v38, %v4717_v38 }
 0x280   : > { %1065 = vadd.xlane.f32.xlu1 %v1032_v39  ;;  %v1036_v51 = vmul.f32 %v4724_v41, %v4724_v41 }
 0x282   : > { %v3571_v42 = vpop.f32.mrb[24].mxu1 }
 0x283   : > { %v4729_v44 = vadd.f32 %v3571_v42, %v4688_v33  ;;  %v936_v45 = vpop.f32.mrb[25].mxu1  ;;  %1071 = vadd.xlane.f32.xlu0 %v1035_v40 }
 0x284   : > { %v3572_v46 = vpop.f32.mrb[26].mxu1  ;;  %1077 = vadd.xlane.f32.xlu1 %v1038_v43  ;;  %v4732_v47 = vadd.f32 %v4688_v33, %v936_v45 }
 0x285   : > { %v939_v48 = vpop.f32.mrb[27].mxu1  ;;  %v1041_v49 = vmul.f32 %v4729_v44, %v4729_v44  ;;  %v4737_v50 = vadd.f32 %v3572_v46, %v4688_v33 }
 0x286   : > { %v1039_v52 = vmul.f32 %v4732_v47, %v4732_v47  ;;  %v4744_v53 = vadd.f32 %v4688_v33, %v939_v48 }
 0x287   : > { %1083 = vadd.xlane.f32.xlu0 %v1041_v49  ;;  %v1042_v55 = vmul.f32 %v4737_v50, %v4737_v50 }
 0x288   : > { %1073 = vadd.xlane.f32.xlu1 %v1036_v51  ;;  %v1040_v63 = vmul.f32 %v4744_v53, %v4744_v53 }
 0x28a   : > { %v3575_v54 = vpop.f32.mrb[28].mxu1 }
 0x28b   : > { %v4749_v56 = vadd.f32 %v3575_v54, %v4688_v33  ;;  %v952_v57 = vpop.f32.mrb[29].mxu1  ;;  %1079 = vadd.xlane.f32.xlu0 %v1039_v52 }
 0x28c   : > { %v3576_v58 = vpop.f32.mrb[30].mxu1  ;;  %1085 = vadd.xlane.f32.xlu1 %v1042_v55  ;;  %v4824_v51 = vadd.f32 %v4688_v33, %v952_v57 }
 0x28d   : > { %6983 = vst [vmem:[#allocation22_spill] sm:$0xff] %v4749_v56  ;;  %v4752_v60 = vadd.f32 %v3576_v58, %v4688_v33  ;;  %v955_v61 = vpop.f32.mrb[31].mxu1 }
 0x28e   : > { %v4813_v42 = vadd.f32 %v4688_v33, %v955_v61  ;;  %v1043_v57 = vmul.f32 %v4824_v51, %v4824_v51 }
 0x28f   : > { %6984 = vst [vmem:[#allocation23_spill] sm:$0xff] %v4752_v60 }
 0x290   : > { %1081 = vadd.xlane.f32.xlu1 %v1040_v63  ;;  %v1044_v61 = vmul.f32 %v4813_v42, %v4813_v42 }
 0x292   : > { %v3579_v0 = vpop.f32.mrb[32].mxu1 }
 0x293   : > { %v4757_v1 = vadd.f32 %v3579_v0, %v4688_v33  ;;  %v968_v2 = vpop.f32.mrb[33].mxu1 }
 0x294   : > { %v3580_v3 = vpop.f32.mrb[34].mxu1  ;;  %v4760_v4 = vadd.f32 %v4688_v33, %v968_v2 }
 0x295   : > { %v4763_v5 = vadd.f32 %v3580_v3, %v4688_v33  ;;  %v971_v6 = vpop.f32.mrb[35].mxu1  ;;  %v1049_v7 = vmul.f32 %v4757_v1, %v4757_v1  ;;  %v1046_v3 = vmul.f32 %v4752_v60, %v4752_v60 }
 0x296   : > { %v4770_v9 = vadd.f32 %v4688_v33, %v971_v6  ;;  %v1047_v10 = vmul.f32 %v4760_v4, %v4760_v4  ;;  %v1045_v6 = vmul.f32 %v4749_v56, %v4749_v56 }
 0x297   : > { %1099 = vadd.xlane.f32.xlu0 %v1049_v7  ;;  %v1050_v8 = vmul.f32 %v4763_v5, %v4763_v5  ;;  %v1261_v7 = vlaneseq }
 0x298   : > { %v1048_v17 = vmul.f32 %v4770_v9, %v4770_v9 }
 0x299   : > { %1101 = vadd.xlane.f32.xlu1 %v1050_v8  ;;  %v4850_v8 = vshrl.u32 %v1261_v7, 7  ;;  %v7018_v7 = vmov 0 }
 0x29a   : > { %v3583_v11 = vpop.f32.mrb[36].mxu1 }
 0x29b   : > { %v984_v12 = vpop.f32.mrb[37].mxu1  ;;  %1095 = vadd.xlane.f32.xlu0 %v1047_v10  ;;  %v4775_v14 = vadd.f32 %v3583_v11, %v4688_v33  ;;  %6987 = vst [vmem:[#allocation26_spill] sm:$0xff] %v4850_v8  ;;  %v1284_v10 = vsub.s32 1, %v4850_v8  ;;  %v1260_v11 = vld [vmem:[%s4581_s27] sm:$0x3] }
 0x29c   : > { %v3584_v13 = vpop.f32.mrb[38].mxu1  ;;  %v4788_v20 = vadd.f32 %v4688_v33, %v984_v12  ;;  %v6904_v12 = vsub.s32 0, %v4850_v8 }
 0x29d   : > { %v4778_v15 = vadd.f32 %v3584_v13, %v4688_v33  ;;  %v987_v16 = vpop.f32.mrb[39].mxu1  ;;  %v1053_v21 = vmul.f32 %v4775_v14, %v4775_v14  ;;  %v4856_v13 = vadd.s32 8, %v4850_v8 }
 0x29e   : > { %v4783_v18 = vadd.f32 %v4688_v33, %v987_v16  ;;  %v1051_v32 = vmul.f32 %v4788_v20, %v4788_v20  ;;  %v4858_v16 = vrot.slane %v1260_v11, %v1284_v10 }
 0x29f   : > { %1097 = vadd.xlane.f32.xlu0 %v1048_v17  ;;  %v1054_v19 = vmul.f32 %v4778_v15, %v4778_v15  ;;  %v4862_v17 = vrot.slane %v1260_v11, %v6904_v12  ;;  %v5060_v12 = vadd.s32 96, %v4850_v8 }
 0x2a0   : > { %v1052_v25 = vmul.f32 %v4783_v18, %v4783_v18  ;;  %vm6903_vm1 = vcmp.eq.s32.totalorder %v4850_v8, %v4858_v16  ;;  %vm6897_vm2 = vcmp.eq.s32.totalorder %v4856_v13, %v4858_v16 }
 0x2a1   : > { %1109 = vadd.xlane.f32.xlu1 %v1054_v19  ;;  %vm6900_vm3 = vcmp.eq.s32.totalorder %v4856_v13, %v4862_v17  ;;  %vm3265_vm4 = vmpackc.low %vm6897_vm2, %vm6903_vm1  ;;  %vm6911_vm5 = vcmp.eq.s32.totalorder %v4850_v8, %v4862_v17  ;;  %v6905_v19 = vmov 1.0|1.0  }
 0x2a2   : > { %v3587_v62 = vpop.f32.mrb[40].mxu1  ;;  %3266 = vmatprep.mubr.msk.bf16.mxu0 %vm3265_vm4, %v6905_v19  ;;  %vm4885_vm6 = vmpackc.low %vm6900_vm3, %vm6911_vm5 }
 0x2a3   : > { %v1000_v24 = vpop.f32.mrb[41].mxu1  ;;  %1107 = vadd.xlane.f32.xlu0 %v1053_v21  ;;  %v4795_v27 = vadd.f32 %v3587_v62, %v4688_v33  ;;  %v6988_v21 = vmov 0  ;;  %v4890_v62 = vadd.s32 16, %v4850_v8 }
 0x2a4   : > { %v3588_v23 = vpop.f32.mrb[42].mxu1  ;;  %v4808_v37 = vadd.f32 %v4688_v33, %v1000_v24  ;;  %v6989_v21 = vsel %vm4885_vm6, 4294967295, %v6988_v21  ;;  %v4893_v24 = vadd.s32 24, %v4850_v8 }
 0x2a5   : > { %v4798_v29 = vadd.f32 %v3588_v23, %v4688_v33  ;;  %v1003_v30 = vpop.f32.mrb[43].mxu1  ;;  %1105 = vadd.xlane.f32.xlu1 %v1052_v25  ;;  %v1057_v39 = vmul.f32 %v4795_v27, %v4795_v27  ;;  %6990 = vst [vmem:[#allocation27_spill] sm:$0xff] %v6989_v21  ;;  %vm6891_vm7 = vcmp.eq.s32.totalorder %v4890_v62, %v4858_v16  ;;  %v6991_v25 = vmov 0 }
 0x2a6   : > { %v4803_v34 = vadd.f32 %v4688_v33, %v1003_v30  ;;  %v1055_v55 = vmul.f32 %v4808_v37, %v4808_v37  ;;  %vm6885_vm8 = vcmp.eq.s32.totalorder %v4893_v24, %v4858_v16  ;;  %vm6894_vm9 = vcmp.eq.s32.totalorder %v4890_v62, %v4862_v17 }
 0x2a7   : > { %1103 = vadd.xlane.f32.xlu0 %v1051_v32  ;;  %v1058_v36 = vmul.f32 %v4798_v29, %v4798_v29  ;;  %vm6888_vm10 = vcmp.eq.s32.totalorder %v4893_v24, %v4862_v17  ;;  %vm4909_vm11 = vmpackc.low %vm6885_vm8, %vm6891_vm7  ;;  %v6994_v23 = vmov 0  ;;  %v4924_v30 = vadd.s32 32, %v4850_v8 }
 0x2a8   : > { %v1056_v46 = vmul.f32 %v4803_v34, %v4803_v34  ;;  %v6992_v25 = vsel %vm4909_vm11, 4294967295, %v6991_v25  ;;  %vm4919_vm12 = vmpackc.low %vm6888_vm10, %vm6894_vm9  ;;  %v4927_v32 = vadd.s32 40, %v4850_v8 }
 0x2a9   : > { %1117 = vadd.xlane.f32.xlu1 %v1058_v36  ;;  %6993 = vst [vmem:[#allocation28_spill] sm:$0xff] %v6992_v25  ;;  %v6995_v23 = vsel %vm4919_vm12, 4294967295, %v6994_v23  ;;  %vm6887_vm13 = vcmp.eq.s32.totalorder %v4924_v30, %v4858_v16  ;;  %vm6890_vm15 = vcmp.eq.s32.totalorder %v4924_v30, %v4862_v17  ;;  %v6997_v36 = vmov 0 }
 0x2aa   : > { %v3591_v40 = vpop.f32.mrb[44].mxu1  ;;  %6996 = vst [vmem:[#allocation29_spill] sm:$0xff] %v6995_v23  ;;  %vm6886_vm14 = vcmp.eq.s32.totalorder %v4927_v32, %v4858_v16  ;;  %vm6889_vm0 = vcmp.eq.s32.totalorder %v4927_v32, %v4862_v17 }
 0x2ab   : > { %v4816_v43 = vadd.f32 %v3591_v40, %v4688_v33  ;;  %v1016_v45 = vpop.f32.mrb[45].mxu1  ;;  %1115 = vadd.xlane.f32.xlu0 %v1057_v39  ;;  %vm4943_vm4 = vmpackc.low %vm6886_vm14, %vm6887_vm13  ;;  %v7000_v39 = vmov 0  ;;  %v4958_v40 = vadd.s32 48, %v4850_v8 }
 0x2ac   : > { %v4821_v48 = vadd.f32 %v4688_v33, %v1016_v45  ;;  %v3592_v49 = vpop.f32.mrb[46].mxu1  ;;  %v6998_v36 = vsel %vm4943_vm4, 4294967295, %v6997_v36  ;;  %vm4953_vm8 = vmpackc.low %vm6889_vm0, %vm6890_vm15  ;;  %v4961_v45 = vadd.s32 56, %v4850_v8 }
 0x2ad   : > { %6985 = vst [vmem:[#allocation24_spill] sm:$0xff] %v4816_v43  ;;  %v4827_v52 = vadd.f32 %v3592_v49, %v4688_v33  ;;  %v1019_v54 = vpop.f32.mrb[47].mxu1  ;;  %1113 = vadd.xlane.f32.xlu1 %v1056_v46  ;;  %v1061_v2 = vmul.f32 %v4816_v43, %v4816_v43  ;;  %6999 = vst [vmem:[#allocation30_spill] sm:$0xff] %v6998_v36  ;;  %v7001_v39 = vsel %vm4953_vm8, 4294967295, %v7000_v39  ;;  %v7003_v46 = vmov 0 }
 0x2ae   : > { %v4832_v58 = vadd.f32 %v4688_v33, %v1019_v54  ;;  %v1059_v0 = vmul.f32 %v4821_v48, %v4821_v48  ;;  %7002 = vst [vmem:[#allocation31_spill] sm:$0xff] %v7001_v39  ;;  %vm6893_vm14 = vcmp.eq.s32.totalorder %v4958_v40, %v4858_v16  ;;  %vm6892_vm13 = vcmp.eq.s32.totalorder %v4961_v45, %v4858_v16 }
 0x2af   : > { %6986 = vst [vmem:[#allocation25_spill] sm:$0xff] %v4827_v52  ;;  %1111 = vadd.xlane.f32.xlu0 %v1055_v55  ;;  %v1062_v33 = vmul.f32 %v4827_v52, %v4827_v52  ;;  %vm6896_vm10 = vcmp.eq.s32.totalorder %v4958_v40, %v4862_v17  ;;  %vm6895_vm0 = vcmp.eq.s32.totalorder %v4961_v45, %v4862_v17  ;;  %vm4977_vm15 = vmpackc.low %vm6892_vm13, %vm6893_vm14  ;;  %v7006_v49 = vmov 0 }
 0x2b0   : > { %v1060_v63 = vmul.f32 %v4832_v58, %v4832_v58  ;;  %v7004_v46 = vsel %vm4977_vm15, 4294967295, %v7003_v46  ;;  %vm4987_vm7 = vmpackc.low %vm6895_vm0, %vm6896_vm10  ;;  %v4992_v54 = vadd.s32 64, %v4850_v8  ;;  %v4995_v55 = vadd.s32 72, %v4850_v8 }
 0x2b1   : > { %1089 = vadd.xlane.f32.xlu1 %v1044_v61  ;;  %7005 = vst [vmem:[#allocation32_spill] sm:$0xff] %v7004_v46  ;;  %v7007_v49 = vsel %vm4987_vm7, 4294967295, %v7006_v49  ;;  %v7009_v61 = vmov 0  ;;  %v4333_v43 = vmov 0.0  }
 0x2b2   : > { %7008 = vst [vmem:[#allocation33_spill] sm:$0xff] %v7007_v49  ;;  %vm6899_vm13 = vcmp.eq.s32.totalorder %v4992_v54, %v4858_v16  ;;  %vm6898_vm14 = vcmp.eq.s32.totalorder %v4995_v55, %v4858_v16  ;;  %vm6902_vm9 = vcmp.eq.s32.totalorder %v4992_v54, %v4862_v17  ;;  %vm6901_vm0 = vcmp.eq.s32.totalorder %v4995_v55, %v4862_v17 }
 0x2b3   : > { %1087 = vadd.xlane.f32.xlu0 %v1043_v57  ;;  %vm5011_vm10 = vmpackc.low %vm6898_vm14, %vm6899_vm13  ;;  %v7012_v57 = vmov 0 }
 0x2b4   : > { %v7010_v61 = vsel %vm5011_vm10, 4294967295, %v7009_v61  ;;  %vm5021_vm2 = vmpackc.low %vm6901_vm0, %vm6902_vm9 }
 0x2b5   : > { %1121 = vadd.xlane.f32.xlu1 %v1060_v63  ;;  %7011 = vst [vmem:[#allocation34_spill] sm:$0xff] %v7010_v61  ;;  %v7013_v57 = vsel %vm5021_vm2, 4294967295, %v7012_v57  ;;  %v5026_v63 = vadd.s32 80, %v4850_v8 }
 0x2b6   : > { %7014 = vst [vmem:[#allocation35_spill] sm:$0xff] %v7013_v57 }
 0x2b7   : > { %1119 = vadd.xlane.f32.xlu0 %v1059_v0  ;;  %v5029_v0 = vadd.s32 88, %v4850_v8  ;;  %vm6909_vm14 = vcmp.eq.s32.totalorder %v5026_v63, %v4858_v16  ;;  %vm6910_vm3 = vcmp.eq.s32.totalorder %v5026_v63, %v4862_v17 }
 0x2b9   : > { %1125 = vadd.xlane.f32.xlu1 %v1062_v33  ;;  %vm6907_vm13 = vcmp.eq.s32.totalorder %v5029_v0, %v4858_v16  ;;  %vm6908_vm0 = vcmp.eq.s32.totalorder %v5029_v0, %v4862_v17 }
 0x2ba   : > { %vm5045_vm9 = vmpackc.low %vm6907_vm13, %vm6909_vm14  ;;  %vm6921_vm13 = vcmp.eq.s32.totalorder %v5060_v12, %v4858_v16  ;;  %vm6922_vm14 = vcmp.eq.s32.totalorder %v5060_v12, %v4862_v17 }
 0x2bb   : > { %1123 = vadd.xlane.f32.xlu0 %v1061_v2  ;;  %v7015_v2 = vmov 0  ;;  %vm5055_vm1 = vmpackc.low %vm6908_vm0, %vm6910_vm3 }
 0x2bc   : > { %v7016_v2 = vsel %vm5045_vm9, 4294967295, %v7015_v2  ;;  %v7019_v7 = vsel %vm5055_vm1, 4294967295, %v7018_v7 }
 0x2bd   : > { %1093 = vadd.xlane.f32.xlu1 %v1046_v3  ;;  %7017 = vst [vmem:[#allocation36_spill] sm:$0xff] %v7016_v2  ;;  %7020 = vst [vmem:[#allocation37_spill] sm:$0xff] %v7019_v7 }
 0x2bf   : > { %1091 = vadd.xlane.f32.xlu0 %v1045_v6 }
 0x304   : > { %v1068_v33 = vpop.xlane.xlu0 %1067 }
 0x305   : > { %v1129_v3 = vmax.f32 %v1068_v33, 1e-24  ;;  %v1064_v6 = vpop.xlane.xlu1 %1063  ;;  %v5063_v33 = vadd.s32 104, %v4850_v8 }
 0x306   : > { %v1127_v10 = vmax.f32 %v1064_v6, 1e-24  ;;  %v7021_v6 = vmov 0 }
 0x307   : > { %3883 = vrsqrt.f32 %v1129_v3  ;;  %vm6919_vm0 = vcmp.eq.s32.totalorder %v5063_v33, %v4858_v16  ;;  %vm6920_vm3 = vcmp.eq.s32.totalorder %v5063_v33, %v4862_v17 }
 0x308   : > { %3885 = vrsqrt.f32 %v1127_v10  ;;  %vm5079_vm5 = vmpackc.low %vm6919_vm0, %vm6921_vm13 }
 0x309   : > { %v1070_v11 = vpop.xlane.xlu1 %1069  ;;  %v7022_v6 = vsel %vm5079_vm5, 4294967295, %v7021_v6  ;;  %vm5089_vm1 = vmpackc.low %vm6920_vm3, %vm6922_vm14 }
 0x30a   : > { %v1130_v19 = vmax.f32 %v1070_v11, 1e-24  ;;  %7023 = vst [vmem:[#allocation38_spill] sm:$0xff] %v7022_v6  ;;  %v5098_v6 = vadd.s32 120, %v4850_v8 }
 0x30c   : > { %3887 = vrsqrt.f32 %v1130_v19  ;;  %v1076_v3 = vpop.xlane.xlu0 %1075  ;;  %v7024_v19 = vmov 0  ;;  %vm6923_vm3 = vcmp.eq.s32.totalorder %v5098_v6, %v4858_v16 }
 0x30d   : > { %v1133_v10 = vmax.f32 %v1076_v3, 1e-24  ;;  %v1066_v11 = vpop.xlane.xlu1 %1065  ;;  %v7025_v19 = vsel %vm5089_vm1, 4294967295, %v7024_v19  ;;  %v5095_v3 = vadd.s32 112, %v4850_v8  ;;  %vm6935_vm1 = vcmp.eq.s32.totalorder %v5098_v6, %v4862_v17 }
 0x30e   : > { %7026 = vst [vmem:[#allocation39_spill] sm:$0xff] %v7025_v19  ;;  %v1128_v7 = vmax.f32 %v1066_v11, 1e-24  ;;  %v7030_v11 = vmov 0 }
 0x30f   : > { %3889 = vrsqrt.f32 %v1133_v10  ;;  %vm6936_vm0 = vcmp.eq.s32.totalorder %v5095_v3, %v4858_v16  ;;  %vm6937_vm14 = vcmp.eq.s32.totalorder %v5095_v3, %v4862_v17 }
 0x310   : > { %3891 = vrsqrt.f32 %v1128_v7  ;;  %v1072_v2 = vpop.xlane.xlu0 %1071  ;;  %vm5112_vm13 = vmpackc.low %vm6923_vm3, %vm6936_vm0  ;;  %vm7033_vm0 = vcmp.eq.s32.totalorder %v4850_v8, %v4858_v16 }
 0x311   : > { %v1131_v57 = vmax.f32 %v1072_v2, 1e-24  ;;  %v1078_v61 = vpop.xlane.xlu1 %1077  ;;  %v3884_v46 = vpop.eup %3883  ;;  %vm5127_vm3 = vmpackc.low %vm6935_vm1, %vm6937_vm14  ;;  %vm7032_vm1 = vcmp.eq.s32.totalorder %v4850_v8, %v4862_v17  ;;  %vm7034_vm14 = vcmp.eq.s32.totalorder %v4856_v13, %v4862_v17 }
 0x312   : > { %v1134_v49 = vmax.f32 %v1078_v61, 1e-24  ;;  %v3886_v7 = vpop.eup %3885  ;;  %v7027_v61 = vmov 0  ;;  %v7031_v11 = vsel %vm5127_vm3, 4294967295, %v7030_v11  ;;  %v1193_v39 = vmul.f32 %v3884_v46, %v4691_v22 }
 0x313   : > { %v7028_v61 = vsel %vm5112_vm13, 4294967295, %v7027_v61  ;;  %v1191_v25 = vmul.f32 %v3886_v7, %v4694_v59  ;;  %v3233_v22 = vsel %vm7032_vm1, 1.0, %v4333_v43  ;;  %vm7035_vm1 = vcmp.eq.s32.totalorder %v4856_v13, %v4858_v16 }
 0x314   : > { %3893 = vrsqrt.f32 %v1134_v49  ;;  %v1084_v2 = vpop.xlane.xlu0 %1083  ;;  %7029 = vst [vmem:[#allocation40_spill] sm:$0xff] %v7028_v61  ;;  %vm7037_vm3 = vcmp.eq.s32.totalorder %v4890_v62, %v4858_v16 }
 0x315   : > { %3895 = vrsqrt.f32 %v1131_v57  ;;  %v1137_v10 = vmax.f32 %v1084_v2, 1e-24  ;;  %v1074_v49 = vpop.xlane.xlu1 %1073 }
 0x316   : > { %v3888_v61 = vpop.eup %3887  ;;  %v1132_v19 = vmax.f32 %v1074_v49, 1e-24 }
 0x317   : > { %v1194_v36 = vmul.f32 %v3888_v61, %v4699_v26  ;;  %v3234_v26 = vsel %vm7033_vm0, 1.0, %v4333_v43  ;;  %vm7036_vm0 = vcmp.eq.s32.totalorder %v4890_v62, %v4862_v17 }
 0x318   : > { %3897 = vrsqrt.f32 %v1132_v19  ;;  %v1080_v57 = vpop.xlane.xlu0 %1079 }
 0x319   : > { %v3890_v2 = vpop.eup %3889  ;;  %3899 = vrsqrt.f32 %v1137_v10  ;;  %v1086_v23 = vpop.xlane.xlu1 %1085  ;;  %v5134_v21 = vpack.c.bf16 %v1194_v36, %v1193_v39  ;;  %v1135_v56 = vmax.f32 %v1080_v57, 1e-24  ;;  %v3235_v36 = vsel %vm7034_vm14, 1.0, %v4333_v43 }
 0x31a   : > { %v3892_v60 = vpop.eup %3891  ;;  %v1138_v52 = vmax.f32 %v1086_v23, 1e-24  ;;  %v1197_v59 = vmul.f32 %v3890_v2, %v4709_v31  ;;  %v1559_v23 = vadd.f32 %v3234_v26, %v3233_v22  ;;  %v3238_v31 = vsel %vm7037_vm3, 1.0, %v4333_v43 }
 0x31b   : > { %v1192_v46 = vmul.f32 %v3892_v60, %v4704_v28  ;;  %1245 = vst [vmem:[%s5145_s23 + $0x8] sm:$0xff] %v5134_v21  ;;  %v3236_v28 = vsel %vm7035_vm1, 1.0, %v4333_v43  ;;  %v3237_v60 = vsel %vm7036_vm0, 1.0, %v4333_v43  ;;  %vm7038_vm14 = vcmp.eq.s32.totalorder %v4893_v24, %v4862_v17 }
 0x31c   : > { %3901 = vrsqrt.f32 %v1138_v52  ;;  %1560 = vadd.xlane.f32.xlu0 %v1559_v23  ;;  %v1562_v52 = vadd.f32 %v3236_v28, %v3235_v36  ;;  %v1565_v7 = vadd.f32 %v3238_v31, %v3237_v60  ;;  %v3239_v13 = vsel %vm7038_vm14, 1.0, %v4333_v43 }
 0x31d   : > { %v1082_v39 = vpop.xlane.xlu1 %1081  ;;  %v5166_v19 = vpack.c.bf16 %v1192_v46, %v1191_v25  ;;  %3903 = vrsqrt.f32 %v1135_v56  ;;  %vm7039_vm1 = vcmp.eq.s32.totalorder %v4893_v24, %v4858_v16  ;;  %vm7040_vm3 = vcmp.eq.s32.totalorder %v4924_v30, %v4862_v17 }
 0x31e   : > { %v3894_v61 = vpop.eup %3893  ;;  %v1136_v10 = vmax.f32 %v1082_v39, 1e-24  ;;  %v3240_v62 = vsel %vm7039_vm1, 1.0, %v4333_v43  ;;  %v3241_v25 = vsel %vm7040_vm3, 1.0, %v4333_v43  ;;  %1563 = vadd.xlane.f32.xlu1 %v1562_v52  ;;  %vm7041_vm0 = vcmp.eq.s32.totalorder %v4924_v30, %v4858_v16 }
 0x31f   : > { %v3896_v49 = vpop.eup %3895  ;;  %1244 = vst [vmem:[%s5145_s23] sm:$0xff] %v5166_v19  ;;  %v1198_v57 = vmul.f32 %v3894_v61, %v4717_v38  ;;  %v1568_v2 = vadd.f32 %v3240_v62, %v3239_v13  ;;  %v3242_v56 = vsel %vm7041_vm0, 1.0, %v4333_v43  ;;  %vm7042_vm14 = vcmp.eq.s32.totalorder %v4927_v32, %v4862_v17 }
 0x320   : > { %v3243_v24 = vsel %vm7042_vm14, 1.0, %v4333_v43  ;;  %3905 = vrsqrt.f32 %v1136_v10  ;;  %v1571_v22 = vadd.f32 %v3242_v56, %v3241_v25  ;;  %vm7043_vm1 = vcmp.eq.s32.totalorder %v4927_v32, %v4858_v16  ;;  %1566 = vadd.xlane.f32.xlu0 %v1565_v7 }
 0x321   : > { %v3244_v38 = vsel %vm7043_vm1, 1.0, %v4333_v43  ;;  %vm7044_vm3 = vcmp.eq.s32.totalorder %v4958_v40, %v4862_v17  ;;  %v5199_v30 = vpack.c.bf16 %v1198_v57, %v1197_v59  ;;  %vm7045_vm0 = vcmp.eq.s32.totalorder %v4958_v40, %v4858_v16 }
 0x322   : > { %v3245_v26 = vsel %vm7044_vm3, 1.0, %v4333_v43  ;;  %v1574_v46 = vadd.f32 %v3244_v38, %v3243_v24  ;;  %v3246_v23 = vsel %vm7045_vm0, 1.0, %v4333_v43  ;;  %vm7046_vm14 = vcmp.eq.s32.totalorder %v4961_v45, %v4862_v17  ;;  %v3898_v36 = vpop.eup %3897  ;;  %1569 = vadd.xlane.f32.xlu1 %v1568_v2 }
 0x323   : > { %v3247_v32 = vsel %vm7046_vm14, 1.0, %v4333_v43  ;;  %v1195_v28 = vmul.f32 %v3896_v49, %v4712_v35  ;;  %v1577_v60 = vadd.f32 %v3246_v23, %v3245_v26  ;;  %vm7047_vm1 = vcmp.eq.s32.totalorder %v4961_v45, %v4858_v16  ;;  %v3900_v31 = vpop.eup %3899  ;;  %1247 = vst [vmem:[%s5145_s23 + $0x18] sm:$0xff] %v5199_v30 }
 0x324   : > { %v3248_v59 = vsel %vm7047_vm1, 1.0, %v4333_v43  ;;  %vm7048_vm3 = vcmp.eq.s32.totalorder %v4992_v54, %v4862_v17  ;;  %v1196_v39 = vmul.f32 %v3898_v36, %v4724_v41  ;;  %vm7049_vm0 = vcmp.eq.s32.totalorder %v4992_v54, %v4858_v16  ;;  %v1100_v7 = vpop.xlane.xlu0 %1099  ;;  %1572 = vadd.xlane.f32.xlu0 %v1571_v22 }
 0x325   : > { %v3249_v40 = vsel %vm7048_vm3, 1.0, %v4333_v43  ;;  %v1580_v52 = vadd.f32 %v3248_v59, %v3247_v32  ;;  %v3250_v35 = vsel %vm7049_vm0, 1.0, %v4333_v43  ;;  %vm7050_vm14 = vcmp.eq.s32.totalorder %v4995_v55, %v4862_v17 }
 0x326   : > { %v3251_v45 = vsel %vm7050_vm14, 1.0, %v4333_v43  ;;  %v1583_v13 = vadd.f32 %v3250_v35, %v3249_v40  ;;  %vm7051_vm1 = vcmp.eq.s32.totalorder %v4995_v55, %v4858_v16  ;;  %vm7052_vm3 = vcmp.eq.s32.totalorder %v5026_v63, %v4862_v17  ;;  %v3902_v57 = vpop.eup %3901  ;;  %v1102_v55 = vpop.xlane.xlu1 %1101  ;;  %1575 = vadd.xlane.f32.xlu1 %v1574_v46 }
 0x327   : > { %v3252_v41 = vsel %vm7051_vm1, 1.0, %v4333_v43  ;;  %v3253_v61 = vsel %vm7052_vm3, 1.0, %v4333_v43  ;;  %vm7053_vm0 = vcmp.eq.s32.totalorder %v5026_v63, %v4858_v16  ;;  %v1145_v10 = vmax.f32 %v1100_v7, 1e-24  ;;  %v3904_v26 = vpop.eup %3903 }
 0x328   : > { %v3254_v54 = vsel %vm7053_vm0, 1.0, %v4333_v43  ;;  %v5241_v62 = vpack.c.bf16 %v1196_v39, %v1195_v28  ;;  %v1586_v25 = vadd.f32 %v3252_v41, %v3251_v45  ;;  %v1201_v2 = vmul.f32 %v3900_v31, %v4729_v44  ;;  %v1096_v23 = vpop.xlane.xlu0 %1095  ;;  %1578 = vadd.xlane.f32.xlu0 %v1577_v60 }
 0x329   : > { %v1589_v49 = vadd.f32 %v3254_v54, %v3253_v61  ;;  %vm7054_vm14 = vcmp.eq.s32.totalorder %v5029_v0, %v4862_v17  ;;  %vm7055_vm1 = vcmp.eq.s32.totalorder %v5029_v0, %v4858_v16  ;;  %vm7056_vm3 = vcmp.eq.s32.totalorder %v5060_v12, %v4862_v17 }
 0x32a   : > { %v3255_v56 = vsel %vm7054_vm14, 1.0, %v4333_v43  ;;  %v3256_v63 = vsel %vm7055_vm1, 1.0, %v4333_v43  ;;  %v3257_v24 = vsel %vm7056_vm3, 1.0, %v4333_v43  ;;  %3907 = vrsqrt.f32 %v1145_v10  ;;  %1246 = vst [vmem:[%s5145_s23 + $0x10] sm:$0xff] %v5241_v62  ;;  %v3906_v59 = vpop.eup %3905  ;;  %1581 = vadd.xlane.f32.xlu1 %v1580_v52 }
 0x32b   : > { %v1146_v22 = vmax.f32 %v1102_v55, 1e-24  ;;  %v1202_v44 = vmul.f32 %v3902_v57, %v4737_v50  ;;  %v1592_v38 = vadd.f32 %v3256_v63, %v3255_v56  ;;  %vm7057_vm0 = vcmp.eq.s32.totalorder %v5060_v12, %v4858_v16 }
 0x32c   : > { %v3258_v0 = vsel %vm7057_vm0, 1.0, %v4333_v43  ;;  %vm7058_vm14 = vcmp.eq.s32.totalorder %v5063_v33, %v4862_v17  ;;  %vm7059_vm1 = vcmp.eq.s32.totalorder %v5063_v33, %v4858_v16  ;;  %vm7060_vm3 = vcmp.eq.s32.totalorder %v5095_v3, %v4862_v17  ;;  %v1098_v7 = vpop.xlane.xlu0 %1097  ;;  %1584 = vadd.xlane.f32.xlu0 %v1583_v13 }
 0x32d   : > { %v3259_v32 = vsel %vm7058_vm14, 1.0, %v4333_v43  ;;  %v3260_v50 = vsel %vm7059_vm1, 1.0, %v4333_v43  ;;  %v3261_v46 = vsel %vm7060_vm3, 1.0, %v4333_v43  ;;  %3909 = vrsqrt.f32 %v1146_v22 }
 0x32e   : > { %v1143_v36 = vmax.f32 %v1096_v23, 1e-24  ;;  %v5275_v12 = vpack.c.bf16 %v1202_v44, %v1201_v2  ;;  %v1595_v28 = vadd.f32 %v3258_v0, %v3257_v24  ;;  %v1598_v40 = vadd.f32 %v3260_v50, %v3259_v32  ;;  %v1110_v61 = vpop.xlane.xlu1 %1109  ;;  %1587 = vadd.xlane.f32.xlu1 %v1586_v25 }
 0x32f   : > { %vm7061_vm0 = vcmp.eq.s32.totalorder %v5095_v3, %v4858_v16  ;;  %vm7062_vm14 = vcmp.eq.s32.totalorder %v5098_v6, %v4862_v17  ;;  %vm7063_vm1 = vcmp.eq.s32.totalorder %v5098_v6, %v4858_v16  ;;  %v1199_v60 = vmul.f32 %v3904_v26, %v4732_v47 }
 0x330   : > { %v3262_v31 = vsel %vm7061_vm0, 1.0, %v4333_v43  ;;  %v3263_v33 = vsel %vm7062_vm14, 1.0, %v4333_v43  ;;  %v3264_v39 = vsel %vm7063_vm1, 1.0, %v4333_v43  ;;  %v1200_v35 = vmul.f32 %v3906_v59, %v4744_v53  ;;  %1249 = vst [vmem:[%s5145_s23 + $0x28] sm:$0xff] %v5275_v12  ;;  %v1108_v47 = vpop.xlane.xlu0 %1107  ;;  %1590 = vadd.xlane.f32.xlu0 %v1589_v49 }
 0x331   : > { %v1601_v3 = vadd.f32 %v3262_v31, %v3261_v46  ;;  %v1604_v45 = vadd.f32 %v3264_v39, %v3263_v33  ;;  %3911 = vrsqrt.f32 %v1143_v36  ;;  %v1144_v41 = vmax.f32 %v1098_v7, 1e-24 }
 0x332   : > { %v5293_v17 = vpack.c.bf16 %v1200_v35, %v1199_v60  ;;  %v1150_v16 = vmax.f32 %v1110_v61, 1e-24  ;;  %v1149_v53 = vmax.f32 %v1108_v47, 1e-24  ;;  %v1106_v6 = vpop.xlane.xlu1 %1105  ;;  %1593 = vadd.xlane.f32.xlu1 %v1592_v38 }
 0x333   : > { %3913 = vrsqrt.f32 %v1144_v41  ;;  %v1148_v54 = vmax.f32 %v1106_v6, 1e-24 }
 0x334   : > { %1248 = vst [vmem:[%s5145_s23 + $0x20] sm:$0xff] %v5293_v17  ;;  %v3908_v43 = vpop.eup %3907  ;;  %3915 = vrsqrt.f32 %v1150_v16  ;;  %v1104_v10 = vpop.xlane.xlu0 %1103  ;;  %1596 = vadd.xlane.f32.xlu0 %v1595_v28 }
 0x335   : > { %3917 = vrsqrt.f32 %v1149_v53  ;;  %v1209_v13 = vmul.f32 %v3908_v43, %v4757_v1  ;;  %v1147_v55 = vmax.f32 %v1104_v10, 1e-24 }
 0x336   : > { %3919 = vrsqrt.f32 %v1148_v54  ;;  %v1118_v25 = vpop.xlane.xlu1 %1117  ;;  %1599 = vadd.xlane.f32.xlu1 %v1598_v40 }
 0x337   : > { %v3910_v52 = vpop.eup %3909  ;;  %3921 = vrsqrt.f32 %v1147_v55  ;;  %v1154_v63 = vmax.f32 %v1118_v25, 1e-24 }
 0x338   : > { %v1210_v57 = vmul.f32 %v3910_v52, %v4763_v5  ;;  %v1116_v49 = vpop.xlane.xlu0 %1115  ;;  %1602 = vadd.xlane.f32.xlu0 %v1601_v3 }
 0x339   : > { %3923 = vrsqrt.f32 %v1154_v63  ;;  %v1153_v22 = vmax.f32 %v1116_v49, 1e-24 }
 0x33a   : > { %v1232_v2 = vpack.c.bf16 %v1210_v57, %v1209_v13  ;;  %v1114_v44 = vpop.xlane.xlu1 %1113  ;;  %1605 = vadd.xlane.f32.xlu1 %v1604_v45 }
 0x33b   : > { %v3912_v56 = vpop.eup %3911  ;;  %3925 = vrsqrt.f32 %v1153_v22  ;;  %v1152_v26 = vmax.f32 %v1114_v44, 1e-24 }
 0x33c   : > { %1253 = vst [vmem:[%s5145_s23 + $0x48] sm:$0xff] %v1232_v2  ;;  %v1207_v1 = vmul.f32 %v3912_v56, %v4760_v4  ;;  %v1112_v23 = vpop.xlane.xlu0 %1111 }
 0x33d   : > { %v3914_v24 = vpop.eup %3913  ;;  %3927 = vrsqrt.f32 %v1152_v26  ;;  %v1151_v50 = vmax.f32 %v1112_v23, 1e-24  ;;  %v7068_v23 = vmov 1.0|1.0  }
 0x33e   : > { %v1208_v5 = vmul.f32 %v3914_v24, %v4770_v9  ;;  %v3916_v38 = vpop.eup %3915  ;;  %v1090_v46 = vpop.xlane.xlu1 %1089 }
 0x33f   : > { %v3918_v32 = vpop.eup %3917  ;;  %v1214_v28 = vmul.f32 %v3916_v38, %v4778_v15  ;;  %3929 = vrsqrt.f32 %v1151_v50  ;;  %v1140_v9 = vmax.f32 %v1090_v46, 1e-24  ;;  %v7067_v38 = vld [vmem:[#allocation23_spill] sm:$0xff] }
 0x340   : > { %v1231_v0 = vpack.c.bf16 %v1208_v5, %v1207_v1  ;;  %v1213_v36 = vmul.f32 %v3918_v32, %v4775_v14  ;;  %v3920_v4 = vpop.eup %3919  ;;  %v1088_v59 = vpop.xlane.xlu0 %1087 }
 0x341   : > { %v3922_v31 = vpop.eup %3921  ;;  %3931 = vrsqrt.f32 %v1140_v9  ;;  %v1139_v33 = vmax.f32 %v1088_v59, 1e-24  ;;  %v1212_v35 = vmul.f32 %v3920_v4, %v4783_v18 }
 0x342   : > { %1252 = vst [vmem:[%s5145_s23 + $0x40] sm:$0xff] %v1231_v0  ;;  %3378 = vmatprep.subr.bf16.mxu0 %v1231_v0  ;;  %v1234_v40 = vpack.c.bf16 %v1214_v28, %v1213_v36  ;;  %v1122_v39 = vpop.xlane.xlu1 %1121  ;;  %v1211_v60 = vmul.f32 %v3922_v31, %v4788_v20  ;;  %v7079_v31 = vld [vmem:[#allocation37_spill] sm:$0xff]  ;;  %v1383_v36 = vld [vmem:[#allocation3 + $0x8] sm:$0xff] }
 0x343   : > { %3379 = vmatpush3.bf16.msra.mxu0 %v5166_v19  ;;  %v3924_v14 = vpop.eup %3923  ;;  %3933 = vrsqrt.f32 %v1139_v33  ;;  %v1156_v15 = vmax.f32 %v1122_v39, 1e-24  ;;  %v7082_v39 = vld [vmem:[#allocation39_spill] sm:$0xff]  ;;  %v1382_v0 = vld [vmem:[#allocation3] sm:$0xff] }
 0x344   : > { %3380 = vmatprep.subr.bf16.mxu0 %v1232_v2  ;;  %1255 = vst [vmem:[%s5145_s23 + $0x58] sm:$0xff] %v1234_v40  ;;  %v1120_v3 = vpop.xlane.xlu0 %1119  ;;  %v1233_v19 = vpack.c.bf16 %v1212_v35, %v1211_v60  ;;  %v1218_v20 = vmul.f32 %v3924_v14, %v4798_v29  ;;  %v1543_v35 = vld [vmem:[#allocation4] sm:$0xff] }
 0x345   : > { %v3926_v45 = vpop.eup %3925  ;;  %3935 = vrsqrt.f32 %v1156_v15  ;;  %v1155_v7 = vmax.f32 %v1120_v3, 1e-24  ;;  %v1544_v15 = vld [vmem:[#allocation4 + $0x8] sm:$0xff] }
 0x346   : > { %1254 = vst [vmem:[%s5145_s23 + $0x50] sm:$0xff] %v1233_v19  ;;  %v1126_v41 = vpop.xlane.xlu1 %1125  ;;  %v1217_v61 = vmul.f32 %v3926_v45, %v4795_v27 }
 0x347   : > { %3381 = vmatpush3.bf16.msra.mxu0 %v5134_v21  ;;  %v3928_v18 = vpop.eup %3927  ;;  %3937 = vrsqrt.f32 %v1155_v7  ;;  %v1158_v16 = vmax.f32 %v1126_v41, 1e-24  ;;  %v1545_v7 = vld [vmem:[#allocation4 + $0x10] sm:$0xff] }
 0x348   : > { %3382 = vmatprep.subr.bf16.mxu0 %v1233_v19  ;;  %v1124_v47 = vpop.xlane.xlu0 %1123  ;;  %v1236_v21 = vpack.c.bf16 %v1218_v20, %v1217_v61  ;;  %v1216_v54 = vmul.f32 %v3928_v18, %v4803_v34  ;;  %v1546_v61 = vld [vmem:[#allocation4 + $0x18] sm:$0xff] }
 0x349   : > { %v3930_v43 = vpop.eup %3929  ;;  %3939 = vrsqrt.f32 %v1158_v16  ;;  %v1157_v53 = vmax.f32 %v1124_v47, 1e-24 }
 0x34a   : > { %v1094_v6 = vpop.xlane.xlu1 %1093  ;;  %v1215_v52 = vmul.f32 %v3930_v43, %v4808_v37  ;;  %1257 = vst [vmem:[%s5145_s23 + $0x68] sm:$0xff] %v1236_v21 }
 0x34b   : > { %3383 = vmatpush3.bf16.msra.mxu0 %v5241_v62  ;;  %v3932_v27 = vpop.eup %3931  ;;  %3941 = vrsqrt.f32 %v1157_v53  ;;  %v1142_v29 = vmax.f32 %v1094_v6, 1e-24 }
 0x34c   : > { %3384 = vmatprep.subr.bf16.mxu0 %v1234_v40  ;;  %v1092_v10 = vpop.xlane.xlu0 %1091  ;;  %v1235_v62 = vpack.c.bf16 %v1216_v54, %v1215_v52  ;;  %v1204_v37 = vmul.f32 %v3932_v27, %v4813_v42  ;;  %v7064_v42 = vld [vmem:[#allocation24_spill] sm:$0xff] }
 0x34d   : > { %v3934_v13 = vpop.eup %3933  ;;  %3943 = vrsqrt.f32 %v1142_v29  ;;  %v1141_v57 = vmax.f32 %v1092_v10, 1e-24  ;;  %v1549_v52 = vld [vmem:[#allocation4 + $0x30] sm:$0xff]  ;;  %v1550_v27 = vld [vmem:[#allocation4 + $0x38] sm:$0xff] }
 0x34e   : > { %1256 = vst [vmem:[%s5145_s23 + $0x60] sm:$0xff] %v1235_v62  ;;  %v1203_v55 = vmul.f32 %v3934_v13, %v4824_v51  ;;  %v1551_v13 = vld [vmem:[#allocation4 + $0x40] sm:$0xff] }
 0x34f   : > { %3385 = vmatpush3.bf16.msra.mxu0 %v5199_v30  ;;  %v3936_v34 = vpop.eup %3935  ;;  %3945 = vrsqrt.f32 %v1141_v57 }
 0x350   : > { %3386 = vmatprep.subr.bf16.mxu0 %v1235_v62  ;;  %v1229_v25 = vpack.c.bf16 %v1204_v37, %v1203_v55  ;;  %v1220_v56 = vmul.f32 %v3936_v34, %v4832_v58  ;;  %v1552_v55 = vld [vmem:[#allocation4 + $0x48] sm:$0xff] }
 0x351   : > { %v3938_v30 = vpop.eup %3937 }
 0x352   : > { %v1219_v2 = vmul.f32 %v3938_v30, %v4821_v48  ;;  %1250 = vst [vmem:[%s5145_s23 + $0x30] sm:$0xff] %v1229_v25  ;;  %v7066_v48 = vld [vmem:[#allocation22_spill] sm:$0xff]  ;;  %v1553_v30 = vld [vmem:[#allocation4 + $0x50] sm:$0xff] }
 0x353   : > { %3387 = vmatpush3.bf16.msra.mxu0 %v5293_v17  ;;  %v3940_v63 = vpop.eup %3939  ;;  %v7065_v17 = vld [vmem:[#allocation25_spill] sm:$0xff] }
 0x354   : > { %3388 = vmatprep.subr.bf16.mxu0 %v1236_v21  ;;  %v1237_v51 = vpack.c.bf16 %v1220_v56, %v1219_v2  ;;  %v1222_v22 = vmul.f32 %v3940_v63, %v7065_v17  ;;  %v1548_v21 = vld [vmem:[#allocation4 + $0x28] sm:$0xff]  ;;  %v1554_v56 = vld [vmem:[#allocation4 + $0x58] sm:$0xff] }
 0x355   : > { %v3942_v49 = vpop.eup %3941  ;;  %v1556_v17 = vld [vmem:[#allocation4 + $0x68] sm:$0xff] }
 0x356   : > { %1258 = vst [vmem:[%s5145_s23 + $0x70] sm:$0xff] %v1237_v51  ;;  %v1221_v24 = vmul.f32 %v3942_v49, %v7064_v42  ;;  %v1555_v42 = vld [vmem:[#allocation4 + $0x60] sm:$0xff] }
 0x357   : > { %3389 = vmatpush3.bf16.msra.mxu0 %v5275_v12  ;;  %v3944_v44 = vpop.eup %3943 }
 0x358   : > { %3390 = vmatprep.subr.bf16.mxu0 %v1237_v51  ;;  %v1238_v1 = vpack.c.bf16 %v1222_v22, %v1221_v24  ;;  %v1206_v26 = vmul.f32 %v3944_v44, %v7067_v38 }
 0x359   : > { %v3946_v5 = vpop.eup %3945 }
 0x35a   : > { %1259 = vst [vmem:[%s5145_s23 + $0x78] sm:$0xff] %v1238_v1  ;;  %v1205_v58 = vmul.f32 %v3946_v5, %v7066_v48  ;;  %v1557_v5 = vld [vmem:[#allocation4 + $0x70] sm:$0xff] }
 0x35b   : > { %3391 = vmatpush3.bf16.msra.mxu0 %v1229_v25 }
 0x35c   : > { %3392 = vmatprep.subr.bf16.mxu0 %v1238_v1  ;;  %v1230_v12 = vpack.c.bf16 %v1206_v26, %v1205_v58  ;;  %v1558_v58 = vld [vmem:[#allocation4 + $0x78] sm:$0xff] }
 0x35e   : > { %1251 = vst [vmem:[%s5145_s23 + $0x38] sm:$0xff] %v1230_v12 }
 0x35f   : > { %3393 = vmatpush3.bf16.msra.mxu0 %v1230_v12 }
 0x362   : > { %3268 = vmatmul.mubr.msk.bf16.vlgmr.msra.gmra.mrb[16].mxu0 %vm4885_vm6, %v7068_v23  ;;  %vm7080_vm6 = vnez %v7079_v31  ;;  %v1384_v31 = vld [vmem:[#allocation3 + $0x10] sm:$0xff] }
 0x363   : > { %3270 = vmatprep.mubr.msk.bf16.mxu0 %vm4909_vm11, %v7068_v23 }
 0x36a   : > { %3272 = vmatmul.mubr.msk.bf16.gmra.mrb[20].mxu0 %vm4919_vm12, %v7068_v23 }
 0x36b   : > { %3274 = vmatprep.mubr.msk.bf16.mxu0 %vm4943_vm4, %v7068_v23 }
 0x372   : > { %3276 = vmatmul.mubr.msk.bf16.gmra.mrb[24].mxu0 %vm4953_vm8, %v7068_v23  ;;  %vm1623_vm8 = vcmask 7168  }
 0x373   : > { %3278 = vmatprep.mubr.msk.bf16.mxu0 %vm4977_vm15, %v7068_v23 }
 0x37a   : > { %3280 = vmatmul.mubr.msk.bf16.gmra.mrb[28].mxu0 %vm4987_vm7, %v7068_v23  ;;  %vm7083_vm7 = vnez %v7082_v39 }
 0x37b   : > { %3282 = vmatprep.mubr.msk.bf16.mxu0 %vm5011_vm10, %v7068_v23 }
 0x382   : > { %3284 = vmatmul.mubr.msk.bf16.gmra.mrb[32].mxu0 %vm5021_vm2, %v7068_v23  ;;  %vm7085_vm2 = vnez %v7031_v11  ;;  %v1547_v11 = vld [vmem:[#allocation4 + $0x20] sm:$0xff] }
 0x383   : > { %3286 = vmatprep.mubr.msk.bf16.mxu0 %vm5045_vm9, %v7068_v23 }
 0x38a   : > { %3288 = vmatmul.mubr.msk.bf16.gmra.mrb[36].mxu0 %vm7080_vm6, %v7068_v23 }
 0x38b   : > { %3290 = vmatprep.mubr.msk.bf16.mxu0 %vm5079_vm5, %v7068_v23 }
 0x392   : > { %3292 = vmatmul.mubr.msk.bf16.gmra.mrb[40].mxu0 %vm7083_vm7, %v7068_v23 }
 0x393   : > { %3294 = vmatprep.mubr.msk.bf16.mxu0 %vm5112_vm13, %v7068_v23 }
 0x39a   : > { %3296 = vmatmul.mubr.msk.bf16.gmra.mrb[44].mxu0 %vm7085_vm2, %v7068_v23 }
 0x3a9   : > { %v1561_v14 = vpop.xlane.xlu0 %1560 }
 0x3aa   : > { %v1607_v19 = vadd.f32 %v1561_v14, %v1543_v35  ;;  %v1385_v35 = vld [vmem:[#allocation3 + $0x18] sm:$0xff] }
 0x3ab   : > { %v1564_v3 = vpop.xlane.xlu1 %1563 }
 0x3ac   : > { %v1608_v45 = vadd.f32 %v1564_v3, %v1544_v15  ;;  %1624 = vst.msk [vmem:[#allocation4] sm:$0xff] %vm1623_vm8, %v1607_v19 }
 0x3ad   : > { %v1567_v41 = vpop.xlane.xlu0 %1566 }
 0x3ae   : > { %1625 = vst.msk [vmem:[#allocation4 + $0x8] sm:$0xff] %vm1623_vm8, %v1608_v45  ;;  %v1609_v18 = vadd.f32 %v1567_v41, %v1545_v7  ;;  %v1386_v7 = vld [vmem:[#allocation3 + $0x20] sm:$0xff] }
 0x3af   : > { %v1570_v20 = vpop.xlane.xlu1 %1569 }
 0x3b0   : > { %v1610_v16 = vadd.f32 %v1570_v20, %v1546_v61  ;;  %1626 = vst.msk [vmem:[#allocation4 + $0x10] sm:$0xff] %vm1623_vm8, %v1609_v18  ;;  %v1387_v18 = vld [vmem:[#allocation3 + $0x28] sm:$0xff] }
 0x3b1   : > { %v1573_v47 = vpop.xlane.xlu0 %1572 }
 0x3b2   : > { %1627 = vst.msk [vmem:[#allocation4 + $0x18] sm:$0xff] %vm1623_vm8, %v1610_v16  ;;  %v1611_v53 = vadd.f32 %v1573_v47, %v1547_v11 }
 0x3b3   : > { %v1576_v43 = vpop.xlane.xlu1 %1575 }
 0x3b4   : > { %v1612_v6 = vadd.f32 %v1576_v43, %v1548_v21  ;;  %1628 = vst.msk [vmem:[#allocation4 + $0x20] sm:$0xff] %vm1623_vm8, %v1611_v53  ;;  %v1388_v53 = vld [vmem:[#allocation3 + $0x30] sm:$0xff] }
 0x3b5   : > { %v1579_v54 = vpop.xlane.xlu0 %1578 }
 0x3b6   : > { %1629 = vst.msk [vmem:[#allocation4 + $0x28] sm:$0xff] %vm1623_vm8, %v1612_v6  ;;  %v1613_v10 = vadd.f32 %v1579_v54, %v1549_v52 }
 0x3b7   : > { %v1582_v29 = vpop.xlane.xlu1 %1581 }
 0x3b8   : > { %v1614_v62 = vadd.f32 %v1582_v29, %v1550_v27  ;;  %1630 = vst.msk [vmem:[#allocation4 + $0x30] sm:$0xff] %vm1623_vm8, %v1613_v10  ;;  %v1389_v27 = vld [vmem:[#allocation3 + $0x38] sm:$0xff] }
 0x3b9   : > { %v1585_v57 = vpop.xlane.xlu0 %1584 }
 0x3ba   : > { %1631 = vst.msk [vmem:[#allocation4 + $0x38] sm:$0xff] %vm1623_vm8, %v1614_v62  ;;  %v1615_v34 = vadd.f32 %v1585_v57, %v1551_v13 }
 0x3bb   : > { %v1588_v37 = vpop.xlane.xlu1 %1587 }
 0x3bc   : > { %v1616_v25 = vadd.f32 %v1588_v37, %v1552_v55  ;;  %1632 = vst.msk [vmem:[#allocation4 + $0x40] sm:$0xff] %vm1623_vm8, %v1615_v34  ;;  %v1390_v55 = vld [vmem:[#allocation3 + $0x40] sm:$0xff] }
 0x3bd   : > { %v1591_v2 = vpop.xlane.xlu0 %1590 }
 0x3be   : > { %1633 = vst.msk [vmem:[#allocation4 + $0x48] sm:$0xff] %vm1623_vm8, %v1616_v25  ;;  %v1617_v51 = vadd.f32 %v1591_v2, %v1553_v30  ;;  %v1391_v30 = vld [vmem:[#allocation3 + $0x48] sm:$0xff] }
 0x3bf   : > { %v1594_v63 = vpop.xlane.xlu1 %1593 }
 0x3c0   : > { %v1618_v49 = vadd.f32 %v1594_v63, %v1554_v56  ;;  %1634 = vst.msk [vmem:[#allocation4 + $0x50] sm:$0xff] %vm1623_vm8, %v1617_v51 }
 0x3c1   : > { %v1597_v24 = vpop.xlane.xlu0 %1596 }
 0x3c2   : > { %1635 = vst.msk [vmem:[#allocation4 + $0x58] sm:$0xff] %vm1623_vm8, %v1618_v49  ;;  %v1619_v44 = vadd.f32 %v1597_v24, %v1555_v42  ;;  %v1392_v42 = vld [vmem:[#allocation3 + $0x50] sm:$0xff] }
 0x3c3   : > { %v1600_v22 = vpop.xlane.xlu1 %1599 }
 0x3c4   : > { %v1620_v1 = vadd.f32 %v1600_v22, %v1556_v17  ;;  %1636 = vst.msk [vmem:[#allocation4 + $0x60] sm:$0xff] %vm1623_vm8, %v1619_v44  ;;  %v1393_v44 = vld [vmem:[#allocation3 + $0x58] sm:$0xff] }
 0x3c5   : > { %v1603_v48 = vpop.xlane.xlu0 %1602 }
 0x3c6   : > { %1637 = vst.msk [vmem:[#allocation4 + $0x68] sm:$0xff] %vm1623_vm8, %v1620_v1  ;;  %v1621_v26 = vadd.f32 %v1603_v48, %v1557_v5 }
 0x3c7   : > { %v1606_v38 = vpop.xlane.xlu1 %1605 }
 0x3c8   : > { %v1622_v12 = vadd.f32 %v1606_v38, %v1558_v58  ;;  %1638 = vst.msk [vmem:[#allocation4 + $0x70] sm:$0xff] %vm1623_vm8, %v1621_v26  ;;  %v1394_v26 = vld [vmem:[#allocation3 + $0x60] sm:$0xff] }
 0x3ca   : > { %1639 = vst.msk [vmem:[#allocation4 + $0x78] sm:$0xff] %vm1623_vm8, %v1622_v12 }
 0x435   : > { %v3394_v23 = vpop.f32.mrb[16].mxu0 }
 0x436   : > { %v3395_v32 = vpop.f32.mrb[17].mxu0 }
 0x437   : > { %v3396_v50 = vadd.f32 %v3395_v32, %v3394_v23  ;;  %v3397_v46 = vpop.f32.mrb[18].mxu0  ;;  %v1395_v32 = vld [vmem:[#allocation3 + $0x68] sm:$0xff] }
 0x438   : > { %v3398_v28 = vpop.f32.mrb[19].mxu0 }
 0x439   : > { %v1511_v4 = vadd.f32 %v3396_v50, %v1382_v0  ;;  %v3399_v9 = vadd.f32 %v3398_v28, %v3397_v46 }
 0x43b   : > { %1527 = vst [vmem:[#allocation3] sm:$0xff] %v1511_v4  ;;  %v1512_v59 = vadd.f32 %v3399_v9, %v1383_v36  ;;  %v1396_v9 = vld [vmem:[#allocation3 + $0x70] sm:$0xff] }
 0x43d   : > { %1528 = vst [vmem:[#allocation3 + $0x8] sm:$0xff] %v1512_v59  ;;  %v3400_v40 = vpop.f32.mrb[20].mxu0 }
 0x43e   : > { %v3401_v33 = vpop.f32.mrb[21].mxu0 }
 0x43f   : > { %v3402_v39 = vadd.f32 %v3401_v33, %v3400_v40  ;;  %v3403_v60 = vpop.f32.mrb[22].mxu0  ;;  %v1397_v33 = vld [vmem:[#allocation3 + $0x78] sm:$0xff] }
 0x440   : > { %v3404_v14 = vpop.f32.mrb[23].mxu0 }
 0x441   : > { %v1513_v15 = vadd.f32 %v3402_v39, %v1384_v31  ;;  %v3405_v3 = vadd.f32 %v3404_v14, %v3403_v60 }
 0x443   : > { %1529 = vst [vmem:[#allocation3 + $0x10] sm:$0xff] %v1513_v15  ;;  %v1514_v19 = vadd.f32 %v3405_v3, %v1385_v35 }
 0x445   : > { %1530 = vst [vmem:[#allocation3 + $0x18] sm:$0xff] %v1514_v19  ;;  %v3406_v45 = vpop.f32.mrb[24].mxu0 }
 0x446   : > { %v3407_v41 = vpop.f32.mrb[25].mxu0 }
 0x447   : > { %v3408_v61 = vadd.f32 %v3407_v41, %v3406_v45  ;;  %v3409_v20 = vpop.f32.mrb[26].mxu0 }
 0x448   : > { %v3410_v16 = vpop.f32.mrb[27].mxu0 }
 0x449   : > { %v1515_v11 = vadd.f32 %v3408_v61, %v1386_v7  ;;  %v3411_v47 = vadd.f32 %v3410_v16, %v3409_v20 }
 0x44b   : > { %1531 = vst [vmem:[#allocation3 + $0x20] sm:$0xff] %v1515_v11  ;;  %v1516_v21 = vadd.f32 %v3411_v47, %v1387_v18 }
 0x44d   : > { %1532 = vst [vmem:[#allocation3 + $0x28] sm:$0xff] %v1516_v21  ;;  %v3412_v43 = vpop.f32.mrb[28].mxu0 }
 0x44e   : > { %v3413_v6 = vpop.f32.mrb[29].mxu0 }
 0x44f   : > { %v3414_v52 = vadd.f32 %v3413_v6, %v3412_v43  ;;  %v3415_v54 = vpop.f32.mrb[30].mxu0 }
 0x450   : > { %v3416_v29 = vpop.f32.mrb[31].mxu0 }
 0x451   : > { %v1517_v10 = vadd.f32 %v3414_v52, %v1388_v53  ;;  %v3417_v62 = vadd.f32 %v3416_v29, %v3415_v54 }
 0x453   : > { %1533 = vst [vmem:[#allocation3 + $0x30] sm:$0xff] %v1517_v10  ;;  %v1518_v13 = vadd.f32 %v3417_v62, %v1389_v27 }
 0x455   : > { %1534 = vst [vmem:[#allocation3 + $0x38] sm:$0xff] %v1518_v13  ;;  %v3418_v57 = vpop.f32.mrb[32].mxu0 }
 0x456   : > { %v3419_v37 = vpop.f32.mrb[33].mxu0 }
 0x457   : > { %v3420_v34 = vadd.f32 %v3419_v37, %v3418_v57  ;;  %v3421_v25 = vpop.f32.mrb[34].mxu0 }
 0x458   : > { %v3422_v2 = vpop.f32.mrb[35].mxu0 }
 0x459   : > { %v1519_v56 = vadd.f32 %v3420_v34, %v1390_v55  ;;  %v3423_v63 = vadd.f32 %v3422_v2, %v3421_v25 }
 0x45b   : > { %1535 = vst [vmem:[#allocation3 + $0x40] sm:$0xff] %v1519_v56  ;;  %v1520_v51 = vadd.f32 %v3423_v63, %v1391_v30 }
 0x45d   : > { %1536 = vst [vmem:[#allocation3 + $0x48] sm:$0xff] %v1520_v51  ;;  %v3424_v49 = vpop.f32.mrb[36].mxu0 }
 0x45e   : > { %v3425_v24 = vpop.f32.mrb[37].mxu0 }
 0x45f   : > { %v3426_v17 = vadd.f32 %v3425_v24, %v3424_v49  ;;  %v3427_v22 = vpop.f32.mrb[38].mxu0 }
 0x460   : > { %v3428_v1 = vpop.f32.mrb[39].mxu0 }
 0x461   : > { %v1521_v5 = vadd.f32 %v3426_v17, %v1392_v42  ;;  %v3429_v48 = vadd.f32 %v3428_v1, %v3427_v22 }
 0x463   : > { %1537 = vst [vmem:[#allocation3 + $0x50] sm:$0xff] %v1521_v5  ;;  %v1522_v58 = vadd.f32 %v3429_v48, %v1393_v44 }
 0x465   : > { %1538 = vst [vmem:[#allocation3 + $0x58] sm:$0xff] %v1522_v58  ;;  %v3430_v38 = vpop.f32.mrb[40].mxu0 }
 0x466   : > { %v3431_v12 = vpop.f32.mrb[41].mxu0 }
 0x467   : > { %v3432_v23 = vadd.f32 %v3431_v12, %v3430_v38  ;;  %v3433_v0 = vpop.f32.mrb[42].mxu0 }
 0x468   : > { %v3434_v50 = vpop.f32.mrb[43].mxu0 }
 0x469   : > { %v1523_v46 = vadd.f32 %v3432_v23, %v1394_v26  ;;  %v3435_v36 = vadd.f32 %v3434_v50, %v3433_v0 }
 0x46b   : > { %1539 = vst [vmem:[#allocation3 + $0x60] sm:$0xff] %v1523_v46  ;;  %v1524_v28 = vadd.f32 %v3435_v36, %v1395_v32 }
 0x46d   : > { %1540 = vst [vmem:[#allocation3 + $0x68] sm:$0xff] %v1524_v28  ;;  %v3436_v4 = vpop.f32.mrb[44].mxu0 }
 0x46e   : > { %v3437_v59 = vpop.f32.mrb[45].mxu0 }
 0x46f   : > { %v3438_v40 = vadd.f32 %v3437_v59, %v3436_v4  ;;  %v3439_v31 = vpop.f32.mrb[46].mxu0  ;;  %1643 = sbr.rel (%p3297_p12) target bundleno = 1799 (0x707), region = 68 }
 0x470   : > { %v3440_v39 = vpop.f32.mrb[47].mxu0 }
 0x471   : > { %v1525_v60 = vadd.f32 %v3438_v40, %v1396_v9  ;;  %v3441_v35 = vadd.f32 %v3440_v39, %v3439_v31 }
 0x473   : > { %1541 = vst [vmem:[#allocation3 + $0x70] sm:$0xff] %v1525_v60  ;;  %v1526_v14 = vadd.f32 %v3441_v35, %v1397_v33 }
 0x475   : > { %1542 = vst [vmem:[#allocation3 + $0x78] sm:$0xff] %v1526_v14 }
 0x476   : > { %v1646_v15 = vld [vmem:[#allocation4 + $0x10] sm:$0xff]  ;;  %v1644_v3 = vld [vmem:[#allocation4] sm:$0xff]  ;;  %v1647_v19 = vld [vmem:[#allocation4 + $0x18] sm:$0xff]  ;;  %v4334_v45 = vmov 0  }
 0x477   : > { %3948 = vset.pattern.permute.xlu1 %v4334_v45  ;;  %3947 = vset.pattern.permute.xlu0 %v4334_v45  ;;  %v1694_v7 = vmax.f32 %v1646_v15, 1.0  ;;  %v1692_v41 = vmax.f32 %v1644_v3, 1.0  ;;  %v1645_v61 = vld [vmem:[#allocation4 + $0x8] sm:$0xff]  ;;  %v1695_v20 = vmax.f32 %v1647_v19, 1.0  ;;  %vm1660_vm9 = vcmp.gt.f32.partialorder %v1644_v3, 0.0  ;;  %v1648_v21 = vld [vmem:[#allocation4 + $0x20] sm:$0xff] }
 0x478   : > { %v1693_v18 = vmax.f32 %v1645_v61, 1.0  ;;  %vm1661_vm5 = vcmp.gt.f32.partialorder %v1645_v61, 0.0  ;;  %v1820_v11 = vsel %vm1660_vm9, 1, %v4334_v45  ;;  %v1649_v47 = vld [vmem:[#allocation4 + $0x28] sm:$0xff]  ;;  %v1696_v53 = vmax.f32 %v1648_v21, 1.0  ;;  %v1651_v54 = vld [vmem:[#allocation4 + $0x38] sm:$0xff] }
 0x479   : > { %1720 = vperm.xlu1 %3948, %v1694_v7   ;;  %1710 = vperm.xlu0 %3947, %v1692_v41   ;;  %v1821_v16 = vsel %vm1661_vm5, 1, %v4334_v45  ;;  %v1697_v43 = vmax.f32 %v1649_v47, 1.0  ;;  %vm1663_vm10 = vcmp.gt.f32.partialorder %v1647_v19, 0.0  ;;  %vm1662_vm11 = vcmp.gt.f32.partialorder %v1646_v15, 0.0  ;;  %v1650_v27 = vld [vmem:[#allocation4 + $0x30] sm:$0xff]  ;;  %v1653_v57 = vld [vmem:[#allocation4 + $0x48] sm:$0xff] }
 0x47a   : > { %v1823_v6 = vsel %vm1663_vm10, 1, %v4334_v45  ;;  %v1822_v52 = vsel %vm1662_vm11, 1, %v4334_v45  ;;  %v1699_v29 = vmax.f32 %v1651_v54, 1.0  ;;  %v1698_v10 = vmax.f32 %v1650_v27, 1.0  ;;  %v1652_v55 = vld [vmem:[#allocation4 + $0x40] sm:$0xff]  ;;  %v1655_v2 = vld [vmem:[#allocation4 + $0x58] sm:$0xff] }
 0x47b   : > { %vm1665_vm12 = vcmp.gt.f32.partialorder %v1649_v47, 0.0  ;;  %vm1664_vm13 = vcmp.gt.f32.partialorder %v1648_v21, 0.0  ;;  %v1701_v37 = vmax.f32 %v1653_v57, 1.0  ;;  %v1700_v34 = vmax.f32 %v1652_v55, 1.0  ;;  %v1654_v56 = vld [vmem:[#allocation4 + $0x50] sm:$0xff]  ;;  %v1657_v24 = vld [vmem:[#allocation4 + $0x68] sm:$0xff] }
 0x47c   : > { %v1825_v62 = vsel %vm1665_vm12, 1, %v4334_v45  ;;  %v1824_v13 = vsel %vm1664_vm13, 1, %v4334_v45  ;;  %vm1667_vm15 = vcmp.gt.f32.partialorder %v1651_v54, 0.0  ;;  %vm1666_vm4 = vcmp.gt.f32.partialorder %v1650_v27, 0.0  ;;  %v1656_v17 = vld [vmem:[#allocation4 + $0x60] sm:$0xff]  ;;  %v1659_v48 = vld [vmem:[#allocation4 + $0x78] sm:$0xff] }
 0x47d   : > { %1725 = vperm.xlu1 %3948, %v1695_v20   ;;  %1715 = vperm.xlu0 %3947, %v1693_v18   ;;  %v1827_v25 = vsel %vm1667_vm15, 1, %v4334_v45  ;;  %v1826_v30 = vsel %vm1666_vm4, 1, %v4334_v45  ;;  %v1703_v63 = vmax.f32 %v1655_v2, 1.0  ;;  %v1702_v51 = vmax.f32 %v1654_v56, 1.0  ;;  %v1658_v58 = vld [vmem:[#allocation4 + $0x70] sm:$0xff]  ;;  %v1962_v50 = vld [vmem:[#allocation2 + $0x80] sm:$0xff] }
 0x47e   : > { %vm1669_vm3 = vcmp.gt.f32.partialorder %v1653_v57, 0.0  ;;  %vm1668_vm0 = vcmp.gt.f32.partialorder %v1652_v55, 0.0  ;;  %v1705_v22 = vmax.f32 %v1657_v24, 1.0  ;;  %v1704_v44 = vmax.f32 %v1656_v17, 1.0  ;;  %3637 = vmatprep.mubr.bf16.mxu1 %v1962_v50  ;;  %v1948_v46 = vld [vmem:[#allocation2 + $0x10] sm:$0xff]  ;;  %v1676_v31 = vld [vmem:[#allocation3] sm:$0xff] }
 0x47f   : > { %v1829_v49 = vsel %vm1669_vm3, 1, %v4334_v45  ;;  %v1828_v42 = vsel %vm1668_vm0, 1, %v4334_v45  ;;  %vm1671_vm14 = vcmp.gt.f32.partialorder %v1655_v2, 0.0  ;;  %vm1670_vm1 = vcmp.gt.f32.partialorder %v1654_v56, 0.0  ;;  %3609 = vmatprep.mubr.bf16.mxu0 %v1948_v46  ;;  %v1678_v39 = vld [vmem:[#allocation3 + $0x10] sm:$0xff]  ;;  %v1679_v3 = vld [vmem:[#allocation3 + $0x18] sm:$0xff] }
 0x480   : > { %v1831_v1 = vsel %vm1671_vm14, 1, %v4334_v45  ;;  %v1830_v5 = vsel %vm1670_vm1, 1, %v4334_v45  ;;  %v1707_v38 = vmax.f32 %v1659_v48, 1.0  ;;  %v1706_v26 = vmax.f32 %v1658_v58, 1.0  ;;  %v1677_v19 = vld [vmem:[#allocation3 + $0x8] sm:$0xff]  ;;  %v1680_v57 = vld [vmem:[#allocation3 + $0x20] sm:$0xff] }
 0x481   : > { %1840 = vperm.xlu1 %3948, %v1821_v16   ;;  %1837 = vperm.xlu0 %3947, %v1820_v11   ;;  %vm1673_vm6 = vcmp.gt.f32.partialorder %v1657_v24, 0.0  ;;  %vm1672_vm7 = vcmp.gt.f32.partialorder %v1656_v17, 0.0  ;;  %vm1675_vm2 = vcmp.gt.f32.partialorder %v1659_v48, 0.0  ;;  %vm1674_vm8 = vcmp.gt.f32.partialorder %v1658_v58, 0.0 }
 0x482   : > { %v1833_v12 = vsel %vm1673_vm6, 1, %v4334_v45  ;;  %v1832_v23 = vsel %vm1672_vm7, 1, %v4334_v45  ;;  %v1835_v0 = vsel %vm1675_vm2, 1, %v4334_v45  ;;  %v1834_v32 = vsel %vm1674_vm8, 1, %v4334_v45 }
 0x485   : > { %1735 = vperm.xlu1 %3948, %v1697_v43   ;;  %1730 = vperm.xlu0 %3947, %v1696_v53  }
 0x489   : > { %1846 = vperm.xlu1 %3948, %v1823_v6   ;;  %1843 = vperm.xlu0 %3947, %v1822_v52  }
 0x48d   : > { %1745 = vperm.xlu1 %3948, %v1699_v29   ;;  %1740 = vperm.xlu0 %3947, %v1698_v10  }
 0x491   : > { %1852 = vperm.xlu1 %3948, %v1825_v62   ;;  %1849 = vperm.xlu0 %3947, %v1824_v13   ;;  %v1681_v62 = vld [vmem:[#allocation3 + $0x28] sm:$0xff] }
 0x495   : > { %1755 = vperm.xlu1 %3948, %v1701_v37   ;;  %1750 = vperm.xlu0 %3947, %v1700_v34  }
 0x499   : > { %1858 = vperm.xlu1 %3948, %v1827_v25   ;;  %1855 = vperm.xlu0 %3947, %v1826_v30  }
 0x49d   : > { %1765 = vperm.xlu1 %3948, %v1703_v63   ;;  %1760 = vperm.xlu0 %3947, %v1702_v51  }
 0x4a1   : > { %1864 = vperm.xlu1 %3948, %v1829_v49   ;;  %1861 = vperm.xlu0 %3947, %v1828_v42  }
 0x4a5   : > { %1775 = vperm.xlu1 %3948, %v1705_v22   ;;  %1770 = vperm.xlu0 %3947, %v1704_v44   ;;  %v1683_v22 = vld [vmem:[#allocation3 + $0x38] sm:$0xff] }
 0x4a9   : > { %1870 = vperm.xlu1 %3948, %v1831_v1   ;;  %1867 = vperm.xlu0 %3947, %v1830_v5   ;;  %v1682_v5 = vld [vmem:[#allocation3 + $0x30] sm:$0xff] }
 0x4ad   : > { %1785 = vperm.xlu1 %3948, %v1707_v38   ;;  %1780 = vperm.xlu0 %3947, %v1706_v26  }
 0x4b1   : > { %1876 = vperm.xlu1 %3948, %v1833_v12   ;;  %1873 = vperm.xlu0 %3947, %v1832_v23  }
 0x4b5   : > { %1882 = vperm.xlu1 %3948, %v1835_v0   ;;  %1879 = vperm.xlu0 %3947, %v1834_v32  }
 0x4f8   : > { %v1721_v36 = vpop.permute.xlu1 %1720  ;;  %v1711_v28 = vpop.permute.xlu0 %1710 }
 0x4f9   : > { %3949 = vrcp.f32 %v1721_v36 }
 0x4fa   : > { %3951 = vrcp.f32 %v1711_v28 }
 0x4fc   : > { %v1726_v4 = vpop.permute.xlu1 %1725  ;;  %v1716_v9 = vpop.permute.xlu0 %1715 }
 0x4fd   : > { %3953 = vrcp.f32 %v1726_v4 }
 0x4fe   : > { %3955 = vrcp.f32 %v1716_v9  ;;  %v1685_v9 = vld [vmem:[#allocation3 + $0x48] sm:$0xff] }
 0x500   : > { %v1841_v59 = vpop.permute.xlu1 %1840  ;;  %v1838_v40 = vpop.permute.xlu0 %1837 }
 0x501   : > { %vm1884_vm5 = vcmp.eq.s32.totalorder %v1838_v40, 1  ;;  %vm1885_vm9 = vcmp.eq.s32.totalorder %v1841_v59, 1 }
 0x502   : > { %vm3298_vm12 = vmpackc.low %vm1885_vm9, %vm1884_vm5 }
 0x503   : > { %v3950_v33 = vpop.eup %3949 }
 0x504   : > { %v3952_v60 = vpop.eup %3951  ;;  %v1736_v35 = vpop.permute.xlu1 %1735  ;;  %v1793_v45 = vmul.f32 %v3950_v33, %v1678_v39 }
 0x505   : > { %v1731_v14 = vpop.permute.xlu0 %1730  ;;  %v1789_v15 = vmul.f32 %v3952_v60, %v1676_v31  ;;  %3957 = vrcp.f32 %v1736_v35  ;;  %v1684_v31 = vld [vmem:[#allocation3 + $0x40] sm:$0xff] }
 0x506   : > { %3959 = vrcp.f32 %v1731_v14 }
 0x507   : > { %v3954_v7 = vpop.eup %3953  ;;  %v5414_v41 = vsel %vm1884_vm5, %v1789_v15, 0.0 }
 0x508   : > { %v3956_v61 = vpop.eup %3955  ;;  %1916 = vst [vmem:[#allocation14] sm:$0xff] %v5414_v41  ;;  %v1795_v20 = vmul.f32 %v3954_v7, %v1679_v3  ;;  %v1847_v18 = vpop.permute.xlu1 %1846 }
 0x509   : > { %v1844_v16 = vpop.permute.xlu0 %1843  ;;  %v1791_v11 = vmul.f32 %v3956_v61, %v1677_v19  ;;  %vm1887_vm10 = vcmp.eq.s32.totalorder %v1847_v18, 1 }
 0x50a   : > { %vm1886_vm11 = vcmp.eq.s32.totalorder %v1844_v16, 1  ;;  %v1903_v47 = vsel %vm1887_vm10, %v1795_v20, 0.0  ;;  %v3302_v21 = vpack.c.bf16 %v1795_v20, %v1793_v45  ;;  %v1687_v16 = vld [vmem:[#allocation3 + $0x58] sm:$0xff] }
 0x50b   : > { %v1902_v43 = vsel %vm1886_vm11, %v1793_v45, 0.0  ;;  %v5419_v53 = vsel %vm1885_vm9, %v1791_v11, 0.0  ;;  %v3299_v6 = vpack.c.bf16 %v1791_v11, %v1789_v15  ;;  %1919 = vst [vmem:[#allocation14 + $0x18] sm:$0xff] %v1903_v47  ;;  %v5421_v52 = vmul.f32 %v1903_v47, %v1903_v47  ;;  %vm5431_vm13 = vmpackc.low %vm1887_vm10, %vm1886_vm11  ;;  %v1963_v11 = vld [vmem:[#allocation2 + $0x88] sm:$0xff] }
 0x50c   : > { %1918 = vst [vmem:[#allocation14 + $0x10] sm:$0xff] %v1902_v43  ;;  %v5423_v54 = vmul.f32 %v1902_v43, %v1902_v43  ;;  %1917 = vst [vmem:[#allocation14 + $0x8] sm:$0xff] %v5419_v53  ;;  %v1746_v27 = vpop.permute.xlu1 %1745 }
 0x50d   : > { %v1741_v29 = vpop.permute.xlu0 %1740  ;;  %3961 = vrcp.f32 %v1746_v27  ;;  %3593 = vmatprep.subr.msk.bf16.mxu0 %vm3298_vm12, %v3299_v6  ;;  %3744 = vmatprep.subr.msk.bf16.mxu1 %vm3298_vm12, %v3299_v6 }
 0x50e   : > { %v3708_v10 = vpack.c.bf16 %v5421_v52, %v5423_v54  ;;  %3963 = vrcp.f32 %v1741_v29  ;;  %3594 = vmatpush3.bf16.xpose.msk.msra.mxu0 %vm3298_vm12, %v3299_v6  ;;  %3752 = vmatpush3.bf16.xpose.msk.msra.mxu1 %vm3298_vm12, %v3299_v6  ;;  %v1969_v52 = vld [vmem:[#allocation2 + $0xb8] sm:$0xff]  ;;  %v1955_v54 = vld [vmem:[#allocation2 + $0x48] sm:$0xff] }
 0x50f   : > { %v3958_v55 = vpop.eup %3957  ;;  %3595 = vmatprep.subr.msk.bf16.mxu0 %vm5431_vm13, %v3302_v21  ;;  %3745 = vmatprep.subr.msk.bf16.mxu1 %vm5431_vm13, %v3302_v21 }
 0x510   : > { %v3960_v37 = vpop.eup %3959  ;;  %v1799_v34 = vmul.f32 %v3958_v55, %v1681_v62  ;;  %v1853_v25 = vpop.permute.xlu1 %1852 }
 0x511   : > { %v1850_v30 = vpop.permute.xlu0 %1849  ;;  %vm1889_vm15 = vcmp.eq.s32.totalorder %v1853_v25, 1  ;;  %v1797_v2 = vmul.f32 %v3960_v37, %v1680_v57 }
 0x512   : > { %vm1888_vm4 = vcmp.eq.s32.totalorder %v1850_v30, 1  ;;  %v1905_v56 = vsel %vm1889_vm15, %v1799_v34, 0.0 }
 0x513   : > { %1921 = vst [vmem:[#allocation14 + $0x28] sm:$0xff] %v1905_v56  ;;  %v5439_v63 = vmul.f32 %v1905_v56, %v1905_v56  ;;  %v1904_v51 = vsel %vm1888_vm4, %v1797_v2, 0.0  ;;  %v3305_v17 = vpack.c.bf16 %v1799_v34, %v1797_v2  ;;  %vm5443_vm3 = vmpackc.low %vm1889_vm15, %vm1888_vm4  ;;  %v1689_v56 = vld [vmem:[#allocation3 + $0x68] sm:$0xff] }
 0x514   : > { %1920 = vst [vmem:[#allocation14 + $0x20] sm:$0xff] %v1904_v51  ;;  %v5441_v49 = vmul.f32 %v1904_v51, %v1904_v51  ;;  %v1756_v42 = vpop.permute.xlu1 %1755  ;;  %v1977_v51 = vld [vmem:[#allocation2 + $0xf8] sm:$0xff] }
 0x515   : > { %v1751_v24 = vpop.permute.xlu0 %1750  ;;  %3965 = vrcp.f32 %v1756_v42 }
 0x516   : > { %v3711_v1 = vpack.c.bf16 %v5439_v63, %v5441_v49  ;;  %3967 = vrcp.f32 %v1751_v24  ;;  %3596 = vmatpush3.bf16.xpose.msk.msra.mxu0 %vm5431_vm13, %v3302_v21  ;;  %3753 = vmatpush3.bf16.xpose.msk.msra.mxu1 %vm5431_vm13, %v3302_v21  ;;  %v1686_v21 = vld [vmem:[#allocation3 + $0x50] sm:$0xff]  ;;  %v1688_v24 = vld [vmem:[#allocation3 + $0x60] sm:$0xff]  ;;  %v1971_v63 = vld [vmem:[#allocation2 + $0xc8] sm:$0xff] }
 0x517   : > { %v3962_v48 = vpop.eup %3961  ;;  %3597 = vmatprep.subr.msk.bf16.mxu0 %vm5443_vm3, %v3305_v17  ;;  %3746 = vmatprep.subr.msk.bf16.mxu1 %vm5443_vm3, %v3305_v17  ;;  %v1957_v49 = vld [vmem:[#allocation2 + $0x58] sm:$0xff] }
 0x518   : > { %v3964_v58 = vpop.eup %3963  ;;  %v1803_v38 = vmul.f32 %v3962_v48, %v1683_v22  ;;  %v1859_v26 = vpop.permute.xlu1 %1858 }
 0x519   : > { %v1856_v12 = vpop.permute.xlu0 %1855  ;;  %vm1891_vm0 = vcmp.eq.s32.totalorder %v1859_v26, 1  ;;  %v1801_v23 = vmul.f32 %v3964_v58, %v1682_v5 }
 0x51a   : > { %vm1890_vm14 = vcmp.eq.s32.totalorder %v1856_v12, 1  ;;  %v1907_v0 = vsel %vm1891_vm0, %v1803_v38, 0.0 }
 0x51b   : > { %1923 = vst [vmem:[#allocation14 + $0x38] sm:$0xff] %v1907_v0  ;;  %v5457_v32 = vmul.f32 %v1907_v0, %v1907_v0  ;;  %v1906_v50 = vsel %vm1890_vm14, %v1801_v23, 0.0  ;;  %v3308_v4 = vpack.c.bf16 %v1803_v38, %v1801_v23  ;;  %vm5461_vm1 = vmpackc.low %vm1891_vm0, %vm1890_vm14 }
 0x51c   : > { %1922 = vst [vmem:[#allocation14 + $0x30] sm:$0xff] %v1906_v50  ;;  %v5459_v46 = vmul.f32 %v1906_v50, %v1906_v50  ;;  %v1766_v36 = vpop.permute.xlu1 %1765  ;;  %v1691_v50 = vld [vmem:[#allocation3 + $0x78] sm:$0xff] }
 0x51d   : > { %v1761_v28 = vpop.permute.xlu0 %1760  ;;  %3969 = vrcp.f32 %v1766_v36 }
 0x51e   : > { %v3714_v40 = vpack.c.bf16 %v5457_v32, %v5459_v46  ;;  %3971 = vrcp.f32 %v1761_v28  ;;  %3598 = vmatpush3.bf16.xpose.msk.msra.mxu0 %vm5443_vm3, %v3305_v17  ;;  %3754 = vmatpush3.bf16.xpose.msk.msra.mxu1 %vm5443_vm3, %v3305_v17  ;;  %v1973_v32 = vld [vmem:[#allocation2 + $0xd8] sm:$0xff]  ;;  %v1959_v46 = vld [vmem:[#allocation2 + $0x68] sm:$0xff]  ;;  %vm4336_vm3 = vmmov 0  }
 0x51f   : > { %v3966_v33 = vpop.eup %3965  ;;  %3599 = vmatprep.subr.msk.bf16.mxu0 %vm5461_vm1, %v3308_v4  ;;  %3747 = vmatprep.subr.msk.bf16.mxu1 %vm5461_vm1, %v3308_v4 }
 0x520   : > { %v3968_v39 = vpop.eup %3967  ;;  %v1807_v60 = vmul.f32 %v3966_v33, %v1685_v9  ;;  %v1865_v35 = vpop.permute.xlu1 %1864  ;;  %v1690_v9 = vld [vmem:[#allocation3 + $0x70] sm:$0xff] }
 0x521   : > { %v1862_v14 = vpop.permute.xlu0 %1861  ;;  %vm1893_vm6 = vcmp.eq.s32.totalorder %v1865_v35, 1  ;;  %v1805_v15 = vmul.f32 %v3968_v39, %v1684_v31 }
 0x522   : > { %vm1892_vm7 = vcmp.eq.s32.totalorder %v1862_v14, 1  ;;  %v1909_v3 = vsel %vm1893_vm6, %v1807_v60, 0.0 }
 0x523   : > { %1925 = vst [vmem:[#allocation14 + $0x48] sm:$0xff] %v1909_v3  ;;  %v5475_v19 = vmul.f32 %v1909_v3, %v1909_v3  ;;  %v1908_v45 = vsel %vm1892_vm7, %v1805_v15, 0.0  ;;  %v3311_v18 = vpack.c.bf16 %v1807_v60, %v1805_v15  ;;  %vm5479_vm2 = vmpackc.low %vm1893_vm6, %vm1892_vm7 }
 0x524   : > { %1924 = vst [vmem:[#allocation14 + $0x40] sm:$0xff] %v1908_v45  ;;  %v5477_v7 = vmul.f32 %v1908_v45, %v1908_v45  ;;  %v1776_v61 = vpop.permute.xlu1 %1775 }
 0x525   : > { %v1771_v20 = vpop.permute.xlu0 %1770  ;;  %3973 = vrcp.f32 %v1776_v61 }
 0x526   : > { %v3717_v47 = vpack.c.bf16 %v5475_v19, %v5477_v7  ;;  %3975 = vrcp.f32 %v1771_v20  ;;  %3600 = vmatpush3.bf16.xpose.msk.msra.mxu0 %vm5461_vm1, %v3308_v4  ;;  %3755 = vmatpush3.bf16.xpose.msk.msra.mxu1 %vm5461_vm1, %v3308_v4  ;;  %v4335_v20 = vmov 0.0|0.0   ;;  %v1975_v19 = vld [vmem:[#allocation2 + $0xe8] sm:$0xff]  ;;  %v1961_v7 = vld [vmem:[#allocation2 + $0x78] sm:$0xff] }
 0x527   : > { %v3970_v43 = vpop.eup %3969  ;;  %3601 = vmatprep.subr.msk.bf16.mxu0 %vm5479_vm2, %v3311_v18  ;;  %3748 = vmatprep.subr.msk.bf16.mxu1 %vm5479_vm2, %v3311_v18 }
 0x528   : > { %v3972_v6 = vpop.eup %3971  ;;  %v1811_v27 = vmul.f32 %v3970_v43, %v1687_v16  ;;  %v1871_v29 = vpop.permute.xlu1 %1870  ;;  %v1932_v16 = vmul.f32 %v5414_v41, %v5414_v41  ;;  %v1964_v43 = vld [vmem:[#allocation2 + $0x90] sm:$0xff]  ;;  %v1967_v41 = vld [vmem:[#allocation2 + $0xa8] sm:$0xff] }
 0x529   : > { %v1868_v62 = vpop.permute.xlu0 %1867  ;;  %vm1895_vm8 = vcmp.eq.s32.totalorder %v1871_v29, 1  ;;  %v1809_v13 = vmul.f32 %v3972_v6, %v1686_v21  ;;  %v1949_v21 = vld [vmem:[#allocation2 + $0x18] sm:$0xff] }
 0x52a   : > { %vm1894_vm5 = vcmp.eq.s32.totalorder %v1868_v62, 1  ;;  %v1911_v57 = vsel %vm1895_vm8, %v1811_v27, 0.0  ;;  %v1965_v29 = vld [vmem:[#allocation2 + $0x98] sm:$0xff]  ;;  %v1951_v62 = vld [vmem:[#allocation2 + $0x28] sm:$0xff] }
 0x52b   : > { %1927 = vst [vmem:[#allocation14 + $0x58] sm:$0xff] %v1911_v57  ;;  %v5493_v55 = vmul.f32 %v1911_v57, %v1911_v57  ;;  %v1910_v37 = vsel %vm1894_vm5, %v1809_v13, 0.0  ;;  %v3314_v2 = vpack.c.bf16 %v1811_v27, %v1809_v13  ;;  %vm5497_vm9 = vmpackc.low %vm1895_vm8, %vm1894_vm5  ;;  %v1950_v27 = vld [vmem:[#allocation2 + $0x20] sm:$0xff]  ;;  %v1952_v57 = vld [vmem:[#allocation2 + $0x30] sm:$0xff] }
 0x52c   : > { %1926 = vst [vmem:[#allocation14 + $0x50] sm:$0xff] %v1910_v37  ;;  %v5495_v34 = vmul.f32 %v1910_v37, %v1910_v37  ;;  %v1786_v25 = vpop.permute.xlu1 %1785  ;;  %v1966_v13 = vld [vmem:[#allocation2 + $0xa0] sm:$0xff]  ;;  %v1968_v37 = vld [vmem:[#allocation2 + $0xb0] sm:$0xff] }
 0x52d   : > { %v1781_v30 = vpop.permute.xlu0 %1780  ;;  %3977 = vrcp.f32 %v1786_v25  ;;  %v1954_v25 = vld [vmem:[#allocation2 + $0x40] sm:$0xff] }
 0x52e   : > { %v3720_v42 = vpack.c.bf16 %v5493_v55, %v5495_v34  ;;  %3979 = vrcp.f32 %v1781_v30  ;;  %3602 = vmatpush3.bf16.xpose.msk.msra.mxu0 %vm5479_vm2, %v3311_v18  ;;  %3756 = vmatpush3.bf16.xpose.msk.msra.mxu1 %vm5479_vm2, %v3311_v18  ;;  %v1933_v18 = vmul.f32 %v5419_v53, %v5419_v53  ;;  %v1953_v53 = vld [vmem:[#allocation2 + $0x38] sm:$0xff]  ;;  %v1956_v30 = vld [vmem:[#allocation2 + $0x50] sm:$0xff]  ;;  %v4337_v55 = vmov 0.0  }
 0x52f   : > { %v3974_v17 = vpop.eup %3973  ;;  %3603 = vmatprep.subr.msk.bf16.mxu0 %vm5497_vm9, %v3314_v2  ;;  %3749 = vmatprep.subr.msk.bf16.mxu1 %vm5497_vm9, %v3314_v2  ;;  %v4338_v34 = vmov 1.0  }
 0x530   : > { %v3976_v22 = vpop.eup %3975  ;;  %v1815_v44 = vmul.f32 %v3974_v17, %v1689_v56  ;;  %v1877_v5 = vpop.permute.xlu1 %1876  ;;  %v3705_v6 = vpack.c.bf16 %v1933_v18, %v1932_v16  ;;  %v1960_v56 = vld [vmem:[#allocation2 + $0x70] sm:$0xff] }
 0x531   : > { %v1874_v48 = vpop.permute.xlu0 %1873  ;;  %vm1897_vm10 = vcmp.eq.s32.totalorder %v1877_v5, 1  ;;  %v1813_v58 = vmul.f32 %v3976_v22, %v1688_v24 }
 0x532   : > { %vm1896_vm11 = vcmp.eq.s32.totalorder %v1874_v48, 1  ;;  %v1913_v38 = vsel %vm1897_vm10, %v1815_v44, 0.0 }
 0x533   : > { %1929 = vst [vmem:[#allocation14 + $0x68] sm:$0xff] %v1913_v38  ;;  %v5511_v26 = vmul.f32 %v1913_v38, %v1913_v38  ;;  %v1912_v12 = vsel %vm1896_vm11, %v1813_v58, 0.0  ;;  %v3317_v0 = vpack.c.bf16 %v1815_v44, %v1813_v58  ;;  %vm5515_vm12 = vmpackc.low %vm1897_vm10, %vm1896_vm11 }
 0x534   : > { %1928 = vst [vmem:[#allocation14 + $0x60] sm:$0xff] %v1912_v12  ;;  %v5513_v23 = vmul.f32 %v1912_v12, %v1912_v12  ;;  %v1883_v4 = vpop.permute.xlu1 %1882 }
 0x535   : > { %v1880_v31 = vpop.permute.xlu0 %1879  ;;  %vm1899_vm13 = vcmp.eq.s32.totalorder %v1883_v4, 1 }
 0x536   : > { %v3723_v28 = vpack.c.bf16 %v5511_v26, %v5513_v23  ;;  %3604 = vmatpush3.bf16.xpose.msk.msra.mxu0 %vm5497_vm9, %v3314_v2  ;;  %3757 = vmatpush3.bf16.xpose.msk.msra.mxu1 %vm5497_vm9, %v3314_v2  ;;  %vm1898_vm15 = vcmp.eq.s32.totalorder %v1880_v31, 1  ;;  %v1958_v2 = vld [vmem:[#allocation2 + $0x60] sm:$0xff] }
 0x537   : > { %v3978_v59 = vpop.eup %3977  ;;  %3605 = vmatprep.subr.msk.bf16.mxu0 %vm5515_vm12, %v3317_v0  ;;  %3750 = vmatprep.subr.msk.bf16.mxu1 %vm5515_vm12, %v3317_v0  ;;  %vm3319_vm4 = vmpackc.low %vm1899_vm13, %vm1898_vm15 }
 0x538   : > { %v3980_v33 = vpop.eup %3979  ;;  %v1819_v39 = vmul.f32 %v3978_v59, %v1691_v50 }
 0x539   : > { %v1817_v60 = vmul.f32 %v3980_v33, %v1690_v9 }
 0x53a   : > { %v1915_v35 = vsel %vm1899_vm13, %v1819_v39, 0.0 }
 0x53b   : > { %1931 = vst [vmem:[#allocation14 + $0x78] sm:$0xff] %v1915_v35  ;;  %v5529_v14 = vmul.f32 %v1915_v35, %v1915_v35  ;;  %v1914_v15 = vsel %vm1898_vm15, %v1817_v60, 0.0  ;;  %v3320_v45 = vpack.c.bf16 %v1819_v39, %v1817_v60 }
 0x53c   : > { %1930 = vst [vmem:[#allocation14 + $0x70] sm:$0xff] %v1914_v15  ;;  %v5531_v3 = vmul.f32 %v1914_v15, %v1914_v15 }
 0x53e   : > { %v3726_v61 = vpack.c.bf16 %v5529_v14, %v5531_v3  ;;  %3606 = vmatpush3.bf16.xpose.msk.msra.mxu0 %vm5515_vm12, %v3317_v0  ;;  %3758 = vmatpush3.bf16.xpose.msk.msra.mxu1 %vm5515_vm12, %v3317_v0 }
 0x53f   : > { %3607 = vmatprep.subr.msk.bf16.mxu0 %vm3319_vm4, %v3320_v45  ;;  %3751 = vmatprep.subr.msk.bf16.mxu1 %vm3319_vm4, %v3320_v45 }
 0x546   : > { %3608 = vmatpush3.bf16.xpose.msk.msra.mxu0 %vm3319_vm4, %v3320_v45  ;;  %3759 = vmatpush3.bf16.xpose.msk.msra.mxu1 %vm3319_vm4, %v3320_v45 }
 0x547   : > { %3704 = vmatprep.subr.bf16.mxu1 %v4335_v20 }
 0x54d   : > { %3638 = vmatmul.mubr.bf16.vlgmr.msra.gmra.mrb[0].mxu1 %v1963_v11  ;;  %3610 = vmatmul.mubr.bf16.vlgmr.msra.gmra.mrb[0].mxu0 %v1949_v21 }
 0x54e   : > { %3706 = vmatpush3.bf16.xpose.msra.mxu1 %v3705_v6  ;;  %3641 = vmatprep.mubr.bf16.mxu1 %v1964_v43 }
 0x54f   : > { %3707 = vmatprep.subr.bf16.mxu1 %v4335_v20  ;;  %3613 = vmatprep.mubr.bf16.mxu0 %v1950_v27 }
 0x555   : > { %3642 = vmatmul.mubr.bf16.gmra.mrb[4].mxu1 %v1965_v29  ;;  %3614 = vmatmul.mubr.bf16.gmra.mrb[4].mxu0 %v1951_v62 }
 0x556   : > { %3709 = vmatpush3.bf16.xpose.msra.mxu1 %v3708_v10  ;;  %3645 = vmatprep.mubr.bf16.mxu1 %v1966_v13  ;;  %v1970_v10 = vld [vmem:[#allocation2 + $0xc0] sm:$0xff] }
 0x557   : > { %3710 = vmatprep.subr.bf16.mxu1 %v4335_v20  ;;  %3617 = vmatprep.mubr.bf16.mxu0 %v1952_v57 }
 0x55d   : > { %3646 = vmatmul.mubr.bf16.gmra.mrb[8].mxu1 %v1967_v41  ;;  %3618 = vmatmul.mubr.bf16.gmra.mrb[8].mxu0 %v1953_v53 }
 0x55e   : > { %3712 = vmatpush3.bf16.xpose.msra.mxu1 %v3711_v1  ;;  %3649 = vmatprep.mubr.bf16.mxu1 %v1968_v37  ;;  %v1972_v1 = vld [vmem:[#allocation2 + $0xd0] sm:$0xff] }
 0x55f   : > { %3713 = vmatprep.subr.bf16.mxu1 %v4335_v20  ;;  %3621 = vmatprep.mubr.bf16.mxu0 %v1954_v25 }
 0x565   : > { %3650 = vmatmul.mubr.bf16.gmra.mrb[12].mxu1 %v1969_v52  ;;  %3622 = vmatmul.mubr.bf16.gmra.mrb[12].mxu0 %v1955_v54 }
 0x566   : > { %3715 = vmatpush3.bf16.xpose.msra.mxu1 %v3714_v40  ;;  %3653 = vmatprep.mubr.bf16.mxu1 %v1970_v10  ;;  %v1974_v40 = vld [vmem:[#allocation2 + $0xe0] sm:$0xff] }
 0x567   : > { %3716 = vmatprep.subr.bf16.mxu1 %v4335_v20  ;;  %3625 = vmatprep.mubr.bf16.mxu0 %v1956_v30 }
 0x56d   : > { %3654 = vmatmul.mubr.bf16.gmra.mrb[16].mxu1 %v1971_v63  ;;  %3626 = vmatmul.mubr.bf16.gmra.mrb[16].mxu0 %v1957_v49 }
 0x56e   : > { %3718 = vmatpush3.bf16.xpose.msra.mxu1 %v3717_v47  ;;  %3657 = vmatprep.mubr.bf16.mxu1 %v1972_v1  ;;  %v1976_v47 = vld [vmem:[#allocation2 + $0xf0] sm:$0xff] }
 0x56f   : > { %3719 = vmatprep.subr.bf16.mxu1 %v4335_v20  ;;  %3629 = vmatprep.mubr.bf16.mxu0 %v1958_v2 }
 0x575   : > { %3658 = vmatmul.mubr.bf16.gmra.mrb[20].mxu1 %v1973_v32  ;;  %3630 = vmatmul.mubr.bf16.gmra.mrb[20].mxu0 %v1959_v46 }
 0x576   : > { %3721 = vmatpush3.bf16.xpose.msra.mxu1 %v3720_v42  ;;  %3661 = vmatprep.mubr.bf16.mxu1 %v1974_v40 }
 0x577   : > { %3722 = vmatprep.subr.bf16.mxu1 %v4335_v20  ;;  %3633 = vmatprep.mubr.bf16.mxu0 %v1960_v56 }
 0x57d   : > { %3662 = vmatmul.mubr.bf16.gmra.mrb[24].mxu1 %v1975_v19  ;;  %3634 = vmatmul.mubr.bf16.gmra.mrb[24].mxu0 %v1961_v7 }
 0x57e   : > { %3724 = vmatpush3.bf16.xpose.msra.mxu1 %v3723_v28  ;;  %3665 = vmatprep.mubr.bf16.mxu1 %v1976_v47 }
 0x57f   : > { %3725 = vmatprep.subr.bf16.mxu1 %v4335_v20 }
 0x585   : > { %3666 = vmatmul.mubr.bf16.gmra.mrb[28].mxu1 %v1977_v51 }
 0x586   : > { %3727 = vmatpush3.bf16.xpose.msra.mxu1 %v3726_v61  ;;  %3701 = vmatprep.mubr.msk.f32.mxu1 %vm4336_vm3, %v4337_v55 }
 0x58d   : > { %3702 = vmatmul.mubr.f32.vlgmr.msra.gmra.mrb[32].mxu1 %v4338_v34 }
 0x620   : > { %v3639_v42 = vpop.f32.mrb[0].mxu1  ;;  %v3611_v24 = vpop.f32.mrb[0].mxu0 }
 0x621   : > { %v2132_v17 = vpop.f32.mrb[1].mxu1  ;;  %v2020_v22 = vpop.f32.mrb[1].mxu0  ;;  %v5578_v56 = vmul.f32 2.0, %v3639_v42  ;;  %v5580_v19 = vmul.f32 2.0, %v3611_v24 }
 0x622   : > { %v3640_v44 = vpop.f32.mrb[2].mxu1  ;;  %v3612_v5 = vpop.f32.mrb[2].mxu0  ;;  %v5582_v7 = vmul.f32 2.0, %v2132_v17  ;;  %v5586_v51 = vmul.f32 2.0, %v2020_v22 }
 0x623   : > { %v2135_v48 = vpop.f32.mrb[3].mxu1  ;;  %v2023_v58 = vpop.f32.mrb[3].mxu0  ;;  %v5584_v47 = vmul.f32 2.0, %v3640_v44  ;;  %v5588_v55 = vmul.f32 2.0, %v3612_v5 }
 0x624   : > { %v5590_v34 = vmul.f32 2.0, %v2135_v48 }
 0x625   : > { %7100 = vst [vmem:[#allocation43_spill] sm:$0xff] %v5584_v47 }
 0x628   : > { %v3643_v38 = vpop.f32.mrb[4].mxu1  ;;  %v3615_v26 = vpop.f32.mrb[4].mxu0 }
 0x629   : > { %v2148_v12 = vpop.f32.mrb[5].mxu1  ;;  %v2036_v23 = vpop.f32.mrb[5].mxu0  ;;  %v5592_v8 = vmul.f32 2.0, %v3643_v38 }
 0x62a   : > { %v3644_v0 = vpop.f32.mrb[6].mxu1  ;;  %v3616_v50 = vpop.f32.mrb[6].mxu0  ;;  %v5598_v42 = vmul.f32 2.0, %v2148_v12  ;;  %v5602_v17 = vmul.f32 2.0, %v2036_v23 }
 0x62b   : > { %v2151_v36 = vpop.f32.mrb[7].mxu1  ;;  %v2039_v28 = vpop.f32.mrb[7].mxu0  ;;  %v5600_v24 = vmul.f32 2.0, %v3644_v0  ;;  %v5604_v44 = vmul.f32 2.0, %v3616_v50 }
 0x62c   : > { %v5606_v47 = vmul.f32 2.0, %v2151_v36  ;;  %v5610_v48 = vmul.f32 2.0, %v2039_v28 }
 0x62d   : > { %7101 = vst [vmem:[#allocation44_spill] sm:$0xff] %v5600_v24 }
 0x630   : > { %v3647_v4 = vpop.f32.mrb[8].mxu1  ;;  %v3619_v9 = vpop.f32.mrb[8].mxu0 }
 0x631   : > { %v2164_v59 = vpop.f32.mrb[9].mxu1  ;;  %v2052_v31 = vpop.f32.mrb[9].mxu0  ;;  %v5608_v5 = vmul.f32 2.0, %v3647_v4  ;;  %v5612_v38 = vmul.f32 2.0, %v3619_v9 }
 0x632   : > { %v3648_v33 = vpop.f32.mrb[10].mxu1  ;;  %v3620_v39 = vpop.f32.mrb[10].mxu0  ;;  %v5618_v0 = vmul.f32 2.0, %v2052_v31 }
 0x633   : > { %v2167_v60 = vpop.f32.mrb[11].mxu1  ;;  %v2055_v35 = vpop.f32.mrb[11].mxu0  ;;  %7102 = vst [vmem:[#allocation45_spill] sm:$0xff] %v5608_v5  ;;  %v5616_v12 = vmul.f32 2.0, %v3648_v33  ;;  %v5620_v23 = vmul.f32 2.0, %v3620_v39 }
 0x634   : > { %v5622_v24 = vmul.f32 2.0, %v2167_v60  ;;  %v5626_v4 = vmul.f32 2.0, %v2055_v35 }
 0x635   : > { %7103 = vst [vmem:[#allocation46_spill] sm:$0xff] %v5616_v12 }
 0x638   : > { %v3651_v14 = vpop.f32.mrb[12].mxu1  ;;  %v3623_v15 = vpop.f32.mrb[12].mxu0 }
 0x639   : > { %v2180_v3 = vpop.f32.mrb[13].mxu1  ;;  %v2068_v45 = vpop.f32.mrb[13].mxu0  ;;  %v5624_v36 = vmul.f32 2.0, %v3651_v14  ;;  %v5628_v28 = vmul.f32 2.0, %v3623_v15 }
 0x63a   : > { %v3652_v61 = vpop.f32.mrb[14].mxu1  ;;  %v3624_v20 = vpop.f32.mrb[14].mxu0  ;;  %v5630_v5 = vmul.f32 2.0, %v2180_v3  ;;  %v5634_v33 = vmul.f32 2.0, %v2068_v45 }
 0x63b   : > { %v2183_v18 = vpop.f32.mrb[15].mxu1  ;;  %v2071_v16 = vpop.f32.mrb[15].mxu0  ;;  %7104 = vst [vmem:[#allocation47_spill] sm:$0xff] %v5624_v36  ;;  %v5636_v31 = vmul.f32 2.0, %v3624_v20 }
 0x63c   : > { %v5638_v39 = vmul.f32 2.0, %v2183_v18  ;;  %v5642_v60 = vmul.f32 2.0, %v2071_v16 }
 0x640   : > { %v3655_v11 = vpop.f32.mrb[16].mxu1  ;;  %v3627_v21 = vpop.f32.mrb[16].mxu0 }
 0x641   : > { %v2196_v43 = vpop.f32.mrb[17].mxu1  ;;  %v2084_v6 = vpop.f32.mrb[17].mxu0  ;;  %v5640_v12 = vmul.f32 2.0, %v3655_v11  ;;  %v5644_v14 = vmul.f32 2.0, %v3627_v21 }
 0x642   : > { %v3656_v27 = vpop.f32.mrb[18].mxu1  ;;  %v3628_v29 = vpop.f32.mrb[18].mxu0  ;;  %v5646_v35 = vmul.f32 2.0, %v2196_v43  ;;  %v5650_v3 = vmul.f32 2.0, %v2084_v6 }
 0x643   : > { %v2199_v62 = vpop.f32.mrb[19].mxu1  ;;  %v2087_v13 = vpop.f32.mrb[19].mxu0  ;;  %v5648_v15 = vmul.f32 2.0, %v3656_v27 }
 0x644   : > { %v5654_v45 = vmul.f32 2.0, %v2199_v62  ;;  %v5658_v18 = vmul.f32 2.0, %v2087_v13 }
 0x645   : > { %7106 = vst [vmem:[#allocation49_spill] sm:$0xff] %v5648_v15 }
 0x648   : > { %v3659_v57 = vpop.f32.mrb[20].mxu1  ;;  %v3631_v41 = vpop.f32.mrb[20].mxu0 }
 0x649   : > { %v2212_v53 = vpop.f32.mrb[21].mxu1  ;;  %v2100_v37 = vpop.f32.mrb[21].mxu0  ;;  %v5656_v20 = vmul.f32 2.0, %v3659_v57  ;;  %v5660_v11 = vmul.f32 2.0, %v3631_v41 }
 0x64a   : > { %v3660_v25 = vpop.f32.mrb[22].mxu1  ;;  %v3632_v52 = vpop.f32.mrb[22].mxu0  ;;  %v5662_v16 = vmul.f32 2.0, %v2212_v53  ;;  %v5666_v43 = vmul.f32 2.0, %v2100_v37 }
 0x64b   : > { %v2215_v54 = vpop.f32.mrb[23].mxu1  ;;  %v2103_v10 = vpop.f32.mrb[23].mxu0  ;;  %7107 = vst [vmem:[#allocation50_spill] sm:$0xff] %v5656_v20  ;;  %v5664_v21 = vmul.f32 2.0, %v3660_v25  ;;  %v5668_v27 = vmul.f32 2.0, %v3632_v52 }
 0x64c   : > { %v5670_v15 = vmul.f32 2.0, %v2215_v54  ;;  %v5674_v62 = vmul.f32 2.0, %v2103_v10  ;;  %v7114_v10 = vld [vmem:[#allocation26_spill] sm:$0xff] }
 0x64d   : > { %7108 = vst [vmem:[#allocation51_spill] sm:$0xff] %v5664_v21 }
 0x650   : > { %v3663_v30 = vpop.f32.mrb[24].mxu1  ;;  %v5572_v63 = vpop.f32.mrb[24].mxu0 }
 0x651   : > { %v2228_v49 = vpop.f32.mrb[25].mxu1  ;;  %v5574_v1 = vpop.f32.mrb[25].mxu0  ;;  %v5681_v53 = vmul.f32 2.0, %v5572_v63 }
 0x652   : > { %7098 = vst [vmem:[#allocation41_spill] sm:$0xff] %v5574_v1  ;;  %v3664_v2 = vpop.f32.mrb[26].mxu1  ;;  %v5576_v32 = vpop.f32.mrb[26].mxu0  ;;  %v5594_v1 = vmul.f32 2.0, %v2023_v58  ;;  %v5676_v20 = vmul.f32 2.0, %v2228_v49  ;;  %v7123_v36 = vld [vmem:[#allocation50_spill] sm:$0xff] }
 0x653   : > { %7099 = vst [vmem:[#allocation42_spill] sm:$0xff] %v5576_v32  ;;  %v2231_v46 = vpop.f32.mrb[27].mxu1  ;;  %v2119_v40 = vpop.f32.mrb[27].mxu0  ;;  %v5596_v32 = vmul.f32 2.0, %v3615_v26  ;;  %v5614_v26 = vmul.f32 2.0, %v2164_v59  ;;  %v5632_v59 = vmul.f32 2.0, %v3652_v61 }
 0x654   : > { %v5652_v61 = vmul.f32 2.0, %v3628_v29  ;;  %v5672_v29 = vmul.f32 2.0, %v3663_v30  ;;  %7110 = vst [vmem:[#allocation53_spill] sm:$0xff] %v5676_v20  ;;  %v5678_v41 = vmul.f32 2.0, %v3664_v2  ;;  %v5686_v52 = vmul.f32 2.0, %v2231_v46 }
 0x655   : > { %7105 = vst [vmem:[#allocation48_spill] sm:$0xff] %v5632_v59  ;;  %v5691_v30 = vmul.f32 2.0, %v2119_v40  ;;  %v7124_v59 = vld [vmem:[#allocation51_spill] sm:$0xff] }
 0x656   : > { %7109 = vst [vmem:[#allocation52_spill] sm:$0xff] %v5672_v29  ;;  %7111 = vst [vmem:[#allocation54_spill] sm:$0xff] %v5678_v41 }
 0x658   : > { %v3667_v22 = vpop.f32.mrb[28].mxu1 }
 0x659   : > { %v2244_v58 = vpop.f32.mrb[29].mxu1  ;;  %v7112_v37 = vld [vmem:[#allocation41_spill] sm:$0xff]  ;;  %v5697_v49 = vmul.f32 2.0, %v3667_v22 }
 0x65a   : > { %v3668_v50 = vpop.f32.mrb[30].mxu1  ;;  %v5684_v25 = vmul.f32 2.0, %v7112_v37  ;;  %v7113_v54 = vld [vmem:[#allocation42_spill] sm:$0xff]  ;;  %v5699_v2 = vmul.f32 2.0, %v2244_v58 }
 0x65b   : > { %v2247_v9 = vpop.f32.mrb[31].mxu1  ;;  %v5689_v21 = vmul.f32 2.0, %v7113_v54  ;;  %7116 = vst [vmem:[#allocation41_spill] sm:$0xff] %v5697_v49  ;;  %v5701_v63 = vmul.f32 2.0, %v3668_v50 }
 0x65c   : > { %7117 = vst [vmem:[#allocation42_spill] sm:$0xff] %v5699_v2  ;;  %v5703_v41 = vmul.f32 2.0, %v2247_v9 }
 0x660   : > { %v2325_v6 = vpop.f32.mrb[32].mxu1 }
 0x661   : > { %v2326_v57 = vadd.f32 1.0, %v2325_v6  ;;  %v3703_v13 = vpop.f32.mrb[33].mxu1  ;;  %v7115_v6 = vsub.s32 0, %v7114_v10  ;;  %v7120_v10 = vld [vmem:[#allocation45_spill] sm:$0xff] }
 0x663   : > { %v5695_v13 = vrot.slane %v2326_v57, %v7115_v6  ;;  %v7136_v6 = vld [vmem:[#allocation48_spill] sm:$0xff] }
 0x665   : > { %v2393_v46 = vsub.f32 %v5695_v13, %v5586_v51  ;;  %v2394_v37 = vsub.f32 %v5695_v13, %v5594_v1  ;;  %v2395_v40 = vsub.f32 %v5695_v13, %v5580_v19  ;;  %v2396_v57 = vsub.f32 %v5695_v13, %v5588_v55 }
 0x666   : > { %v2397_v22 = vsub.f32 %v5695_v13, %v5602_v17  ;;  %v2398_v58 = vsub.f32 %v5695_v13, %v5610_v48  ;;  %v2399_v50 = vsub.f32 %v5695_v13, %v5596_v32  ;;  %v2400_v51 = vsub.f32 %v5695_v13, %v5604_v44 }
 0x667   : > { %v2401_v1 = vsub.f32 %v5695_v13, %v5618_v0  ;;  %v2402_v19 = vsub.f32 %v5695_v13, %v5626_v4  ;;  %v2403_v55 = vsub.f32 %v5695_v13, %v5612_v38  ;;  %v2404_v17 = vsub.f32 %v5695_v13, %v5620_v23 }
 0x668   : > { %v2405_v48 = vsub.f32 %v5695_v13, %v5634_v33  ;;  %v2406_v32 = vsub.f32 %v5695_v13, %v5642_v60  ;;  %v2407_v44 = vsub.f32 %v5695_v13, %v5628_v28  ;;  %v2408_v0 = vsub.f32 %v5695_v13, %v5636_v31 }
 0x669   : > { %v2409_v4 = vsub.f32 %v5695_v13, %v5650_v3  ;;  %v2410_v38 = vsub.f32 %v5695_v13, %v5658_v18  ;;  %v2411_v23 = vsub.f32 %v5695_v13, %v5644_v14  ;;  %v2412_v9 = vsub.f32 %v5695_v13, %v5652_v61 }
 0x66a   : > { %v2413_v33 = vsub.f32 %v5695_v13, %v5666_v43  ;;  %v2414_v28 = vsub.f32 %v5695_v13, %v5674_v62  ;;  %v2415_v31 = vsub.f32 %v5695_v13, %v5660_v11  ;;  %v2416_v60 = vsub.f32 %v5695_v13, %v5668_v27  ;;  %v7118_v62 = vld [vmem:[#allocation43_spill] sm:$0xff] }
 0x66b   : > { %v2417_v3 = vsub.f32 %v5695_v13, %v5684_v25  ;;  %v2418_v14 = vsub.f32 %v5695_v13, %v5691_v30  ;;  %v2419_v61 = vsub.f32 %v5695_v13, %v5681_v53  ;;  %v2420_v18 = vsub.f32 %v5695_v13, %v5689_v21  ;;  %v7119_v30 = vld [vmem:[#allocation44_spill] sm:$0xff] }
 0x66c   : > { %v2421_v43 = vsub.f32 %v5695_v13, %v5582_v7  ;;  %v2422_v11 = vsub.f32 %v5695_v13, %v5590_v34  ;;  %v2423_v27 = vsub.f32 %v5695_v13, %v5578_v56  ;;  %v2424_v25 = vsub.f32 %v5695_v13, %v7118_v62  ;;  %v7125_v62 = vld [vmem:[#allocation54_spill] sm:$0xff] }
 0x66d   : > { %v2425_v54 = vsub.f32 %v5695_v13, %v5598_v42  ;;  %v2426_v53 = vsub.f32 %v5695_v13, %v5606_v47  ;;  %v2427_v21 = vsub.f32 %v5695_v13, %v5592_v8  ;;  %v2428_v7 = vsub.f32 %v5695_v13, %v7119_v30 }
 0x66e   : > { %v2429_v34 = vsub.f32 %v5695_v13, %v5614_v26  ;;  %v5825_v20 = vmax.f32 %v2393_v46, 0.0  ;;  %v5827_v42 = vmax.f32 %v2394_v37, 0.0  ;;  %v5829_v47 = vmax.f32 %v2395_v40, 0.0 }
 0x66f   : > { %v5831_v29 = vmax.f32 %v2396_v57, 0.0  ;;  %v5833_v8 = vmax.f32 %v2397_v22, 0.0  ;;  %v5835_v30 = vmax.f32 %v2398_v58, 0.0  ;;  %v5837_v2 = vmax.f32 %v2399_v50, 0.0 }
 0x670   : > { %v5839_v26 = vmax.f32 %v2400_v51, 0.0  ;;  %v5841_v56 = vmax.f32 %v2401_v1, 0.0  ;;  %v5843_v49 = vmax.f32 %v2402_v19, 0.0  ;;  %v5845_v46 = vmax.f32 %v2403_v55, 0.0 }
 0x671   : > { %v5847_v37 = vmax.f32 %v2404_v17, 0.0  ;;  %v5849_v40 = vmax.f32 %v2405_v48, 0.0  ;;  %v5851_v57 = vmax.f32 %v2406_v32, 0.0  ;;  %v5853_v22 = vmax.f32 %v2407_v44, 0.0 }
 0x672   : > { %v5855_v58 = vmax.f32 %v2408_v0, 0.0  ;;  %v5857_v50 = vmax.f32 %v2409_v4, 0.0  ;;  %v5859_v51 = vmax.f32 %v2410_v38, 0.0  ;;  %v5861_v1 = vmax.f32 %v2411_v23, 0.0 }
 0x673   : > { %v5863_v19 = vmax.f32 %v2412_v9, 0.0  ;;  %v5865_v55 = vmax.f32 %v2413_v33, 0.0  ;;  %v5867_v17 = vmax.f32 %v2414_v28, 0.0  ;;  %v5869_v48 = vmax.f32 %v2415_v31, 0.0 }
 0x674   : > { %v5871_v32 = vmax.f32 %v2416_v60, 0.0  ;;  %v5873_v44 = vmax.f32 %v2417_v3, 0.0  ;;  %v5875_v0 = vmax.f32 %v2418_v14, 0.0  ;;  %v5877_v4 = vmax.f32 %v2419_v61, 0.0 }
 0x675   : > { %v5879_v38 = vmax.f32 %v2420_v18, 0.0  ;;  %3981 = vrsqrt.f32 %v5825_v20  ;;  %v5882_v23 = vmax.f32 %v2421_v43, 0.0  ;;  %v5884_v9 = vmax.f32 %v2422_v11, 0.0 }
 0x676   : > { %v5886_v33 = vmax.f32 %v2423_v27, 0.0  ;;  %3983 = vrsqrt.f32 %v5827_v42  ;;  %v5889_v28 = vmax.f32 %v2424_v25, 0.0  ;;  %v5891_v31 = vmax.f32 %v2425_v54, 0.0  ;;  %v7128_v25 = vld [vmem:[#allocation46_spill] sm:$0xff] }
 0x677   : > { %v5893_v60 = vmax.f32 %v2426_v53, 0.0  ;;  %3985 = vrsqrt.f32 %v5829_v47  ;;  %v5896_v3 = vmax.f32 %v2427_v21, 0.0  ;;  %v5898_v14 = vmax.f32 %v2428_v7, 0.0 }
 0x678   : > { %v5900_v61 = vmax.f32 %v2429_v34, 0.0  ;;  %3987 = vrsqrt.f32 %v5831_v29  ;;  %v7126_v18 = vsub.f32 %v5695_v13, %v5622_v24  ;;  %v7127_v11 = vsub.f32 %v5695_v13, %v7120_v10 }
 0x679   : > { %v7129_v54 = vsub.f32 %v5695_v13, %v7128_v25  ;;  %v7130_v21 = vsub.f32 %v5695_v13, %v5630_v5  ;;  %v7131_v24 = vsub.f32 %v5695_v13, %v5638_v39  ;;  %v7137_v25 = vsub.f32 %v5695_v13, %v7136_v6  ;;  %v7145_v6 = vld [vmem:[#allocation49_spill] sm:$0xff] }
 0x67a   : > { %v5906_v43 = vmax.f32 %v7126_v18, 0.0  ;;  %v5911_v27 = vmax.f32 %v7127_v11, 0.0  ;;  %v7133_v18 = vld [vmem:[#allocation47_spill] sm:$0xff]  ;;  %3989 = vrsqrt.f32 %v5833_v8  ;;  %v7139_v5 = vsub.f32 %v5695_v13, %v5646_v35 }
 0x67b   : > { %v5916_v53 = vmax.f32 %v7129_v54, 0.0  ;;  %v5921_v7 = vmax.f32 %v7130_v21, 0.0  ;;  %v5926_v34 = vmax.f32 %v7131_v24, 0.0  ;;  %v7134_v10 = vsub.f32 %v5695_v13, %v7133_v18 }
 0x67c   : > { %v5936_v54 = vmax.f32 %v7137_v25, 0.0  ;;  %v5942_v21 = vmax.f32 %v7139_v5, 0.0  ;;  %v7141_v39 = vsub.f32 %v5695_v13, %v5654_v45  ;;  %v7143_v18 = vsub.f32 %v5695_v13, %v5640_v12 }
 0x67d   : > { %7132 = vst [vmem:[#allocation43_spill] sm:$0xff] %v5926_v34  ;;  %v5931_v11 = vmax.f32 %v7134_v10, 0.0  ;;  %3991 = vrsqrt.f32 %v5835_v30  ;;  %v7146_v25 = vsub.f32 %v5695_v13, %v7145_v6  ;;  %v7148_v35 = vsub.f32 %v5695_v13, %v5662_v16  ;;  %v7156_v16 = vld [vmem:[#allocation53_spill] sm:$0xff] }
 0x67e   : > { %7138 = vst [vmem:[#allocation45_spill] sm:$0xff] %v5936_v54  ;;  %7140 = vst [vmem:[#allocation50_spill] sm:$0xff] %v5942_v21  ;;  %v5947_v24 = vmax.f32 %v7141_v39, 0.0  ;;  %v5952_v10 = vmax.f32 %v7143_v18, 0.0  ;;  %v7150_v45 = vsub.f32 %v5695_v13, %v5670_v15  ;;  %3993 = vrsqrt.f32 %v5837_v2 }
 0x67f   : > { %7135 = vst [vmem:[#allocation44_spill] sm:$0xff] %v5931_v11  ;;  %v5958_v54 = vmax.f32 %v7146_v25, 0.0  ;;  %v5963_v5 = vmax.f32 %v7148_v35, 0.0  ;;  %v7152_v12 = vsub.f32 %v5695_v13, %v7123_v36  ;;  %v7154_v6 = vsub.f32 %v5695_v13, %v7124_v59  ;;  %v7161_v36 = vld [vmem:[#allocation52_spill] sm:$0xff] }
 0x680   : > { %7142 = vst [vmem:[#allocation51_spill] sm:$0xff] %v5947_v24  ;;  %7144 = vst [vmem:[#allocation54_spill] sm:$0xff] %v5952_v10  ;;  %v5968_v39 = vmax.f32 %v7150_v45, 0.0  ;;  %v7157_v35 = vsub.f32 %v5695_v13, %v7156_v16  ;;  %3995 = vrsqrt.f32 %v5839_v26  ;;  %v7159_v15 = vsub.f32 %v5695_v13, %v5686_v52  ;;  %v3982_v16 = vpop.eup %3981 }
 0x681   : > { %7147 = vst [vmem:[#allocation46_spill] sm:$0xff] %v5958_v54  ;;  %7149 = vst [vmem:[#allocation47_spill] sm:$0xff] %v5963_v5  ;;  %v5974_v18 = vmax.f32 %v7152_v12, 0.0  ;;  %v5979_v25 = vmax.f32 %v7154_v6, 0.0  ;;  %v7162_v12 = vsub.f32 %v5695_v13, %v7161_v36  ;;  %v7164_v59 = vsub.f32 %v5695_v13, %v7125_v62  ;;  %v7171_v36 = vld [vmem:[#allocation41_spill] sm:$0xff]  ;;  %v3984_v62 = vpop.eup %3983 }
 0x682   : > { %7151 = vst [vmem:[#allocation48_spill] sm:$0xff] %v5968_v39  ;;  %v5984_v5 = vmax.f32 %v7157_v35, 0.0  ;;  %v5990_v45 = vmax.f32 %v7159_v15, 0.0  ;;  %3997 = vrsqrt.f32 %v5841_v56  ;;  %v7166_v35 = vld [vmem:[#allocation42_spill] sm:$0xff]  ;;  %v7169_v52 = vsub.f32 %v5695_v13, %v5703_v41  ;;  %v3986_v41 = vpop.eup %3985 }
 0x683   : > { %7153 = vst [vmem:[#allocation49_spill] sm:$0xff] %v5974_v18  ;;  %7155 = vst [vmem:[#allocation55_spill] sm:$0xff] %v5979_v25  ;;  %v5995_v18 = vmax.f32 %v7162_v12, 0.0  ;;  %v6000_v6 = vmax.f32 %v7164_v59, 0.0  ;;  %v7172_v12 = vsub.f32 %v5695_v13, %v7171_v36  ;;  %3999 = vrsqrt.f32 %v5843_v49 }
 0x684   : > { %7158 = vst [vmem:[#allocation53_spill] sm:$0xff] %v5984_v5  ;;  %7160 = vst [vmem:[#allocation56_spill] sm:$0xff] %v5990_v45  ;;  %v7167_v5 = vsub.f32 %v5695_v13, %v7166_v35  ;;  %v6011_v15 = vmax.f32 %v7169_v52, 0.0  ;;  %v7174_v59 = vsub.f32 %v5695_v13, %v5701_v63  ;;  %vm2515_vm0 = vcmp.eq.f32.partialorder %v5825_v20, inf  ;;  %v3988_v13 = vpop.eup %3987 }
 0x685   : > { %7163 = vst [vmem:[#allocation52_spill] sm:$0xff] %v5995_v18  ;;  %7165 = vst [vmem:[#allocation57_spill] sm:$0xff] %v6000_v6  ;;  %v6016_v18 = vmax.f32 %v7172_v12, 0.0  ;;  %4001 = vrsqrt.f32 %v5845_v46  ;;  %vm2517_vm14 = vcmp.eq.f32.partialorder %v5825_v20, 0.0  ;;  %vm2522_vm1 = vcmp.eq.f32.partialorder %v5827_v42, inf  ;;  %v3990_v12 = vpop.eup %3989 }
 0x686   : > { %v6006_v25 = vmax.f32 %v7167_v5, 0.0  ;;  %7170 = vst [vmem:[#allocation58_spill] sm:$0xff] %v6011_v15  ;;  %v6022_v6 = vmax.f32 %v7174_v59, 0.0  ;;  %v2518_v5 = vand.u32 2147483648, %v5825_v20  ;;  %v2525_v35 = vand.u32 2147483648, %v5827_v42 }
 0x687   : > { %7173 = vst [vmem:[#allocation41_spill] sm:$0xff] %v6016_v18  ;;  %vm2529_vm6 = vcmp.eq.f32.partialorder %v5829_v47, inf  ;;  %4003 = vrsqrt.f32 %v5847_v37  ;;  %vm2524_vm7 = vcmp.eq.f32.partialorder %v5827_v42, 0.0  ;;  %vm2531_vm2 = vcmp.eq.f32.partialorder %v5829_v47, 0.0  ;;  %v3992_v15 = vpop.eup %3991 }
 0x688   : > { %7168 = vst [vmem:[#allocation42_spill] sm:$0xff] %v6006_v25  ;;  %7175 = vst [vmem:[#allocation59_spill] sm:$0xff] %v6022_v6  ;;  %v2532_v63 = vand.u32 2147483648, %v5829_v47  ;;  %vm2536_vm8 = vcmp.eq.f32.partialorder %v5831_v29, inf  ;;  %4005 = vrsqrt.f32 %v5849_v40  ;;  %v2514_v52 = vmul.f32 %v3982_v16, %v5825_v20  ;;  %v3994_v39 = vpop.eup %3993 }
 0x689   : > { %vm2538_vm5 = vcmp.eq.f32.partialorder %v5831_v29, 0.0  ;;  %v2539_v36 = vand.u32 2147483648, %v5831_v29  ;;  %vm2543_vm9 = vcmp.eq.f32.partialorder %v5833_v8, inf  ;;  %4007 = vrsqrt.f32 %v5851_v57 }
 0x68a   : > { %v2521_v59 = vmul.f32 %v3984_v62, %v5827_v42  ;;  %v2528_v6 = vmul.f32 %v3986_v41, %v5829_v47  ;;  %vm2550_vm10 = vcmp.eq.f32.partialorder %v5835_v30, inf  ;;  %v2535_v16 = vmul.f32 %v3988_v13, %v5831_v29  ;;  %v3996_v18 = vpop.eup %3995 }
 0x68b   : > { %vm2557_vm11 = vcmp.eq.f32.partialorder %v5837_v2, inf  ;;  %vm2545_vm12 = vcmp.eq.f32.partialorder %v5833_v8, 0.0  ;;  %vm2564_vm13 = vcmp.eq.f32.partialorder %v5839_v26, inf  ;;  %vm2571_vm15 = vcmp.eq.f32.partialorder %v5841_v56, inf }
 0x68c   : > { %v2516_v13 = vsel %vm2515_vm0, %v5825_v20, %v2514_v52  ;;  %4009 = vrsqrt.f32 %v5853_v22  ;;  %v3998_v25 = vpop.eup %3997  ;;  %v2523_v62 = vsel %vm2522_vm1, %v5827_v42, %v2521_v59  ;;  %v2530_v41 = vsel %vm2529_vm6, %v5829_v47, %v2528_v6 }
 0x68d   : > { %v2542_v54 = vmul.f32 %v3990_v12, %v5833_v8  ;;  %vm2559_vm0 = vcmp.eq.f32.partialorder %v5837_v2, 0.0  ;;  %vm2566_vm4 = vcmp.eq.f32.partialorder %v5839_v26, 0.0  ;;  %v2588_v52 = vand.u32 2147483648, %v5845_v46  ;;  %v4000_v45 = vpop.eup %3999 }
 0x68e   : > { %v2537_v10 = vsel %vm2536_vm8, %v5831_v29, %v2535_v16  ;;  %v2549_v59 = vmul.f32 %v3992_v15, %v5835_v30  ;;  %vm2573_vm1 = vcmp.eq.f32.partialorder %v5841_v56, 0.0  ;;  %v2595_v6 = vand.u32 2147483648, %v5847_v37 }
 0x68f   : > { %4011 = vrsqrt.f32 %v5855_v58  ;;  %v4002_v12 = vpop.eup %4001  ;;  %v6083_v24 = vsel %vm2517_vm14, %v2518_v5, %v2516_v13  ;;  %v2556_v21 = vmul.f32 %v3994_v39, %v5837_v2  ;;  %v2563_v11 = vmul.f32 %v3996_v18, %v5839_v26 }
 0x690   : > { %vm2580_vm8 = vcmp.eq.f32.partialorder %v5843_v49, 0.0  ;;  %vm2599_vm3 = vcmp.eq.f32.partialorder %v5849_v40, inf  ;;  %v2602_v15 = vand.u32 2147483648, %v5849_v40  ;;  %v6092_v34 = vsel %vm2524_vm7, %v2525_v35, %v2523_v62 }
 0x691   : > { %v4004_v16 = vpop.eup %4003  ;;  %v6096_v20 = vsel %vm2531_vm2, %v2532_v63, %v2530_v41  ;;  %v2570_v5 = vmul.f32 %v3998_v25, %v5841_v56  ;;  %vm2587_vm14 = vcmp.eq.f32.partialorder %v5845_v46, 0.0  ;;  %vm2606_vm6 = vcmp.eq.f32.partialorder %v5851_v57, inf }
 0x692   : > { %v4006_v39 = vpop.eup %4005  ;;  %v6103_v18 = vsel %vm2538_vm5, %v2539_v36, %v2537_v10  ;;  %v2544_v42 = vsel %vm2543_vm9, %v5833_v8, %v2542_v54  ;;  %v2577_v35 = vmul.f32 %v4000_v45, %v5843_v49  ;;  %vm2594_vm7 = vcmp.eq.f32.partialorder %v5847_v37, 0.0 }
 0x693   : > { %4013 = vrsqrt.f32 %v5857_v50  ;;  %v4008_v47 = vpop.eup %4007  ;;  %v2551_v25 = vsel %vm2550_vm10, %v5835_v30, %v2549_v59  ;;  %v2584_v63 = vmul.f32 %v4002_v12, %v5845_v46  ;;  %vm2601_vm2 = vcmp.eq.f32.partialorder %v5849_v40, 0.0 }
 0x694   : > { %v2609_v29 = vand.u32 2147483648, %v5851_v57  ;;  %4015 = vrsqrt.f32 %v5859_v51  ;;  %v2558_v54 = vsel %vm2557_vm11, %v5837_v2, %v2556_v21  ;;  %v2565_v10 = vsel %vm2564_vm13, %v5839_v26, %v2563_v11 }
 0x695   : > { %v2591_v45 = vmul.f32 %v4004_v16, %v5847_v37  ;;  %vm2608_vm5 = vcmp.eq.f32.partialorder %v5851_v57, 0.0  ;;  %4017 = vrsqrt.f32 %v5861_v1  ;;  %v7176_v36 = vand.u32 2147483648, %v5833_v8 }
 0x696   : > { %v2572_v21 = vsel %vm2571_vm15, %v5841_v56, %v2570_v5  ;;  %v2598_v41 = vmul.f32 %v4006_v39, %v5849_v40  ;;  %4019 = vrsqrt.f32 %v5863_v19  ;;  %v7177_v11 = vand.u32 2147483648, %v5835_v30  ;;  %v4010_v12 = vpop.eup %4009 }
 0x697   : > { %v6131_v62 = vsel %vm2545_vm12, %v7176_v36, %v2544_v42  ;;  %vm7178_vm9 = vcmp.eq.f32.partialorder %v5835_v30, 0.0  ;;  %vm7179_vm10 = vcmp.eq.f32.partialorder %v5843_v49, inf  ;;  %v2605_v59 = vmul.f32 %v4008_v47, %v5851_v57 }
 0x698   : > { %v6142_v13 = vsel %vm7178_vm9, %v7177_v11, %v2551_v25  ;;  %v2579_v8 = vsel %vm7179_vm10, %v5843_v49, %v2577_v35  ;;  %vm2613_vm11 = vcmp.eq.f32.partialorder %v5853_v22, inf  ;;  %v7180_v16 = vand.u32 2147483648, %v5837_v2 }
 0x699   : > { %v7181_v39 = vand.u32 2147483648, %v5839_v26  ;;  %vm7182_vm12 = vcmp.eq.f32.partialorder %v5845_v46, inf  ;;  %4021 = vrsqrt.f32 %v5865_v55  ;;  %v7183_v35 = vand.u32 2147483648, %v5841_v56  ;;  %v4012_v25 = vpop.eup %4011 }
 0x69a   : > { %v6153_v5 = vsel %vm2559_vm0, %v7180_v16, %v2558_v54  ;;  %v2586_v42 = vsel %vm7182_vm12, %v5845_v46, %v2584_v63  ;;  %vm7184_vm13 = vcmp.eq.f32.partialorder %v5847_v37, inf  ;;  %vm2615_vm15 = vcmp.eq.f32.partialorder %v5853_v22, 0.0 }
 0x69b   : > { %v6159_v30 = vsel %vm2566_vm4, %v7181_v39, %v2565_v10  ;;  %v6169_v47 = vsel %vm2573_vm1, %v7183_v35, %v2572_v21  ;;  %v2593_v2 = vsel %vm7184_vm13, %v5847_v37, %v2591_v45  ;;  %v2616_v26 = vand.u32 2147483648, %v5853_v22 }
 0x69c   : > { %4023 = vrsqrt.f32 %v5867_v17  ;;  %v7185_v63 = vand.u32 2147483648, %v5843_v49  ;;  %v2600_v56 = vsel %vm2599_vm3, %v5849_v40, %v2598_v41  ;;  %vm2620_vm4 = vcmp.eq.f32.partialorder %v5855_v58, inf }
 0x69d   : > { %4025 = vrsqrt.f32 %v5869_v48  ;;  %v6190_v10 = vsel %vm2587_vm14, %v2588_v52, %v2586_v42  ;;  %v2607_v45 = vsel %vm2606_vm6, %v5851_v57, %v2605_v59  ;;  %v2612_v49 = vmul.f32 %v4010_v12, %v5853_v22  ;;  %v4014_v46 = vpop.eup %4013 }
 0x69e   : > { %v6181_v54 = vsel %vm2580_vm8, %v7185_v63, %v2579_v8  ;;  %4027 = vrsqrt.f32 %v5871_v32  ;;  %v6199_v36 = vsel %vm2594_vm7, %v2595_v6, %v2593_v2  ;;  %vm2622_vm3 = vcmp.eq.f32.partialorder %v5855_v58, 0.0  ;;  %v4016_v37 = vpop.eup %4015 }
 0x69f   : > { %v2623_v21 = vand.u32 2147483648, %v5855_v58  ;;  %4029 = vrsqrt.f32 %v5873_v44  ;;  %v6206_v52 = vsel %vm2601_vm2, %v2602_v15, %v2600_v56  ;;  %v2619_v41 = vmul.f32 %v4012_v25, %v5855_v58  ;;  %v4018_v40 = vpop.eup %4017 }
 0x6a0   : > { %vm2627_vm0 = vcmp.eq.f32.partialorder %v5857_v50, inf  ;;  %4031 = vrsqrt.f32 %v5875_v0  ;;  %v6213_v6 = vsel %vm2608_vm5, %v2609_v29, %v2607_v45  ;;  %vm2629_vm1 = vcmp.eq.f32.partialorder %v5857_v50, 0.0  ;;  %v4020_v29 = vpop.eup %4019 }
 0x6a1   : > { %v2630_v11 = vand.u32 2147483648, %v5857_v50  ;;  %vm2634_vm6 = vcmp.eq.f32.partialorder %v5859_v51, inf  ;;  %4033 = vrsqrt.f32 %v5877_v4  ;;  %v2614_v15 = vsel %vm2613_vm11, %v5853_v22, %v2612_v49 }
 0x6a2   : > { %vm2636_vm8 = vcmp.eq.f32.partialorder %v5859_v51, 0.0  ;;  %v2637_v8 = vand.u32 2147483648, %v5859_v51  ;;  %vm2641_vm14 = vcmp.eq.f32.partialorder %v5861_v1, inf  ;;  %v2644_v57 = vand.u32 2147483648, %v5861_v1 }
 0x6a3   : > { %v2626_v59 = vmul.f32 %v4014_v46, %v5857_v50  ;;  %vm2643_vm7 = vcmp.eq.f32.partialorder %v5861_v1, 0.0  ;;  %vm2648_vm2 = vcmp.eq.f32.partialorder %v5863_v19, inf  ;;  %v2651_v12 = vand.u32 2147483648, %v5863_v19  ;;  %v4022_v35 = vpop.eup %4021 }
 0x6a4   : > { %4035 = vrsqrt.f32 %v5879_v38  ;;  %v2621_v16 = vsel %vm2620_vm4, %v5855_v58, %v2619_v41  ;;  %v2633_v39 = vmul.f32 %v4016_v37, %v5859_v51  ;;  %vm2650_vm5 = vcmp.eq.f32.partialorder %v5863_v19, 0.0 }
 0x6a5   : > { %vm2655_vm9 = vcmp.eq.f32.partialorder %v5865_v55, inf  ;;  %v2658_v42 = vand.u32 2147483648, %v5865_v55  ;;  %v6240_v2 = vsel %vm2615_vm15, %v2616_v26, %v2614_v15  ;;  %v2640_v25 = vmul.f32 %v4018_v40, %v5861_v1 }
 0x6a6   : > { %vm2662_vm10 = vcmp.eq.f32.partialorder %v5867_v17, inf  ;;  %4037 = vrsqrt.f32 %v5882_v23  ;;  %v4024_v63 = vpop.eup %4023  ;;  %v2647_v56 = vmul.f32 %v4020_v29, %v5863_v19  ;;  %vm2657_vm11 = vcmp.eq.f32.partialorder %v5865_v55, 0.0 }
 0x6a7   : > { %v2665_v45 = vand.u32 2147483648, %v5867_v17  ;;  %vm2669_vm12 = vcmp.eq.f32.partialorder %v5869_v48, inf  ;;  %v2672_v49 = vand.u32 2147483648, %v5869_v48  ;;  %v4026_v22 = vpop.eup %4025  ;;  %v6252_v26 = vsel %vm2622_vm3, %v2623_v21, %v2621_v16 }
 0x6a8   : > { %7186 = vst [vmem:[#allocation60_spill] sm:$0xff] %v6252_v26  ;;  %v2628_v46 = vsel %vm2627_vm0, %v5857_v50, %v2626_v59  ;;  %vm2664_vm13 = vcmp.eq.f32.partialorder %v5867_v17, 0.0  ;;  %vm2676_vm15 = vcmp.eq.f32.partialorder %v5871_v32, inf  ;;  %4039 = vrsqrt.f32 %v5884_v9  ;;  %v4028_v37 = vpop.eup %4027 }
 0x6a9   : > { %v2635_v40 = vsel %vm2634_vm6, %v5859_v51, %v2633_v39  ;;  %v2654_v58 = vmul.f32 %v4022_v35, %v5865_v55  ;;  %vm2671_vm4 = vcmp.eq.f32.partialorder %v5869_v48, 0.0  ;;  %vm2683_vm3 = vcmp.eq.f32.partialorder %v5873_v44, inf  ;;  %v4030_v15 = vpop.eup %4029 }
 0x6aa   : > { %v2686_v21 = vand.u32 2147483648, %v5873_v44  ;;  %v2642_v29 = vsel %vm2641_vm14, %v5861_v1, %v2640_v25  ;;  %v2661_v59 = vmul.f32 %v4024_v63, %v5867_v17  ;;  %v2693_v16 = vand.u32 2147483648, %v5875_v0  ;;  %v4032_v39 = vpop.eup %4031 }
 0x6ab   : > { %4041 = vrsqrt.f32 %v5886_v33  ;;  %v6277_v35 = vsel %vm2629_vm1, %v2630_v11, %v2628_v46  ;;  %v2649_v41 = vsel %vm2648_vm2, %v5863_v19, %v2647_v56  ;;  %v2668_v26 = vmul.f32 %v4026_v22, %v5869_v48  ;;  %v4034_v25 = vpop.eup %4033 }
 0x6ac   : > { %vm2678_vm6 = vcmp.eq.f32.partialorder %v5871_v32, 0.0  ;;  %vm2685_vm14 = vcmp.eq.f32.partialorder %v5873_v44, 0.0  ;;  %vm2697_vm0 = vcmp.eq.f32.partialorder %v5877_v4, inf  ;;  %v6288_v63 = vsel %vm2636_vm8, %v2637_v8, %v2635_v40 }
 0x6ad   : > { %v2700_v50 = vand.u32 2147483648, %v5877_v4  ;;  %vm2704_vm1 = vcmp.eq.f32.partialorder %v5879_v38, inf  ;;  %4043 = vrsqrt.f32 %v5889_v28  ;;  %v6295_v11 = vsel %vm2643_vm7, %v2644_v57, %v2642_v29 }
 0x6ae   : > { %v2656_v56 = vsel %vm2655_vm9, %v5865_v55, %v2654_v58  ;;  %v2675_v22 = vmul.f32 %v4028_v37, %v5871_v32  ;;  %v2682_v51 = vmul.f32 %v4030_v15, %v5873_v44  ;;  %vm2692_vm8 = vcmp.eq.f32.partialorder %v5875_v0, 0.0  ;;  %v4036_v8 = vpop.eup %4035 }
 0x6af   : > { %vm2699_vm2 = vcmp.eq.f32.partialorder %v5877_v4, 0.0  ;;  %v6306_v46 = vsel %vm2650_vm5, %v2651_v12, %v2649_v41  ;;  %v2663_v1 = vsel %vm2662_vm10, %v5867_v17, %v2661_v59  ;;  %v2707_v57 = vand.u32 2147483648, %v5879_v38 }
 0x6b0   : > { %4045 = vrsqrt.f32 %v5891_v31  ;;  %v2670_v37 = vsel %vm2669_vm12, %v5869_v48, %v2668_v26  ;;  %v2689_v40 = vmul.f32 %v4032_v39, %v5875_v0  ;;  %v2696_v58 = vmul.f32 %v4034_v25, %v5877_v4  ;;  %v4038_v19 = vpop.eup %4037 }
 0x6b1   : > { %vm2706_vm7 = vcmp.eq.f32.partialorder %v5879_v38, 0.0  ;;  %4047 = vrsqrt.f32 %v5893_v60  ;;  %v6322_v12 = vsel %vm2657_vm11, %v2658_v42, %v2656_v56  ;;  %vm2711_vm5 = vcmp.eq.f32.partialorder %v5882_v23, inf }
 0x6b2   : > { %v2714_v41 = vand.u32 2147483648, %v5882_v23  ;;  %4049 = vrsqrt.f32 %v5896_v3  ;;  %v6329_v26 = vsel %vm2664_vm13, %v2665_v45, %v2663_v1  ;;  %v2677_v15 = vsel %vm2676_vm15, %v5871_v32, %v2675_v22  ;;  %v4040_v29 = vpop.eup %4039 }
 0x6b3   : > { %v2684_v55 = vsel %vm2683_vm3, %v5873_v44, %v2682_v51  ;;  %v2703_v42 = vmul.f32 %v4036_v8, %v5879_v38  ;;  %vm2713_vm9 = vcmp.eq.f32.partialorder %v5882_v23, 0.0  ;;  %v6341_v59 = vsel %vm2671_vm4, %v2672_v49, %v2670_v37 }
 0x6b4   : > { %vm2718_vm10 = vcmp.eq.f32.partialorder %v5884_v9, inf  ;;  %v2721_v17 = vand.u32 2147483648, %v5884_v9  ;;  %4051 = vrsqrt.f32 %v5898_v14  ;;  %vm7187_vm11 = vcmp.eq.f32.partialorder %v5875_v0, inf }
 0x6b5   : > { %v2691_v45 = vsel %vm7187_vm11, %v5875_v0, %v2689_v40  ;;  %v2698_v39 = vsel %vm2697_vm0, %v5877_v4, %v2696_v58  ;;  %v2710_v25 = vmul.f32 %v4038_v19, %v5882_v23  ;;  %vm2720_vm12 = vcmp.eq.f32.partialorder %v5884_v9, 0.0  ;;  %v4042_v48 = vpop.eup %4041 }
 0x6b6   : > { %4053 = vrsqrt.f32 %v5900_v61  ;;  %v7188_v49 = vand.u32 2147483648, %v5871_v32  ;;  %v6363_v22 = vsel %vm2685_vm14, %v2686_v21, %v2684_v55  ;;  %vm2725_vm13 = vcmp.eq.f32.partialorder %v5886_v33, inf }
 0x6b7   : > { %4055 = vrsqrt.f32 %v5906_v43  ;;  %v2705_v51 = vsel %vm2704_vm1, %v5879_v38, %v2703_v42  ;;  %v2717_v8 = vmul.f32 %v4040_v29, %v5884_v9  ;;  %vm2727_vm15 = vcmp.eq.f32.partialorder %v5886_v33, 0.0  ;;  %v4044_v32 = vpop.eup %4043  ;;  %v7189_v29 = vld [vmem:[#allocation43_spill] sm:$0xff] }
 0x6b8   : > { %v6359_v56 = vsel %vm2678_vm6, %v7188_v49, %v2677_v15  ;;  %4057 = vrsqrt.f32 %v5911_v27  ;;  %v6375_v44 = vsel %vm2692_vm8, %v2693_v16, %v2691_v45  ;;  %v6379_v21 = vsel %vm2699_vm2, %v2700_v50, %v2698_v39 }
 0x6b9   : > { %v2728_v1 = vand.u32 2147483648, %v5886_v33  ;;  %vm2732_vm4 = vcmp.eq.f32.partialorder %v5889_v28, inf  ;;  %v2712_v37 = vsel %vm2711_vm5, %v5882_v23, %v2710_v25  ;;  %v2724_v40 = vmul.f32 %v4042_v48, %v5886_v33 }
 0x6ba   : > { %vm2734_vm3 = vcmp.eq.f32.partialorder %v5889_v28, 0.0  ;;  %v2735_v0 = vand.u32 2147483648, %v5889_v28  ;;  %4059 = vrsqrt.f32 %v5916_v53  ;;  %v4046_v16 = vpop.eup %4045  ;;  %v6392_v4 = vsel %vm2706_vm7, %v2707_v57, %v2705_v51 }
 0x6bb   : > { %vm2739_vm0 = vcmp.eq.f32.partialorder %v5891_v31, inf  ;;  %v2742_v50 = vand.u32 2147483648, %v5891_v31  ;;  %vm2746_vm6 = vcmp.eq.f32.partialorder %v5893_v60, inf  ;;  %v4048_v58 = vpop.eup %4047  ;;  %v2719_v19 = vsel %vm2718_vm10, %v5884_v9, %v2717_v8  ;;  %v7191_v9 = vld [vmem:[#allocation44_spill] sm:$0xff] }
 0x6bc   : > { %v2731_v15 = vmul.f32 %v4044_v32, %v5889_v28  ;;  %vm2741_vm14 = vcmp.eq.f32.partialorder %v5891_v31, 0.0  ;;  %v2749_v55 = vand.u32 2147483648, %v5893_v60  ;;  %4061 = vrsqrt.f32 %v5921_v7  ;;  %v4050_v38 = vpop.eup %4049 }
 0x6bd   : > { %v6406_v57 = vsel %vm2713_vm9, %v2714_v41, %v2712_v37  ;;  %vm2748_vm1 = vcmp.eq.f32.partialorder %v5893_v60, 0.0  ;;  %vm2753_vm8 = vcmp.eq.f32.partialorder %v5896_v3, inf  ;;  %v2756_v42 = vand.u32 2147483648, %v5896_v3 }
 0x6be   : > { %4063 = vrsqrt.f32 %v7189_v29  ;;  %v2726_v45 = vsel %vm2725_vm13, %v5886_v33, %v2724_v40  ;;  %v2738_v39 = vmul.f32 %v4046_v16, %v5891_v31  ;;  %vm2755_vm2 = vcmp.eq.f32.partialorder %v5896_v3, 0.0  ;;  %v4052_v41 = vpop.eup %4051  ;;  %v7193_v33 = vld [vmem:[#allocation45_spill] sm:$0xff] }
 0x6bf   : > { %vm2760_vm7 = vcmp.eq.f32.partialorder %v5898_v14, inf  ;;  %v2763_v23 = vand.u32 2147483648, %v5898_v14  ;;  %v6421_v25 = vsel %vm2720_vm12, %v2721_v17, %v2719_v19  ;;  %v2745_v48 = vmul.f32 %v4048_v58, %v5893_v60 }
 0x6c0   : > { %7190 = vst [vmem:[#allocation43_spill] sm:$0xff] %v6421_v25  ;;  %vm2767_vm5 = vcmp.eq.f32.partialorder %v5900_v61, inf  ;;  %v2770_v49 = vand.u32 2147483648, %v5900_v61  ;;  %v4054_v51 = vpop.eup %4053  ;;  %v2733_v8 = vsel %vm2732_vm4, %v5889_v28, %v2731_v15  ;;  %v2752_v32 = vmul.f32 %v4050_v38, %v5896_v3  ;;  %v7194_v28 = vld [vmem:[#allocation50_spill] sm:$0xff] }
 0x6c1   : > { %vm2762_vm9 = vcmp.eq.f32.partialorder %v5898_v14, 0.0  ;;  %vm2774_vm10 = vcmp.eq.f32.partialorder %v5906_v43, inf  ;;  %4065 = vrsqrt.f32 %v7191_v9  ;;  %v4056_v17 = vpop.eup %4055  ;;  %v6435_v37 = vsel %vm2727_vm15, %v2728_v1, %v2726_v45 }
 0x6c2   : > { %7192 = vst [vmem:[#allocation44_spill] sm:$0xff] %v6435_v37  ;;  %vm2769_vm11 = vcmp.eq.f32.partialorder %v5900_v61, 0.0  ;;  %v2777_v40 = vand.u32 2147483648, %v5906_v43  ;;  %vm2781_vm12 = vcmp.eq.f32.partialorder %v5911_v27, inf  ;;  %v2784_v16 = vand.u32 2147483648, %v5911_v27  ;;  %v4058_v58 = vpop.eup %4057 }
 0x6c3   : > { %v2740_v19 = vsel %vm2739_vm0, %v5891_v31, %v2738_v39  ;;  %v2759_v15 = vmul.f32 %v4052_v41, %v5898_v14  ;;  %vm2776_vm13 = vcmp.eq.f32.partialorder %v5906_v43, 0.0  ;;  %vm2788_vm15 = vcmp.eq.f32.partialorder %v5916_v53, inf }
 0x6c4   : > { %4067 = vrsqrt.f32 %v7193_v33  ;;  %v6450_v1 = vsel %vm2734_vm3, %v2735_v0, %v2733_v8  ;;  %v2747_v38 = vsel %vm2746_vm6, %v5893_v60, %v2745_v48  ;;  %v2766_v45 = vmul.f32 %v4054_v51, %v5900_v61  ;;  %v4060_v41 = vpop.eup %4059 }
 0x6c5   : > { %vm2783_vm4 = vcmp.eq.f32.partialorder %v5911_v27, 0.0  ;;  %v2791_v39 = vand.u32 2147483648, %v5916_v53  ;;  %v2754_v37 = vsel %vm2753_vm8, %v5896_v3, %v2752_v32  ;;  %v2773_v25 = vmul.f32 %v4056_v17, %v5906_v43 }
 0x6c6   : > { %vm2795_vm3 = vcmp.eq.f32.partialorder %v5921_v7, inf  ;;  %4069 = vrsqrt.f32 %v7194_v28  ;;  %v6466_v0 = vsel %vm2741_vm14, %v2742_v50, %v2740_v19  ;;  %v2780_v48 = vmul.f32 %v4058_v58, %v5911_v27  ;;  %v4062_v8 = vpop.eup %4061  ;;  %v7195_v50 = vld [vmem:[#allocation51_spill] sm:$0xff] }
 0x6c7   : > { %vm2790_vm0 = vcmp.eq.f32.partialorder %v5916_v53, 0.0  ;;  %v2798_v51 = vand.u32 2147483648, %v5921_v7  ;;  %vm2802_vm6 = vcmp.eq.f32.partialorder %v7189_v29, inf  ;;  %v6474_v32 = vsel %vm2748_vm1, %v2749_v55, %v2747_v38 }
 0x6c8   : > { %v2761_v17 = vsel %vm2760_vm7, %v5898_v14, %v2759_v15  ;;  %vm2797_vm14 = vcmp.eq.f32.partialorder %v5921_v7, 0.0  ;;  %v2805_v31 = vand.u32 2147483648, %v7189_v29  ;;  %4071 = vrsqrt.f32 %v7195_v50  ;;  %v4064_v58 = vpop.eup %4063 }
 0x6c9   : > { %v6484_v19 = vsel %vm2755_vm2, %v2756_v42, %v2754_v37  ;;  %v2768_v60 = vsel %vm2767_vm5, %v5900_v61, %v2766_v45  ;;  %v2787_v55 = vmul.f32 %v4060_v41, %v5916_v53  ;;  %vm2804_vm1 = vcmp.eq.f32.partialorder %v7189_v29, 0.0  ;;  %v7197_v42 = vld [vmem:[#allocation54_spill] sm:$0xff]  ;;  %v7200_v61 = vld [vmem:[#allocation47_spill] sm:$0xff] }
 0x6ca   : > { %7196 = vst [vmem:[#allocation45_spill] sm:$0xff] %v6484_v19  ;;  %vm2809_vm8 = vcmp.eq.f32.partialorder %v7191_v9, inf  ;;  %v2775_v15 = vsel %vm2774_vm10, %v5906_v43, %v2773_v25  ;;  %v2794_v38 = vmul.f32 %v4062_v8, %v5921_v7  ;;  %v2812_v3 = vand.u32 2147483648, %v7191_v9  ;;  %v7198_v19 = vld [vmem:[#allocation46_spill] sm:$0xff] }
 0x6cb   : > { %4073 = vrsqrt.f32 %v7197_v42  ;;  %v6500_v37 = vsel %vm2762_vm9, %v2763_v23, %v2761_v17  ;;  %v2782_v45 = vsel %vm2781_vm12, %v5911_v27, %v2780_v48  ;;  %v2801_v41 = vmul.f32 %v4064_v58, %v7189_v29  ;;  %v4066_v25 = vpop.eup %4065 }
 0x6cc   : > { %vm2811_vm2 = vcmp.eq.f32.partialorder %v7191_v9, 0.0  ;;  %4075 = vrsqrt.f32 %v7198_v19  ;;  %v6510_v8 = vsel %vm2769_vm11, %v2770_v49, %v2768_v60  ;;  %vm2816_vm7 = vcmp.eq.f32.partialorder %v7193_v33, inf }
 0x6cd   : > { %v2819_v14 = vand.u32 2147483648, %v7193_v33  ;;  %vm2823_vm5 = vcmp.eq.f32.partialorder %v7194_v28, inf  ;;  %v6517_v23 = vsel %vm2776_vm13, %v2777_v40, %v2775_v15  ;;  %v2789_v48 = vsel %vm2788_vm15, %v5916_v53, %v2787_v55  ;;  %v7202_v40 = vld [vmem:[#allocation48_spill] sm:$0xff] }
 0x6ce   : > { %7199 = vst [vmem:[#allocation50_spill] sm:$0xff] %v6517_v23  ;;  %v2808_v17 = vmul.f32 %v4066_v25, %v7191_v9  ;;  %vm2818_vm9 = vcmp.eq.f32.partialorder %v7193_v33, 0.0  ;;  %4077 = vrsqrt.f32 %v7200_v61  ;;  %v4068_v49 = vpop.eup %4067  ;;  %v6527_v58 = vsel %vm2783_vm4, %v2784_v16, %v2782_v45  ;;  %v7204_v45 = vld [vmem:[#allocation49_spill] sm:$0xff] }
 0x6cf   : > { %7201 = vst [vmem:[#allocation51_spill] sm:$0xff] %v6527_v58  ;;  %v2796_v43 = vsel %vm2795_vm3, %v5921_v7, %v2794_v38  ;;  %vm2825_vm10 = vcmp.eq.f32.partialorder %v7194_v28, 0.0  ;;  %4079 = vrsqrt.f32 %v7202_v40  ;;  %v2803_v60 = vsel %vm2802_vm6, %v7189_v29, %v2801_v41  ;;  %v7208_v29 = vld [vmem:[#allocation53_spill] sm:$0xff] }
 0x6d0   : > { %v2815_v55 = vmul.f32 %v4068_v49, %v7193_v33  ;;  %v2826_v15 = vand.u32 2147483648, %v7194_v28  ;;  %vm2830_vm11 = vcmp.eq.f32.partialorder %v7195_v50, inf  ;;  %v4070_v27 = vpop.eup %4069  ;;  %v6542_v16 = vsel %vm2790_vm0, %v2791_v39, %v2789_v48 }
 0x6d1   : > { %7203 = vst [vmem:[#allocation54_spill] sm:$0xff] %v6542_v16  ;;  %v2833_v38 = vand.u32 2147483648, %v7195_v50  ;;  %vm2837_vm12 = vcmp.eq.f32.partialorder %v7197_v42, inf  ;;  %4081 = vrsqrt.f32 %v7204_v45  ;;  %v6549_v41 = vsel %vm2797_vm14, %v2798_v51, %v2796_v43  ;;  %v7207_v51 = vld [vmem:[#allocation55_spill] sm:$0xff] }
 0x6d2   : > { %7205 = vst [vmem:[#allocation46_spill] sm:$0xff] %v6549_v41  ;;  %v2810_v25 = vsel %vm2809_vm8, %v7191_v9, %v2808_v17  ;;  %v2822_v49 = vmul.f32 %v4070_v27, %v7194_v28  ;;  %vm2832_vm13 = vcmp.eq.f32.partialorder %v7195_v50, 0.0  ;;  %v2840_v53 = vand.u32 2147483648, %v7197_v42  ;;  %v4072_v39 = vpop.eup %4071  ;;  %v7210_v9 = vld [vmem:[#allocation56_spill] sm:$0xff] }
 0x6d3   : > { %v6559_v48 = vsel %vm2804_vm1, %v2805_v31, %v2803_v60  ;;  %vm2844_vm15 = vcmp.eq.f32.partialorder %v7198_v19, inf  ;;  %v2847_v7 = vand.u32 2147483648, %v7198_v19  ;;  %4083 = vrsqrt.f32 %v7207_v51 }
 0x6d4   : > { %7206 = vst [vmem:[#allocation47_spill] sm:$0xff] %v6559_v48  ;;  %v2817_v17 = vsel %vm2816_vm7, %v7193_v33, %v2815_v55  ;;  %v2829_v43 = vmul.f32 %v4072_v39, %v7195_v50  ;;  %vm2839_vm4 = vcmp.eq.f32.partialorder %v7197_v42, 0.0  ;;  %vm2846_vm3 = vcmp.eq.f32.partialorder %v7198_v19, 0.0 }
 0x6d5   : > { %vm2851_vm0 = vcmp.eq.f32.partialorder %v7200_v61, inf  ;;  %4085 = vrsqrt.f32 %v7208_v29  ;;  %v4074_v31 = vpop.eup %4073  ;;  %v6574_v60 = vsel %vm2811_vm2, %v2812_v3, %v2810_v25  ;;  %v2824_v27 = vsel %vm2823_vm5, %v7194_v28, %v2822_v49 }
 0x6d6   : > { %7209 = vst [vmem:[#allocation48_spill] sm:$0xff] %v6574_v60  ;;  %vm2853_vm6 = vcmp.eq.f32.partialorder %v7200_v61, 0.0  ;;  %v2854_v55 = vand.u32 2147483648, %v7200_v61  ;;  %vm2858_vm14 = vcmp.eq.f32.partialorder %v7202_v40, inf  ;;  %v4076_v39 = vpop.eup %4075  ;;  %v2836_v48 = vmul.f32 %v4074_v31, %v7197_v42 }
 0x6d7   : > { %vm2860_vm1 = vcmp.eq.f32.partialorder %v7202_v40, 0.0  ;;  %v2861_v41 = vand.u32 2147483648, %v7202_v40  ;;  %vm2865_vm8 = vcmp.eq.f32.partialorder %v7204_v45, inf  ;;  %4087 = vrsqrt.f32 %v7210_v9 }
 0x6d8   : > { %v6589_v3 = vsel %vm2818_vm9, %v2819_v14, %v2817_v17  ;;  %v2843_v25 = vmul.f32 %v4076_v39, %v7198_v19  ;;  %vm2867_vm2 = vcmp.eq.f32.partialorder %v7204_v45, 0.0  ;;  %v2868_v49 = vand.u32 2147483648, %v7204_v45  ;;  %v4078_v31 = vpop.eup %4077  ;;  %v7213_v14 = vld [vmem:[#allocation52_spill] sm:$0xff] }
 0x6d9   : > { %7211 = vst [vmem:[#allocation49_spill] sm:$0xff] %v6589_v3  ;;  %v6597_v60 = vsel %vm2825_vm10, %v2826_v15, %v2824_v27  ;;  %v2831_v16 = vsel %vm2830_vm11, %v7195_v50, %v2829_v43  ;;  %v2875_v33 = vand.u32 2147483648, %v7207_v51  ;;  %4089 = vrsqrt.f32 %v7213_v14  ;;  %v4080_v17 = vpop.eup %4079 }
 0x6da   : > { %7212 = vst [vmem:[#allocation55_spill] sm:$0xff] %v6597_v60  ;;  %v2850_v39 = vmul.f32 %v4078_v31, %v7200_v61  ;;  %vm2874_vm5 = vcmp.eq.f32.partialorder %v7207_v51, 0.0  ;;  %vm2879_vm9 = vcmp.eq.f32.partialorder %v7208_v29, inf  ;;  %vm2881_vm7 = vcmp.eq.f32.partialorder %v7208_v29, 0.0  ;;  %v7214_v31 = vld [vmem:[#allocation57_spill] sm:$0xff] }
 0x6db   : > { %v2882_v28 = vand.u32 2147483648, %v7208_v29  ;;  %v2838_v15 = vsel %vm2837_vm12, %v7197_v42, %v2836_v48  ;;  %v2845_v43 = vsel %vm2844_vm15, %v7198_v19, %v2843_v25  ;;  %v2857_v27 = vmul.f32 %v4080_v17, %v7202_v40  ;;  %v4082_v60 = vpop.eup %4081  ;;  %v7216_v48 = vld [vmem:[#allocation42_spill] sm:$0xff] }
 0x6dc   : > { %vm2886_vm10 = vcmp.eq.f32.partialorder %v7210_v9, inf  ;;  %4091 = vrsqrt.f32 %v7214_v31  ;;  %v6620_v3 = vsel %vm2832_vm13, %v2833_v38, %v2831_v16  ;;  %v2852_v58 = vsel %vm2851_vm0, %v7200_v61, %v2850_v39  ;;  %v7218_v61 = vld [vmem:[#allocation41_spill] sm:$0xff] }
 0x6dd   : > { %7215 = vst [vmem:[#allocation53_spill] sm:$0xff] %v6620_v3  ;;  %vm2888_vm11 = vcmp.eq.f32.partialorder %v7210_v9, 0.0  ;;  %4093 = vrsqrt.f32 %v7216_v48  ;;  %v2859_v25 = vsel %vm2858_vm14, %v7202_v40, %v2857_v27  ;;  %v2864_v17 = vmul.f32 %v4082_v60, %v7204_v45  ;;  %v4084_v50 = vpop.eup %4083  ;;  %v7217_v27 = vld [vmem:[#allocation58_spill] sm:$0xff] }
 0x6de   : > { %v2889_v23 = vand.u32 2147483648, %v7210_v9  ;;  %vm2893_vm12 = vcmp.eq.f32.partialorder %v7213_v14, inf  ;;  %v6635_v16 = vsel %vm2839_vm4, %v2840_v53, %v2838_v15  ;;  %v6639_v38 = vsel %vm2846_vm3, %v2847_v7, %v2845_v43 }
 0x6df   : > { %vm2895_vm13 = vcmp.eq.f32.partialorder %v7213_v14, 0.0  ;;  %v2896_v39 = vand.u32 2147483648, %v7213_v14  ;;  %4095 = vrsqrt.f32 %v7217_v27  ;;  %v4086_v60 = vpop.eup %4085  ;;  %v6646_v3 = vsel %vm2853_vm6, %v2854_v55, %v2852_v58 }
 0x6e0   : > { %v2866_v42 = vsel %vm2865_vm8, %v7204_v45, %v2864_v17  ;;  %v2871_v53 = vmul.f32 %v4084_v50, %v7207_v51  ;;  %vm2900_vm15 = vcmp.eq.f32.partialorder %v7214_v31, inf  ;;  %v2903_v19 = vand.u32 2147483648, %v7214_v31 }
 0x6e1   : > { %v6656_v7 = vsel %vm2860_vm1, %v2861_v41, %v2859_v25  ;;  %v2878_v15 = vmul.f32 %v4086_v60, %v7208_v29  ;;  %vm2902_vm4 = vcmp.eq.f32.partialorder %v7214_v31, 0.0  ;;  %vm2907_vm3 = vcmp.eq.f32.partialorder %v7216_v48, inf  ;;  %v4088_v58 = vpop.eup %4087 }
 0x6e2   : > { %4097 = vrsqrt.f32 %v7218_v61  ;;  %v6664_v55 = vsel %vm2867_vm2, %v2868_v49, %v2866_v42  ;;  %vm7219_vm0 = vcmp.eq.f32.partialorder %v7207_v51, inf  ;;  %vm2909_vm6 = vcmp.eq.f32.partialorder %v7216_v48, 0.0  ;;  %v7220_v49 = vld [vmem:[#allocation59_spill] sm:$0xff] }
 0x6e3   : > { %v2873_v43 = vsel %vm7219_vm0, %v7207_v51, %v2871_v53  ;;  %v2910_v40 = vand.u32 2147483648, %v7216_v48  ;;  %v2880_v41 = vsel %vm2879_vm9, %v7208_v29, %v2878_v15  ;;  %v2885_v25 = vmul.f32 %v4088_v58, %v7210_v9  ;;  %v4090_v17 = vpop.eup %4089 }
 0x6e4   : > { %vm2914_vm14 = vcmp.eq.f32.partialorder %v7217_v27, inf  ;;  %v2917_v45 = vand.u32 2147483648, %v7217_v27  ;;  %4099 = vrsqrt.f32 %v7220_v49  ;;  %v6680_v50 = vsel %vm2874_vm5, %v2875_v33, %v2873_v43 }
 0x6e5   : > { %v6684_v60 = vsel %vm2881_vm7, %v2882_v28, %v2880_v41  ;;  %vm2916_vm1 = vcmp.eq.f32.partialorder %v7217_v27, 0.0  ;;  %v2924_v42 = vand.u32 2147483648, %v7218_v61  ;;  %v2931_v53 = vand.u32 2147483648, %v7220_v49 }
 0x6e6   : > { %v2887_v15 = vsel %vm2886_vm10, %v7210_v9, %v2885_v25  ;;  %v2892_v58 = vmul.f32 %v4090_v17, %v7213_v14  ;;  %vm2921_vm8 = vcmp.eq.f32.partialorder %v7218_v61, inf  ;;  %v2933_v51 = vsub.f32 0.0, %v6083_v24  ;;  %v4092_v33 = vpop.eup %4091 }
 0x6e7   : > { %v2934_v29 = vsub.f32 0.0, %v6092_v34  ;;  %v6698_v28 = vsel %vm2888_vm11, %v2889_v23, %v2887_v15  ;;  %vm2923_vm2 = vcmp.eq.f32.partialorder %v7218_v61, 0.0  ;;  %v2935_v43 = vsub.f32 0.0, %v6096_v20  ;;  %v4094_v17 = vpop.eup %4093 }
 0x6e8   : > { %v2936_v41 = vsub.f32 0.0, %v6103_v18  ;;  %v2937_v25 = vsub.f32 0.0, %v6131_v62  ;;  %v2894_v24 = vsel %vm2893_vm12, %v7213_v14, %v2892_v58  ;;  %v2899_v34 = vmul.f32 %v4092_v33, %v7214_v31  ;;  %2993 = vst [vmem:[#allocation13] sm:$0xff] %v2933_v51 }
 0x6e9   : > { %vm2928_vm7 = vcmp.eq.f32.partialorder %v7220_v49, inf  ;;  %v2938_v23 = vsub.f32 0.0, %v6142_v13  ;;  %v2939_v9 = vsub.f32 0.0, %v6153_v5  ;;  %2994 = vst [vmem:[#allocation13 + $0x8] sm:$0xff] %v2934_v29  ;;  %v6713_v20 = vsel %vm2895_vm13, %v2896_v39, %v2894_v24  ;;  %2995 = vst [vmem:[#allocation13 + $0x10] sm:$0xff] %v2935_v43  ;;  %v4096_v13 = vpop.eup %4095 }
 0x6ea   : > { %v2906_v18 = vmul.f32 %v4094_v17, %v7216_v48  ;;  %vm2930_vm5 = vcmp.eq.f32.partialorder %v7220_v49, 0.0  ;;  %v2940_v62 = vsub.f32 0.0, %v6159_v30  ;;  %v2941_v15 = vsub.f32 0.0, %v6169_v47  ;;  %2996 = vst [vmem:[#allocation13 + $0x18] sm:$0xff] %v2936_v41  ;;  %2997 = vst [vmem:[#allocation13 + $0x20] sm:$0xff] %v2937_v25 }
 0x6eb   : > { %v2901_v5 = vsel %vm2900_vm15, %v7214_v31, %v2899_v34  ;;  %v2942_v14 = vsub.f32 0.0, %v6181_v54  ;;  %v2943_v39 = vsub.f32 0.0, %v6190_v10  ;;  %v2944_v58 = vsub.f32 0.0, %v6199_v36  ;;  %2998 = vst [vmem:[#allocation13 + $0x28] sm:$0xff] %v2938_v23  ;;  %2999 = vst [vmem:[#allocation13 + $0x30] sm:$0xff] %v2939_v9 }
 0x6ec   : > { %v6727_v30 = vsel %vm2902_vm4, %v2903_v19, %v2901_v5  ;;  %v2908_v47 = vsel %vm2907_vm3, %v7216_v48, %v2906_v18  ;;  %v2913_v51 = vmul.f32 %v4096_v13, %v7217_v27  ;;  %v2945_v29 = vsub.f32 0.0, %v6206_v52  ;;  %3000 = vst [vmem:[#allocation13 + $0x38] sm:$0xff] %v2940_v62  ;;  %3001 = vst [vmem:[#allocation13 + $0x40] sm:$0xff] %v2941_v15  ;;  %v4098_v54 = vpop.eup %4097  ;;  %v7221_v19 = vld [vmem:[#allocation60_spill] sm:$0xff]  ;;  %v7226_v13 = vld [vmem:[#allocation51_spill] sm:$0xff] }
 0x6ed   : > { %v6736_v10 = vsel %vm2909_vm6, %v2910_v40, %v2908_v47  ;;  %v2946_v36 = vsub.f32 0.0, %v6213_v6  ;;  %v2947_v31 = vsub.f32 0.0, %v6240_v2  ;;  %v2948_v33 = vsub.f32 0.0, %v7221_v19  ;;  %3002 = vst [vmem:[#allocation13 + $0x48] sm:$0xff] %v2942_v14  ;;  %3003 = vst [vmem:[#allocation13 + $0x50] sm:$0xff] %v2943_v39  ;;  %v7227_v5 = vld [vmem:[#allocation54_spill] sm:$0xff] }
 0x6ee   : > { %3004 = vst [vmem:[#allocation13 + $0x58] sm:$0xff] %v2944_v58  ;;  %v2915_v52 = vsel %vm2914_vm14, %v7217_v27, %v2913_v51  ;;  %v2920_v43 = vmul.f32 %v4098_v54, %v7218_v61  ;;  %v2949_v41 = vsub.f32 0.0, %v6277_v35  ;;  %v2950_v48 = vsub.f32 0.0, %v6288_v63  ;;  %3005 = vst [vmem:[#allocation13 + $0x60] sm:$0xff] %v2945_v29  ;;  %v4100_v40 = vpop.eup %4099  ;;  %v7229_v39 = vld [vmem:[#allocation47_spill] sm:$0xff]  ;;  %v7230_v47 = vld [vmem:[#allocation48_spill] sm:$0xff] }
 0x6ef   : > { %v6751_v6 = vsel %vm2916_vm1, %v2917_v45, %v2915_v52  ;;  %v2951_v2 = vsub.f32 0.0, %v6295_v11  ;;  %v2952_v25 = vsub.f32 0.0, %v6306_v46  ;;  %v2953_v17 = vsub.f32 0.0, %v6322_v12  ;;  %3006 = vst [vmem:[#allocation13 + $0x68] sm:$0xff] %v2946_v36  ;;  %3007 = vst [vmem:[#allocation13 + $0x70] sm:$0xff] %v2947_v31  ;;  %v7231_v51 = vld [vmem:[#allocation49_spill] sm:$0xff] }
 0x6f0   : > { %3008 = vst [vmem:[#allocation13 + $0x78] sm:$0xff] %v2948_v33  ;;  %v2922_v35 = vsel %vm2921_vm8, %v7218_v61, %v2920_v43  ;;  %v2927_v63 = vmul.f32 %v4100_v40, %v7220_v49  ;;  %v2954_v24 = vsub.f32 0.0, %v6329_v26  ;;  %v2955_v27 = vsub.f32 0.0, %v6341_v59  ;;  %3009 = vst [vmem:[#allocation13 + $0x80] sm:$0xff] %v2949_v41  ;;  %v7233_v36 = vld [vmem:[#allocation53_spill] sm:$0xff] }
 0x6f1   : > { %3010 = vst [vmem:[#allocation13 + $0x88] sm:$0xff] %v2950_v48  ;;  %v6766_v11 = vsel %vm2923_vm2, %v2924_v42, %v2922_v35  ;;  %v2956_v46 = vsub.f32 0.0, %v6359_v56  ;;  %v2957_v12 = vsub.f32 0.0, %v6363_v22  ;;  %v2958_v45 = vsub.f32 0.0, %v6375_v44  ;;  %3011 = vst [vmem:[#allocation13 + $0x90] sm:$0xff] %v2951_v2  ;;  %v7222_v22 = vld [vmem:[#allocation43_spill] sm:$0xff] }
 0x6f2   : > { %3012 = vst [vmem:[#allocation13 + $0x98] sm:$0xff] %v2952_v25  ;;  %3013 = vst [vmem:[#allocation13 + $0xa0] sm:$0xff] %v2953_v17  ;;  %v2929_v26 = vsel %vm2928_vm7, %v7220_v49, %v2927_v63  ;;  %v2959_v59 = vsub.f32 0.0, %v6379_v21  ;;  %v2960_v34 = vsub.f32 0.0, %v6392_v4  ;;  %v2961_v61 = vsub.f32 0.0, %v6406_v57  ;;  %v7223_v42 = vld [vmem:[#allocation44_spill] sm:$0xff] }
 0x6f3   : > { %3014 = vst [vmem:[#allocation13 + $0xa8] sm:$0xff] %v2954_v24  ;;  %3015 = vst [vmem:[#allocation13 + $0xb0] sm:$0xff] %v2955_v27  ;;  %v6781_v56 = vsel %vm2930_vm5, %v2931_v53, %v2929_v26  ;;  %v2962_v44 = vsub.f32 0.0, %v7222_v22  ;;  %v2963_v23 = vsub.f32 0.0, %v7223_v42  ;;  %v2964_v9 = vsub.f32 0.0, %v6450_v1  ;;  %v7224_v57 = vld [vmem:[#allocation45_spill] sm:$0xff] }
 0x6f4   : > { %3016 = vst [vmem:[#allocation13 + $0xb8] sm:$0xff] %v2956_v46  ;;  %3017 = vst [vmem:[#allocation13 + $0xc0] sm:$0xff] %v2957_v12  ;;  %v2965_v21 = vsub.f32 0.0, %v6466_v0  ;;  %v2966_v4 = vsub.f32 0.0, %v6474_v32  ;;  %v2967_v18 = vsub.f32 0.0, %v7224_v57  ;;  %v2968_v62 = vsub.f32 0.0, %v6500_v37 }
 0x6f5   : > { %3018 = vst [vmem:[#allocation13 + $0xc8] sm:$0xff] %v2958_v45  ;;  %3019 = vst [vmem:[#allocation13 + $0xd0] sm:$0xff] %v2959_v59  ;;  %v2969_v49 = vsub.f32 0.0, %v6510_v8  ;;  %v7225_v53 = vld [vmem:[#allocation50_spill] sm:$0xff]  ;;  %v2971_v1 = vsub.f32 0.0, %v7226_v13  ;;  %v2972_v14 = vsub.f32 0.0, %v7227_v5 }
 0x6f6   : > { %3020 = vst [vmem:[#allocation13 + $0xd8] sm:$0xff] %v2960_v34  ;;  %3021 = vst [vmem:[#allocation13 + $0xe0] sm:$0xff] %v2961_v61  ;;  %v2970_v15 = vsub.f32 0.0, %v7225_v53  ;;  %v7228_v0 = vld [vmem:[#allocation46_spill] sm:$0xff]  ;;  %v2974_v58 = vsub.f32 0.0, %v7229_v39  ;;  %v2975_v37 = vsub.f32 0.0, %v7230_v47 }
 0x6f7   : > { %3022 = vst [vmem:[#allocation13 + $0xe8] sm:$0xff] %v2962_v44  ;;  %3023 = vst [vmem:[#allocation13 + $0xf0] sm:$0xff] %v2963_v23  ;;  %v2973_v32 = vsub.f32 0.0, %v7228_v0  ;;  %v2976_v29 = vsub.f32 0.0, %v7231_v51  ;;  %v7232_v8 = vld [vmem:[#allocation55_spill] sm:$0xff]  ;;  %v2978_v31 = vsub.f32 0.0, %v7233_v36 }
 0x6f8   : > { %3024 = vst [vmem:[#allocation13 + $0xf8] sm:$0xff] %v2964_v9  ;;  %3025 = vst [vmem:[#allocation13 + $0x100] sm:$0xff] %v2965_v21  ;;  %v2977_v54 = vsub.f32 0.0, %v7232_v8  ;;  %v2979_v19 = vsub.f32 0.0, %v6635_v16  ;;  %v2980_v33 = vsub.f32 0.0, %v6639_v38  ;;  %v2981_v52 = vsub.f32 0.0, %v6646_v3 }
 0x6f9   : > { %3026 = vst [vmem:[#allocation13 + $0x108] sm:$0xff] %v2966_v4  ;;  %3027 = vst [vmem:[#allocation13 + $0x110] sm:$0xff] %v2967_v18  ;;  %v2982_v43 = vsub.f32 0.0, %v6656_v7  ;;  %v2983_v41 = vsub.f32 0.0, %v6664_v55  ;;  %v2984_v48 = vsub.f32 0.0, %v6680_v50  ;;  %v2985_v16 = vsub.f32 0.0, %v6684_v60 }
 0x6fa   : > { %3028 = vst [vmem:[#allocation13 + $0x118] sm:$0xff] %v2968_v62  ;;  %3029 = vst [vmem:[#allocation13 + $0x120] sm:$0xff] %v2969_v49  ;;  %v2986_v38 = vsub.f32 0.0, %v6698_v28  ;;  %v2987_v40 = vsub.f32 0.0, %v6713_v20  ;;  %v2988_v2 = vsub.f32 0.0, %v6727_v30  ;;  %v2989_v3 = vsub.f32 0.0, %v6736_v10 }
 0x6fb   : > { %3030 = vst [vmem:[#allocation13 + $0x128] sm:$0xff] %v2970_v15  ;;  %3031 = vst [vmem:[#allocation13 + $0x130] sm:$0xff] %v2971_v1  ;;  %v2990_v7 = vsub.f32 0.0, %v6751_v6  ;;  %v2991_v55 = vsub.f32 0.0, %v6766_v11  ;;  %v2992_v50 = vsub.f32 0.0, %v6781_v56 }
 0x6fc   : > { %3032 = vst [vmem:[#allocation13 + $0x138] sm:$0xff] %v2972_v14  ;;  %3033 = vst [vmem:[#allocation13 + $0x140] sm:$0xff] %v2973_v32 }
 0x6fd   : > { %3034 = vst [vmem:[#allocation13 + $0x148] sm:$0xff] %v2974_v58  ;;  %3035 = vst [vmem:[#allocation13 + $0x150] sm:$0xff] %v2975_v37 }
 0x6fe   : > { %3036 = vst [vmem:[#allocation13 + $0x158] sm:$0xff] %v2976_v29  ;;  %3037 = vst [vmem:[#allocation13 + $0x160] sm:$0xff] %v2977_v54 }
 0x6ff   : > { %3038 = vst [vmem:[#allocation13 + $0x168] sm:$0xff] %v2978_v31  ;;  %3039 = vst [vmem:[#allocation13 + $0x170] sm:$0xff] %v2979_v19 }
 0x700   : > { %3040 = vst [vmem:[#allocation13 + $0x178] sm:$0xff] %v2980_v33  ;;  %3041 = vst [vmem:[#allocation13 + $0x180] sm:$0xff] %v2981_v52 }
 0x701   : > { %3042 = vst [vmem:[#allocation13 + $0x188] sm:$0xff] %v2982_v43  ;;  %3043 = vst [vmem:[#allocation13 + $0x190] sm:$0xff] %v2983_v41 }
 0x702   : > { %3044 = vst [vmem:[#allocation13 + $0x198] sm:$0xff] %v2984_v48  ;;  %3045 = vst [vmem:[#allocation13 + $0x1a0] sm:$0xff] %v2985_v16 }
 0x703   : > { %3046 = vst [vmem:[#allocation13 + $0x1a8] sm:$0xff] %v2986_v38  ;;  %3047 = vst [vmem:[#allocation13 + $0x1b0] sm:$0xff] %v2987_v40 }
 0x704   : > { %3048 = vst [vmem:[#allocation13 + $0x1b8] sm:$0xff] %v2988_v2  ;;  %3049 = vst [vmem:[#allocation13 + $0x1c0] sm:$0xff] %v2989_v3 }
 0x705   : > { %3050 = vst [vmem:[#allocation13 + $0x1c8] sm:$0xff] %v2990_v7  ;;  %3051 = vst [vmem:[#allocation13 + $0x1d0] sm:$0xff] %v2991_v55 }
 0x706   : > { %3052 = vst [vmem:[#allocation13 + $0x1d8] sm:$0xff] %v2992_v50 }
 0x707 PF: > { %p3799_p0 = scmp.eq.s32.totalorder %s4402_s28, 1  ;;  %s4339_s22 = smov [#allocation13]  }
 0x708   : > { %s3059_s16 = sshll.u32 %s4339_s22, 4  ;;  %s3060_s16 = int_to_ptr.vmem [resolvable:$true] %s3059_s16 }
 0x709   : > { %s4217_s11 = scalar_lea.vmem %s3060_s16, 7680  ;;  %p4224_p10 = scmp.lt.s32.totalorder %s3060_s16, %s3060_s16 }
 0x70a   : > { %p4218_p2 = scmp.ne.s32.totalorder %s3060_s16, %s4217_s11  ;;  %p4225_p1 = scmp.lt.s32.totalorder %s4217_s11, %s4217_s11 }
 0x70c   : > { %p4219_p13 = pnand %p4218_p2, %p3799_p0  ;;  %p4226_p11 = por %p4225_p1, %p4224_p10 }
 0x70e   : > { %p4220_p3 = pneg %p4219_p13 }
 0x710   : > { %p4227_p7 = pnand %p4226_p11, %p4220_p3 }
 0x712   : > { %4230 = shalt.err (!%p4227_p7)
}
 0x713   : > { %s4231_s27 = scalar_lea.hbm %s6878_s6, 7680 }
 0x714   : > { %p4232_p8 = scmp.ne.s32.totalorder %s6878_s6, %s4231_s27  ;;  %p4237_p6 = scmp.lt.u32.totalorder %s4231_s27, %s6878_s6 }
 0x716   : > { %p4233_p4 = pnand %p4232_p8, %p3799_p0 }
 0x718   : > { %p4234_p5 = pneg %p4233_p4 }
 0x71a   : > { %p4239_p9 = pnand %p4237_p6, %p4234_p5 }
 0x71c   : > { %4242 = shalt.err (!%p4239_p9)
}
 0x71d   : > { %s4340_s29 = smov 128   ;;  %s4341_s30 = smov 8  }
 0x71e   : > { %3773 = dma.vmem_to_hbm [thread:$0]  (%p3799_p0), %s3060_s16, 7680, %s6878_s6, [#allocation7], %s4340_s29, %s4340_s29, %s4341_s30  }
 0x71f   : > { %s4342_s19 = smov [#allocation14]  }
 0x720   : > { %s3072_s10 = sshll.u32 %s4342_s19, 4  ;;  %s3073_s10 = int_to_ptr.vmem [resolvable:$true] %s3072_s10 }
 0x721   : > { %s4243_s14 = scalar_lea.vmem %s3073_s10, 2048  ;;  %p4250_p3 = scmp.lt.s32.totalorder %s3073_s10, %s3073_s10 }
 0x722   : > { %p4244_p12 = scmp.ne.s32.totalorder %s3073_s10, %s4243_s14  ;;  %p4251_p10 = scmp.lt.s32.totalorder %s4243_s14, %s4243_s14 }
 0x724   : > { %p4245_p2 = pnand %p4244_p12, %p3799_p0  ;;  %p4252_p1 = por %p4251_p10, %p4250_p3 }
 0x726   : > { %p4246_p13 = pneg %p4245_p2 }
 0x728   : > { %p4253_p11 = pnand %p4252_p1, %p4246_p13 }
 0x72a   : > { %4256 = shalt.err (!%p4253_p11)
}
 0x72b   : > { %s4257_s11 = scalar_lea.hbm %s6879_s7, 2048 }
 0x72c   : > { %p4258_p7 = scmp.ne.s32.totalorder %s6879_s7, %s4257_s11  ;;  %p4263_p5 = scmp.lt.u32.totalorder %s4257_s11, %s6879_s7 }
 0x72e   : > { %p4259_p8 = pnand %p4258_p7, %p3799_p0 }
 0x730   : > { %p4260_p4 = pneg %p4259_p8 }
 0x732   : > { %p4265_p6 = pnand %p4263_p5, %p4260_p4 }
 0x734   : > { %4268 = shalt.err (!%p4265_p6)
}
 0x735   : > { %3775 = dma.vmem_to_hbm [thread:$0]  (%p3799_p0), %s3073_s10, 2048, %s6879_s7, [#allocation15], %s4340_s29, %s4340_s29, %s4341_s30  }
 0x736   : > { %4302 = dma.done.wait (%p3799_p0), [#allocation7], 7680  }
 0x737   : > { %4304 = vsyncadd (%p3799_p0), [#allocation7], 4294959616 }
 0x738   : > { %4306 = dma.done.wait (%p3799_p0), [#allocation15], 2048  }
 0x739   : > { %4308 = vsyncadd (%p3799_p0), [#allocation15], 4294965248 }
 0x73a PF: > { %p24_p9 = scmp.ge.s32.totalorder %s4483_s20, 4   ;;  %s7234_s24 = smov %s4315_s25 }
 0x73b   : > { %s7235_s25 = smov %s4319_s26  ;;  %s7236_s26 = smov %s4496_s8 }
 0x73c   : > { %s7237_s27 = smov %s4483_s20  ;;  %26 = sbr.rel (!%p24_p9) target bundleno = 8 (0x8), region = 119 }
 0x743   :  { %3092 = vsyncpa [#allocation6], 1 }
 0x744   :  { %3094 = vsyncpa [#allocation6 + $0x1], 1 }
 0x745   :  { %3095 = vsyncpa [#allocation9], 1 }
 0x746   :  { %3097 = vsyncpa [#allocation9 + $0x1], 1 }
 0x747   :  { %3098 = vsyncpa [#allocation12], 1 }
 0x748   :  { %3099 = vsyncpa [#allocation7], 1 }
 0x749   :  { %3101 = vsyncpa [#allocation7 + $0x1], 1 }
 0x74a   :  { %3102 = vsyncpa [#allocation15], 1 }

</bundles_post_ra>
